<compile_context>
chip_gen: v6e
topology: v6e:2x2x1
jax: 0.10.0
libtpu: 0.0.40
codegen_flags: <defaults>
</compile_context>

<pallas_src>
import jax
import jax.numpy as jnp
import numpy as np
from jax import lax
from jax.experimental import pallas as pl
from jax.experimental.pallas import tpu as pltpu


def _round_up(x, m):
    return (x + m - 1) // m * m


_GATE_PERM = (0, 1, 3, 2)   # PyTorch gate order [i, f, g, o] -> kernel order [i, f, o, g]


# ----------------------------------------------------------------------------
# Pallas kernel: one time-chunk of the fused forward+reverse LSTM sweep
# ----------------------------------------------------------------------------
def _bilstm_chunk_kernel(xf_ref, xr_ref, wihf_ref, wihr_ref, whhf_ref, whhr_ref,
                         bf_ref, br_ref, outf_ref, outr_ref,
                         gxf_ref, gxr_ref, hf_ref, cf_ref, hr_ref, cr_ref):
    """Inputs (all 2-D, time-major rows with all B batch rows of a step contiguous):

    xf_ref / xr_ref : (chunk*B, D) bf16. xf streams x forward in time; xr streams a
        pre-reversed copy (time-row s = x[T-1-s], zeros for s >= T) so both
        directions run in the same ascending sweep with correct zero initial state.
    wih*_ref : (D, 4H) bf16, gate columns [i, f, o, g].     whh*_ref : (H, 4H) bf16.
    b*_ref   : (1, 4H) f32 (= b_ih + b_hh).
    outf_ref : (chunk*B, H) f32, forward hiddens in time order.
    outr_ref : (chunk*B, H) f32, reverse hiddens written to mirrored rows.
    gx*_ref  : (chunk*B, 4H) f32 scratch for the per-chunk input projections.
    h*/c*_ref: (B, H) f32 state scratch, persistent across the chunk grid.
    """
    f32 = jnp.float32
    B, H = hf_ref.shape
    rows = xf_ref.shape[0]
    steps = rows // B                          # timesteps in this chunk

    # ---- Per-chunk input projections: big MXU matmuls, no HBM gate tensor. ----
    # Row-tiled so compiler temporaries stay bounded for large chunks.
    def project(x_ref, w_ref, b_ref, gx_ref):
        w = w_ref[...]
        b = b_ref[...]
        tile = min(512, rows)
        for r0 in range(0, rows, tile):
            tr = min(tile, rows - r0)
            gx_ref[r0:r0 + tr, :] = (
                jnp.dot(x_ref[r0:r0 + tr, :], w, preferred_element_type=f32) + b)

    project(xf_ref, wihf_ref, bf_ref, gxf_ref)
    project(xr_ref, wihr_ref, br_ref, gxr_ref)

    @pl.when(pl.program_id(0) == 0)
    def _():
        hf_ref[...] = jnp.zeros_like(hf_ref)
        cf_ref[...] = jnp.zeros_like(cf_ref)
        hr_ref[...] = jnp.zeros_like(hr_ref)
        cr_ref[...] = jnp.zeros_like(cr_ref)

    whh_f = whhf_ref[...]                      # resident for the whole chunk
    whh_r = whhr_ref[...]

    def cell(g_x, h, c, whh):
        gates = g_x + jnp.dot(h.astype(whh.dtype), whh, preferred_element_type=f32)
        sig = jax.nn.sigmoid(gates[:, :3 * H])          # one EUP pass over i|f|o
        i = sig[:, 0 * H:1 * H]
        f = sig[:, 1 * H:2 * H]
        o = sig[:, 2 * H:3 * H]
        g = jnp.tanh(gates[:, 3 * H:])
        c_new = f * c + i * g
        h_new = o * jnp.tanh(c_new)
        return h_new, c_new

    def step(t, carry):
        h_f, c_f, h_r, c_r = carry
        row = pl.multiple_of(t * B, B)                       # sublane-aligned
        mrow = pl.multiple_of((steps - 1 - t) * B, B)        # mirrored row for rev
        h_f, c_f = cell(gxf_ref[pl.ds(row, B)], h_f, c_f, whh_f)
        h_r, c_r = cell(gxr_ref[pl.ds(row, B)], h_r, c_r, whh_r)
        outf_ref[pl.ds(row, B)] = h_f.astype(outf_ref.dtype)
        outr_ref[pl.ds(mrow, B)] = h_r.astype(outr_ref.dtype)
        return h_f, c_f, h_r, c_r

    # State lives in vregs across the chunk: a single scratch load before the loop
    # and a single store after it -> nothing VMEM-bound on the serial critical path.
    unroll = max(1, min(8, 16384 // (B * H)))
    carry = (hf_ref[...], cf_ref[...], hr_ref[...], cr_ref[...])
    h_f, c_f, h_r, c_r = lax.fori_loop(0, steps, step, carry, unroll=unroll)
    # NOTE: after zero-padded tail steps this state is not the true (h_n, c_n); the
    # module never returns it, so this is fine.
    hf_ref[...] = h_f
    cf_ref[...] = c_f
    hr_ref[...] = h_r
    cr_ref[...] = c_r


# ----------------------------------------------------------------------------
# Wrapper: weight prep, chip-aware chunk sizing, pallas_call
# ----------------------------------------------------------------------------
def _reorder_pad_cols(w_t, H, H_pad):
    """(in_dim, 4H) torch-gate-ordered columns -> (in_dim, 4*H_pad) in [i,f,o,g]."""
    in_dim = w_t.shape[0]
    w = w_t.reshape(in_dim, 4, H)[:, jnp.array(_GATE_PERM), :]
    w = jnp.pad(w, ((0, 0), (0, 0), (0, H_pad - H)))
    return w.reshape(in_dim, 4 * H_pad)


def _prep_params(params, H, H_pad, dtype):
    out = {}
    for d in ("f", "r"):
        wih = _reorder_pad_cols(params[f"weight_ih_{d}"].T, H, H_pad).astype(dtype)
        whh = _reorder_pad_cols(params[f"weight_hh_{d}"].T, H, H_pad)
        whh = jnp.pad(whh, ((0, H_pad - H), (0, 0))).astype(dtype)
        b = (params[f"bias_ih_{d}"] + params[f"bias_hh_{d}"]).reshape(4, H)
        b = jnp.pad(b[jnp.array(_GATE_PERM)], ((0, 0), (0, H_pad - H)))
        out[d] = (wih, whh, b.reshape(1, 4 * H_pad).astype(jnp.float32))
    return out


def _vmem_plan():
    """(vmem_limit_bytes, usable budget) — chip-aware, conservative by default."""
    kind = ""
    try:
        kind = jax.devices()[0].device_kind.lower()
    except Exception:
        pass
    if ("v5" in kind) or ("v6" in kind):
        limit = 100 * 2 ** 20            # 128 MiB physical VMEM on v5e / v6e
    else:
        limit = 56 * 2 ** 20             # v7x (64 MiB physical) / unknown: stay safe
    return limit, limit - 16 * 2 ** 20   # headroom for compiler temporaries


def blstm_forward(x, params, hidden_size):
    """x: (B, T, input_size) f32 -> (B, T, hidden_size) f32 (fwd half + rev half)."""
    B, T, D = x.shape
    H = hidden_size
    H_pad = _round_up(H, 128)   # lane-dense gates/outputs; padded columns stay exactly 0
    B_pad = _round_up(B, 8)     # sublane-dense state tiles, aligned dynamic slices
    f32, bf16 = jnp.float32, jnp.bfloat16

    w = _prep_params(params, H, H_pad, bf16)
    wih_f, whh_f, b_f = w["f"]
    wih_r, whh_r, b_r = w["r"]

    # ---- chunk length from a VMEM budget (not from T) ----
    vmem_limit, budget = _vmem_plan()
    fixed = (2 * 2 * D * 4 * H_pad * 2          # wih f/r, double-buffered, bf16
             + 2 * 2 * H_pad * 4 * H_pad * 2    # whh f/r, double-buffered, bf16
             + 2 * 2 * 4 * H_pad * 4            # biases
             + 4 * B_pad * H_pad * 4)           # h/c state scratch
    per_step = B_pad * (2 * 2 * D * 2           # x fwd/rev, double-buffered, bf16
                        + 2 * 2 * H_pad * 4     # out fwd/rev, double-buffered, f32
                        + 2 * 4 * H_pad * 4)    # gx scratch fwd/rev, f32
    chunk = int(max(8, (budget - fixed) // per_step))
    chunk = min(chunk, T)
    n_chunks = int(pl.cdiv(T, chunk))
    chunk = int(pl.cdiv(T, n_chunks))           # rebalance so tail padding < n_chunks
    T_pad = n_chunks * chunk
    rows = chunk * B_pad

    # Time-major, batch-flattened inputs. The reverse stream is pre-reversed so both
    # directions sweep in ascending order starting from zero state at the true
    # sequence ends; zero tail padding only ever runs AFTER the real data.
    xt = jnp.transpose(x, (1, 0, 2)).astype(bf16)        # (T, B, D)

    def pack(x_tbd):
        buf = jnp.zeros((T_pad, B_pad, D), bf16)
        buf = buf.at[:T, :B].set(x_tbd)
        return buf.reshape(T_pad * B_pad, D)

    x_fwd = pack(xt)
    x_rev = pack(xt[::-1])

    def res_spec(shape):                                  # grid-invariant (resident)
        return pl.BlockSpec(shape, lambda c: (0, 0))

    out_f, out_r = pl.pallas_call(
        _bilstm_chunk_kernel,
        out_shape=(jax.ShapeDtypeStruct((T_pad * B_pad, H_pad), f32),
                   jax.ShapeDtypeStruct((T_pad * B_pad, H_pad), f32)),
        grid_spec=pltpu.PrefetchScalarGridSpec(
            num_scalar_prefetch=0,
            grid=(n_chunks,),
            in_specs=[
                pl.BlockSpec((rows, D), lambda c: (c, 0)),        # x forward (streamed)
                pl.BlockSpec((rows, D), lambda c: (c, 0)),        # x reversed (streamed)
                res_spec((D, 4 * H_pad)),                         # W_ih fwd
                res_spec((D, 4 * H_pad)),                         # W_ih rev
                res_spec((H_pad, 4 * H_pad)),                     # W_hh fwd
                res_spec((H_pad, 4 * H_pad)),                     # W_hh rev
                res_spec((1, 4 * H_pad)),                         # bias fwd
                res_spec((1, 4 * H_pad)),                         # bias rev
            ],
            out_specs=(
                pl.BlockSpec((rows, H_pad), lambda c: (c, 0)),                  # fwd
                pl.BlockSpec((rows, H_pad), lambda c: (n_chunks - 1 - c, 0)),   # rev (mirrored)
            ),
            scratch_shapes=[
                pltpu.VMEM((rows, 4 * H_pad), f32),    # gx fwd
                pltpu.VMEM((rows, 4 * H_pad), f32),    # gx rev
                pltpu.VMEM((B_pad, H_pad), f32),       # h fwd
                pltpu.VMEM((B_pad, H_pad), f32),       # c fwd
                pltpu.VMEM((B_pad, H_pad), f32),       # h rev
                pltpu.VMEM((B_pad, H_pad), f32),       # c rev
            ]),
        compiler_params=pltpu.CompilerParams(
            dimension_semantics=("arbitrary",),        # sequential recurrence
            vmem_limit_bytes=vmem_limit),
    )(x_fwd, x_rev, wih_f, wih_r, whh_f, whh_r, b_f, b_r)

    # out_f time-row t            = h_fwd(t)
    # out_r time-row T_pad-1-s    = h_rev(T-1-s)  ->  row (T_pad-T)+tau = h_rev(tau)
    # so one fused crop + add + transpose is the only post-kernel work.
    out_f = out_f.reshape(T_pad, B_pad, H_pad)[:T, :B, :H]
    out_r = out_r.reshape(T_pad, B_pad, H_pad)[T_pad - T:, :B, :H]
    return jnp.transpose(out_f + out_r, (1, 0, 2))


# ----------------------------------------------------------------------------
# Pure-JAX reference (PyTorch nn.LSTM semantics) and param init
# ----------------------------------------------------------------------------
def _lstm_direction_ref(x, wih, whh, bih, bhh, H, reverse):
    B, T, _ = x.shape
    h = jnp.zeros((B, H), jnp.float32)
    c = jnp.zeros((B, H), jnp.float32)
    outs = [None] * T
    order = range(T - 1, -1, -1) if reverse else range(T)
    for t in order:
        g = x[:, t, :] @ wih.T + h @ whh.T + bih + bhh
        i = jax.nn.sigmoid(g[:, 0 * H:1 * H])
        f = jax.nn.sigmoid(g[:, 1 * H:2 * H])
        gg = jnp.tanh(g[:, 2 * H:3 * H])
        o = jax.nn.sigmoid(g[:, 3 * H:4 * H])
        c = f * c + i * gg
        h = o * jnp.tanh(c)
        outs[t] = h
    return jnp.stack(outs, axis=1)


def blstm_reference(x, params, H):
    fwd = _lstm_direction_ref(x, params["weight_ih_f"], params["weight_hh_f"],
                              params["bias_ih_f"], params["bias_hh_f"], H, False)
    rev = _lstm_direction_ref(x, params["weight_ih_r"], params["weight_hh_r"],
                              params["bias_ih_r"], params["bias_hh_r"], H, True)
    return fwd + rev


def init_params(key, input_size, hidden_size):
    H = hidden_size
    k = 1.0 / np.sqrt(H)
    names_shapes = [
        ("weight_ih_f", (4 * H, input_size)), ("weight_hh_f", (4 * H, H)),
        ("bias_ih_f", (4 * H,)), ("bias_hh_f", (4 * H,)),
        ("weight_ih_r", (4 * H, input_size)), ("weight_hh_r", (4 * H, H)),
        ("bias_ih_r", (4 * H,)), ("bias_hh_r", (4 * H,)),
    ]
    params = {}
    keys = jax.random.split(key, len(names_shapes))
    for (name, shape), kk in zip(names_shapes, keys):
        params[name] = jax.random.uniform(kk, shape, jnp.float32, -k, k)
    return params


if __name__ == "__main__":
    B, T, INPUT_SIZE, HIDDEN_SIZE = 2, 8, 16, 32

    key = jax.random.PRNGKey(0)
    kx, kp = jax.random.split(key)
    x = jax.random.normal(kx, (B, T, INPUT_SIZE), jnp.float32)
    params = init_params(kp, INPUT_SIZE, HIDDEN_SIZE)

    run = jax.jit(lambda xx, pp: blstm_forward(xx, pp, HIDDEN_SIZE))
    out = jax.block_until_ready(run(x, params))

    ref = blstm_reference(x, params, HIDDEN_SIZE)
    np.testing.assert_allclose(np.asarray(out), np.asarray(ref),
                               rtol=2e-2, atol=2e-2)
    assert out.shape == (B, T, HIDDEN_SIZE)

    print("KERNEL_OK")
</pallas_src>

<mosaic_0001>
module attributes {stable_mosaic.version = 11 : i64} {
  func.func @_bilstm_chunk_kernel(%arg0: i32, %arg1: memref<64x16xbf16, #tpu.memory_space<vmem>>, %arg2: memref<64x16xbf16, #tpu.memory_space<vmem>>, %arg3: memref<16x512xbf16, #tpu.memory_space<vmem>>, %arg4: memref<16x512xbf16, #tpu.memory_space<vmem>>, %arg5: memref<128x512xbf16, #tpu.memory_space<vmem>>, %arg6: memref<128x512xbf16, #tpu.memory_space<vmem>>, %arg7: memref<1x512xf32, #tpu.memory_space<vmem>>, %arg8: memref<1x512xf32, #tpu.memory_space<vmem>>, %arg9: memref<64x128xf32, #tpu.memory_space<vmem>>, %arg10: memref<64x128xf32, #tpu.memory_space<vmem>>, %arg11: memref<64x512xf32, #tpu.memory_space<vmem>>, %arg12: memref<64x512xf32, #tpu.memory_space<vmem>>, %arg13: memref<8x128xf32, #tpu.memory_space<vmem>>, %arg14: memref<8x128xf32, #tpu.memory_space<vmem>>, %arg15: memref<8x128xf32, #tpu.memory_space<vmem>>, %arg16: memref<8x128xf32, #tpu.memory_space<vmem>>) attributes {dimension_semantics = [#tpu.dimension_semantics<arbitrary>], iteration_bounds = array<i64: 1>, scalar_prefetch = 0 : i64, scratch_operands = 6 : i64, tpu.core_type = #tpu.core_type<tc>, window_params = [{transform_indices = @transform_0, window_bounds = array<i64: 64, 16>}, {transform_indices = @transform_1, window_bounds = array<i64: 64, 16>}, {pipeline_mode = #tpu.pipeline_mode<synchronous>, transform_indices = @transform_2, window_bounds = array<i64: 16, 512>}, {pipeline_mode = #tpu.pipeline_mode<synchronous>, transform_indices = @transform_3, window_bounds = array<i64: 16, 512>}, {pipeline_mode = #tpu.pipeline_mode<synchronous>, transform_indices = @transform_4, window_bounds = array<i64: 128, 512>}, {pipeline_mode = #tpu.pipeline_mode<synchronous>, transform_indices = @transform_5, window_bounds = array<i64: 128, 512>}, {pipeline_mode = #tpu.pipeline_mode<synchronous>, transform_indices = @transform_6, window_bounds = array<i64: 1, 512>}, {pipeline_mode = #tpu.pipeline_mode<synchronous>, transform_indices = @transform_7, window_bounds = array<i64: 1, 512>}, {transform_indices = @transform_8, window_bounds = array<i64: 64, 128>}, {transform_indices = @transform_9, window_bounds = array<i64: 64, 128>}]} {
    %c0 = arith.constant 0 : index
    %c0_0 = arith.constant 0 : index
    %0 = vector.load %arg3[%c0, %c0_0] : memref<16x512xbf16, #tpu.memory_space<vmem>>, vector<16x512xbf16>
    %c0_1 = arith.constant 0 : index
    %c0_2 = arith.constant 0 : index
    %1 = vector.load %arg7[%c0_1, %c0_2] : memref<1x512xf32, #tpu.memory_space<vmem>>, vector<1x512xf32>
    %c0_3 = arith.constant 0 : index
    %c0_4 = arith.constant 0 : index
    %2 = vector.load %arg1[%c0_3, %c0_4] : memref<64x16xbf16, #tpu.memory_space<vmem>>, vector<64x16xbf16>
    %cst = arith.constant dense<0.000000e+00> : vector<64x512xf32>
    %3 = tpu.matmul %2, %0, %cst {dimension_numbers = #tpu.dot_dimension_numbers<[1], [0], [0], [1], [0, 0, 1, 1], [], []>} : vector<64x16xbf16>, vector<16x512xbf16>, vector<64x512xf32> -> vector<64x512xf32>
    %4 = vector.broadcast %1 : vector<1x512xf32> to vector<64x512xf32>
    %5 = arith.addf %3, %4 : vector<64x512xf32>
    %c0_5 = arith.constant 0 : index
    %c0_6 = arith.constant 0 : index
    %6 = vector.load %arg11[%c0_5, %c0_6] : memref<64x512xf32, #tpu.memory_space<vmem>>, vector<64x512xf32>
    tpu.vector_store %arg11[%c0_5, %c0_6], %5 {strides = array<i32>} : memref<64x512xf32, #tpu.memory_space<vmem>>, vector<64x512xf32>,
    %c0_7 = arith.constant 0 : index
    %c0_8 = arith.constant 0 : index
    %7 = vector.load %arg4[%c0_7, %c0_8] : memref<16x512xbf16, #tpu.memory_space<vmem>>, vector<16x512xbf16>
    %c0_9 = arith.constant 0 : index
    %c0_10 = arith.constant 0 : index
    %8 = vector.load %arg8[%c0_9, %c0_10] : memref<1x512xf32, #tpu.memory_space<vmem>>, vector<1x512xf32>
    %c0_11 = arith.constant 0 : index
    %c0_12 = arith.constant 0 : index
    %9 = vector.load %arg2[%c0_11, %c0_12] : memref<64x16xbf16, #tpu.memory_space<vmem>>, vector<64x16xbf16>
    %cst_13 = arith.constant dense<0.000000e+00> : vector<64x512xf32>
    %10 = tpu.matmul %9, %7, %cst_13 {dimension_numbers = #tpu.dot_dimension_numbers<[1], [0], [0], [1], [0, 0, 1, 1], [], []>} : vector<64x16xbf16>, vector<16x512xbf16>, vector<64x512xf32> -> vector<64x512xf32>
    %11 = vector.broadcast %8 : vector<1x512xf32> to vector<64x512xf32>
    %12 = arith.addf %10, %11 : vector<64x512xf32>
    %c0_14 = arith.constant 0 : index
    %c0_15 = arith.constant 0 : index
    %13 = vector.load %arg12[%c0_14, %c0_15] : memref<64x512xf32, #tpu.memory_space<vmem>>, vector<64x512xf32>
    tpu.vector_store %arg12[%c0_14, %c0_15], %12 {strides = array<i32>} : memref<64x512xf32, #tpu.memory_space<vmem>>, vector<64x512xf32>,
    %c0_i32 = arith.constant 0 : i32
    %14 = arith.cmpi eq, %arg0, %c0_i32 : i32
    %15 = arith.extui %14 : i1 to i32
    %c0_i32_16 = arith.constant 0 : i32
    %16 = arith.cmpi ne, %15, %c0_i32_16 : i32
    scf.if %16 {
      %cst_126 = arith.constant 0.000000e+00 : f32
      %435 = vector.broadcast %cst_126 : f32 to vector<8x128xf32>
      %c0_127 = arith.constant 0 : index
      %c0_128 = arith.constant 0 : index
      %436 = vector.load %arg13[%c0_127, %c0_128] : memref<8x128xf32, #tpu.memory_space<vmem>>, vector<8x128xf32>
      tpu.vector_store %arg13[%c0_127, %c0_128], %435 {strides = array<i32>} : memref<8x128xf32, #tpu.memory_space<vmem>>, vector<8x128xf32>,
      %cst_129 = arith.constant 0.000000e+00 : f32
      %437 = vector.broadcast %cst_129 : f32 to vector<8x128xf32>
      %c0_130 = arith.constant 0 : index
      %c0_131 = arith.constant 0 : index
      %438 = vector.load %arg14[%c0_130, %c0_131] : memref<8x128xf32, #tpu.memory_space<vmem>>, vector<8x128xf32>
      tpu.vector_store %arg14[%c0_130, %c0_131], %437 {strides = array<i32>} : memref<8x128xf32, #tpu.memory_space<vmem>>, vector<8x128xf32>,
      %cst_132 = arith.constant 0.000000e+00 : f32
      %439 = vector.broadcast %cst_132 : f32 to vector<8x128xf32>
      %c0_133 = arith.constant 0 : index
      %c0_134 = arith.constant 0 : index
      %440 = vector.load %arg15[%c0_133, %c0_134] : memref<8x128xf32, #tpu.memory_space<vmem>>, vector<8x128xf32>
      tpu.vector_store %arg15[%c0_133, %c0_134], %439 {strides = array<i32>} : memref<8x128xf32, #tpu.memory_space<vmem>>, vector<8x128xf32>,
      %cst_135 = arith.constant 0.000000e+00 : f32
      %441 = vector.broadcast %cst_135 : f32 to vector<8x128xf32>
      %c0_136 = arith.constant 0 : index
      %c0_137 = arith.constant 0 : index
      %442 = vector.load %arg16[%c0_136, %c0_137] : memref<8x128xf32, #tpu.memory_space<vmem>>, vector<8x128xf32>
      tpu.vector_store %arg16[%c0_136, %c0_137], %441 {strides = array<i32>} : memref<8x128xf32, #tpu.memory_space<vmem>>, vector<8x128xf32>,
    } else {
    }
    %c0_17 = arith.constant 0 : index
    %c0_18 = arith.constant 0 : index
    %17 = vector.load %arg5[%c0_17, %c0_18] : memref<128x512xbf16, #tpu.memory_space<vmem>>, vector<128x512xbf16>
    %c0_19 = arith.constant 0 : index
    %c0_20 = arith.constant 0 : index
    %18 = vector.load %arg6[%c0_19, %c0_20] : memref<128x512xbf16, #tpu.memory_space<vmem>>, vector<128x512xbf16>
    %c0_21 = arith.constant 0 : index
    %c0_22 = arith.constant 0 : index
    %19 = vector.load %arg13[%c0_21, %c0_22] : memref<8x128xf32, #tpu.memory_space<vmem>>, vector<8x128xf32>
    %c0_23 = arith.constant 0 : index
    %c0_24 = arith.constant 0 : index
    %20 = vector.load %arg14[%c0_23, %c0_24] : memref<8x128xf32, #tpu.memory_space<vmem>>, vector<8x128xf32>
    %c0_25 = arith.constant 0 : index
    %c0_26 = arith.constant 0 : index
    %21 = vector.load %arg15[%c0_25, %c0_26] : memref<8x128xf32, #tpu.memory_space<vmem>>, vector<8x128xf32>
    %c0_27 = arith.constant 0 : index
    %c0_28 = arith.constant 0 : index
    %22 = vector.load %arg16[%c0_27, %c0_28] : memref<8x128xf32, #tpu.memory_space<vmem>>, vector<8x128xf32>
    %c0_i32_29 = arith.constant 0 : i32
    %c8_i32 = arith.constant 8 : i32
    %23 = arith.muli %c0_i32_29, %c8_i32 : i32
    %24 = tpu.assume_multiple %23, 8 : i32
    %c7_i32 = arith.constant 7 : i32
    %25 = arith.subi %c7_i32, %c0_i32_29 : i32
    %c8_i32_30 = arith.constant 8 : i32
    %26 = arith.muli %25, %c8_i32_30 : i32
    %27 = tpu.assume_multiple %26, 8 : i32
    %28 = arith.index_cast %24 : i32 to index
    %c0_31 = arith.constant 0 : index
    %29 = vector.load %arg11[%28, %c0_31] : memref<64x512xf32, #tpu.memory_space<vmem>>, vector<8x512xf32>
    %30 = arith.truncf %19 : vector<8x128xf32> to vector<8x128xbf16>
    %cst_32 = arith.constant dense<0.000000e+00> : vector<8x512xf32>
    %31 = tpu.matmul %30, %17, %cst_32 {dimension_numbers = #tpu.dot_dimension_numbers<[1], [0], [0], [1], [0, 0, 1, 1], [], []>} : vector<8x128xbf16>, vector<128x512xbf16>, vector<8x512xf32> -> vector<8x512xf32>
    %32 = arith.addf %29, %31 : vector<8x512xf32>
    %33 = vector.extract_strided_slice %32 {offsets = [0, 0], sizes = [8, 384], strides = [1, 1]} : vector<8x512xf32> to vector<8x384xf32>
    %34 = arith.negf %33 : vector<8x384xf32>
    %35 = math.exp %34 : vector<8x384xf32>
    %cst_33 = arith.constant 1.000000e+00 : f32
    %36 = vector.broadcast %cst_33 : f32 to vector<8x384xf32>
    %37 = arith.addf %36, %35 : vector<8x384xf32>
    %38 = arith.divf %36, %37 : vector<8x384xf32>
    %39 = vector.extract_strided_slice %38 {offsets = [0, 0], sizes = [8, 128], strides = [1, 1]} : vector<8x384xf32> to vector<8x128xf32>
    %40 = vector.extract_strided_slice %38 {offsets = [0, 128], sizes = [8, 128], strides = [1, 1]} : vector<8x384xf32> to vector<8x128xf32>
    %41 = vector.extract_strided_slice %38 {offsets = [0, 256], sizes = [8, 128], strides = [1, 1]} : vector<8x384xf32> to vector<8x128xf32>
    %42 = vector.extract_strided_slice %32 {offsets = [0, 384], sizes = [8, 128], strides = [1, 1]} : vector<8x512xf32> to vector<8x128xf32>
    %43 = math.tanh %42 : vector<8x128xf32>
    %44 = arith.mulf %40, %20 : vector<8x128xf32>
    %45 = arith.mulf %39, %43 : vector<8x128xf32>
    %46 = arith.addf %44, %45 : vector<8x128xf32>
    %47 = math.tanh %46 : vector<8x128xf32>
    %48 = arith.mulf %41, %47 : vector<8x128xf32>
    %49 = arith.index_cast %24 : i32 to index
    %c0_34 = arith.constant 0 : index
    %50 = vector.load %arg12[%49, %c0_34] : memref<64x512xf32, #tpu.memory_space<vmem>>, vector<8x512xf32>
    %51 = arith.truncf %21 : vector<8x128xf32> to vector<8x128xbf16>
    %cst_35 = arith.constant dense<0.000000e+00> : vector<8x512xf32>
    %52 = tpu.matmul %51, %18, %cst_35 {dimension_numbers = #tpu.dot_dimension_numbers<[1], [0], [0], [1], [0, 0, 1, 1], [], []>} : vector<8x128xbf16>, vector<128x512xbf16>, vector<8x512xf32> -> vector<8x512xf32>
    %53 = arith.addf %50, %52 : vector<8x512xf32>
    %54 = vector.extract_strided_slice %53 {offsets = [0, 0], sizes = [8, 384], strides = [1, 1]} : vector<8x512xf32> to vector<8x384xf32>
    %55 = arith.negf %54 : vector<8x384xf32>
    %56 = math.exp %55 : vector<8x384xf32>
    %cst_36 = arith.constant 1.000000e+00 : f32
    %57 = vector.broadcast %cst_36 : f32 to vector<8x384xf32>
    %58 = arith.addf %57, %56 : vector<8x384xf32>
    %59 = arith.divf %57, %58 : vector<8x384xf32>
    %60 = vector.extract_strided_slice %59 {offsets = [0, 0], sizes = [8, 128], strides = [1, 1]} : vector<8x384xf32> to vector<8x128xf32>
    %61 = vector.extract_strided_slice %59 {offsets = [0, 128], sizes = [8, 128], strides = [1, 1]} : vector<8x384xf32> to vector<8x128xf32>
    %62 = vector.extract_strided_slice %59 {offsets = [0, 256], sizes = [8, 128], strides = [1, 1]} : vector<8x384xf32> to vector<8x128xf32>
    %63 = vector.extract_strided_slice %53 {offsets = [0, 384], sizes = [8, 128], strides = [1, 1]} : vector<8x512xf32> to vector<8x128xf32>
    %64 = math.tanh %63 : vector<8x128xf32>
    %65 = arith.mulf %61, %22 : vector<8x128xf32>
    %66 = arith.mulf %60, %64 : vector<8x128xf32>
    %67 = arith.addf %65, %66 : vector<8x128xf32>
    %68 = math.tanh %67 : vector<8x128xf32>
    %69 = arith.mulf %62, %68 : vector<8x128xf32>
    %70 = arith.index_cast %24 : i32 to index
    %c0_37 = arith.constant 0 : index
    %71 = vector.load %arg9[%70, %c0_37] : memref<64x128xf32, #tpu.memory_space<vmem>>, vector<8x128xf32>
    tpu.vector_store %arg9[%70, %c0_37], %48 {strides = array<i32>} : memref<64x128xf32, #tpu.memory_space<vmem>>, vector<8x128xf32>,
    %72 = arith.index_cast %27 : i32 to index
    %c0_38 = arith.constant 0 : index
    %73 = vector.load %arg10[%72, %c0_38] : memref<64x128xf32, #tpu.memory_space<vmem>>, vector<8x128xf32>
    tpu.vector_store %arg10[%72, %c0_38], %69 {strides = array<i32>} : memref<64x128xf32, #tpu.memory_space<vmem>>, vector<8x128xf32>,
    %c1_i32 = arith.constant 1 : i32
    %c8_i32_39 = arith.constant 8 : i32
    %74 = arith.muli %c1_i32, %c8_i32_39 : i32
    %75 = tpu.assume_multiple %74, 8 : i32
    %c7_i32_40 = arith.constant 7 : i32
    %76 = arith.subi %c7_i32_40, %c1_i32 : i32
    %c8_i32_41 = arith.constant 8 : i32
    %77 = arith.muli %76, %c8_i32_41 : i32
    %78 = tpu.assume_multiple %77, 8 : i32
    %79 = arith.index_cast %75 : i32 to index
    %c0_42 = arith.constant 0 : index
    %80 = vector.load %arg11[%79, %c0_42] : memref<64x512xf32, #tpu.memory_space<vmem>>, vector<8x512xf32>
    %81 = arith.truncf %48 : vector<8x128xf32> to vector<8x128xbf16>
    %cst_43 = arith.constant dense<0.000000e+00> : vector<8x512xf32>
    %82 = tpu.matmul %81, %17, %cst_43 {dimension_numbers = #tpu.dot_dimension_numbers<[1], [0], [0], [1], [0, 0, 1, 1], [], []>} : vector<8x128xbf16>, vector<128x512xbf16>, vector<8x512xf32> -> vector<8x512xf32>
    %83 = arith.addf %80, %82 : vector<8x512xf32>
    %84 = vector.extract_strided_slice %83 {offsets = [0, 0], sizes = [8, 384], strides = [1, 1]} : vector<8x512xf32> to vector<8x384xf32>
    %85 = arith.negf %84 : vector<8x384xf32>
    %86 = math.exp %85 : vector<8x384xf32>
    %cst_44 = arith.constant 1.000000e+00 : f32
    %87 = vector.broadcast %cst_44 : f32 to vector<8x384xf32>
    %88 = arith.addf %87, %86 : vector<8x384xf32>
    %89 = arith.divf %87, %88 : vector<8x384xf32>
    %90 = vector.extract_strided_slice %89 {offsets = [0, 0], sizes = [8, 128], strides = [1, 1]} : vector<8x384xf32> to vector<8x128xf32>
    %91 = vector.extract_strided_slice %89 {offsets = [0, 128], sizes = [8, 128], strides = [1, 1]} : vector<8x384xf32> to vector<8x128xf32>
    %92 = vector.extract_strided_slice %89 {offsets = [0, 256], sizes = [8, 128], strides = [1, 1]} : vector<8x384xf32> to vector<8x128xf32>
    %93 = vector.extract_strided_slice %83 {offsets = [0, 384], sizes = [8, 128], strides = [1, 1]} : vector<8x512xf32> to vector<8x128xf32>
    %94 = math.tanh %93 : vector<8x128xf32>
    %95 = arith.mulf %91, %46 : vector<8x128xf32>
    %96 = arith.mulf %90, %94 : vector<8x128xf32>
    %97 = arith.addf %95, %96 : vector<8x128xf32>
    %98 = math.tanh %97 : vector<8x128xf32>
    %99 = arith.mulf %92, %98 : vector<8x128xf32>
    %100 = arith.index_cast %75 : i32 to index
    %c0_45 = arith.constant 0 : index
    %101 = vector.load %arg12[%100, %c0_45] : memref<64x512xf32, #tpu.memory_space<vmem>>, vector<8x512xf32>
    %102 = arith.truncf %69 : vector<8x128xf32> to vector<8x128xbf16>
    %cst_46 = arith.constant dense<0.000000e+00> : vector<8x512xf32>
    %103 = tpu.matmul %102, %18, %cst_46 {dimension_numbers = #tpu.dot_dimension_numbers<[1], [0], [0], [1], [0, 0, 1, 1], [], []>} : vector<8x128xbf16>, vector<128x512xbf16>, vector<8x512xf32> -> vector<8x512xf32>
    %104 = arith.addf %101, %103 : vector<8x512xf32>
    %105 = vector.extract_strided_slice %104 {offsets = [0, 0], sizes = [8, 384], strides = [1, 1]} : vector<8x512xf32> to vector<8x384xf32>
    %106 = arith.negf %105 : vector<8x384xf32>
    %107 = math.exp %106 : vector<8x384xf32>
    %cst_47 = arith.constant 1.000000e+00 : f32
    %108 = vector.broadcast %cst_47 : f32 to vector<8x384xf32>
    %109 = arith.addf %108, %107 : vector<8x384xf32>
    %110 = arith.divf %108, %109 : vector<8x384xf32>
    %111 = vector.extract_strided_slice %110 {offsets = [0, 0], sizes = [8, 128], strides = [1, 1]} : vector<8x384xf32> to vector<8x128xf32>
    %112 = vector.extract_strided_slice %110 {offsets = [0, 128], sizes = [8, 128], strides = [1, 1]} : vector<8x384xf32> to vector<8x128xf32>
    %113 = vector.extract_strided_slice %110 {offsets = [0, 256], sizes = [8, 128], strides = [1, 1]} : vector<8x384xf32> to vector<8x128xf32>
    %114 = vector.extract_strided_slice %104 {offsets = [0, 384], sizes = [8, 128], strides = [1, 1]} : vector<8x512xf32> to vector<8x128xf32>
    %115 = math.tanh %114 : vector<8x128xf32>
    %116 = arith.mulf %112, %67 : vector<8x128xf32>
    %117 = arith.mulf %111, %115 : vector<8x128xf32>
    %118 = arith.addf %116, %117 : vector<8x128xf32>
    %119 = math.tanh %118 : vector<8x128xf32>
    %120 = arith.mulf %113, %119 : vector<8x128xf32>
    %121 = arith.index_cast %75 : i32 to index
    %c0_48 = arith.constant 0 : index
    %122 = vector.load %arg9[%121, %c0_48] : memref<64x128xf32, #tpu.memory_space<vmem>>, vector<8x128xf32>
    tpu.vector_store %arg9[%121, %c0_48], %99 {strides = array<i32>} : memref<64x128xf32, #tpu.memory_space<vmem>>, vector<8x128xf32>,
    %123 = arith.index_cast %78 : i32 to index
    %c0_49 = arith.constant 0 : index
    %124 = vector.load %arg10[%123, %c0_49] : memref<64x128xf32, #tpu.memory_space<vmem>>, vector<8x128xf32>
    tpu.vector_store %arg10[%123, %c0_49], %120 {strides = array<i32>} : memref<64x128xf32, #tpu.memory_space<vmem>>, vector<8x128xf32>,
    %c2_i32 = arith.constant 2 : i32
    %c8_i32_50 = arith.constant 8 : i32
    %125 = arith.muli %c2_i32, %c8_i32_50 : i32
    %126 = tpu.assume_multiple %125, 8 : i32
    %c7_i32_51 = arith.constant 7 : i32
    %127 = arith.subi %c7_i32_51, %c2_i32 : i32
    %c8_i32_52 = arith.constant 8 : i32
    %128 = arith.muli %127, %c8_i32_52 : i32
    %129 = tpu.assume_multiple %128, 8 : i32
    %130 = arith.index_cast %126 : i32 to index
    %c0_53 = arith.constant 0 : index
    %131 = vector.load %arg11[%130, %c0_53] : memref<64x512xf32, #tpu.memory_space<vmem>>, vector<8x512xf32>
    %132 = arith.truncf %99 : vector<8x128xf32> to vector<8x128xbf16>
    %cst_54 = arith.constant dense<0.000000e+00> : vector<8x512xf32>
    %133 = tpu.matmul %132, %17, %cst_54 {dimension_numbers = #tpu.dot_dimension_numbers<[1], [0], [0], [1], [0, 0, 1, 1], [], []>} : vector<8x128xbf16>, vector<128x512xbf16>, vector<8x512xf32> -> vector<8x512xf32>
    %134 = arith.addf %131, %133 : vector<8x512xf32>
    %135 = vector.extract_strided_slice %134 {offsets = [0, 0], sizes = [8, 384], strides = [1, 1]} : vector<8x512xf32> to vector<8x384xf32>
    %136 = arith.negf %135 : vector<8x384xf32>
    %137 = math.exp %136 : vector<8x384xf32>
    %cst_55 = arith.constant 1.000000e+00 : f32
    %138 = vector.broadcast %cst_55 : f32 to vector<8x384xf32>
    %139 = arith.addf %138, %137 : vector<8x384xf32>
    %140 = arith.divf %138, %139 : vector<8x384xf32>
    %141 = vector.extract_strided_slice %140 {offsets = [0, 0], sizes = [8, 128], strides = [1, 1]} : vector<8x384xf32> to vector<8x128xf32>
    %142 = vector.extract_strided_slice %140 {offsets = [0, 128], sizes = [8, 128], strides = [1, 1]} : vector<8x384xf32> to vector<8x128xf32>
    %143 = vector.extract_strided_slice %140 {offsets = [0, 256], sizes = [8, 128], strides = [1, 1]} : vector<8x384xf32> to vector<8x128xf32>
    %144 = vector.extract_strided_slice %134 {offsets = [0, 384], sizes = [8, 128], strides = [1, 1]} : vector<8x512xf32> to vector<8x128xf32>
    %145 = math.tanh %144 : vector<8x128xf32>
    %146 = arith.mulf %142, %97 : vector<8x128xf32>
    %147 = arith.mulf %141, %145 : vector<8x128xf32>
    %148 = arith.addf %146, %147 : vector<8x128xf32>
    %149 = math.tanh %148 : vector<8x128xf32>
    %150 = arith.mulf %143, %149 : vector<8x128xf32>
    %151 = arith.index_cast %126 : i32 to index
    %c0_56 = arith.constant 0 : index
    %152 = vector.load %arg12[%151, %c0_56] : memref<64x512xf32, #tpu.memory_space<vmem>>, vector<8x512xf32>
    %153 = arith.truncf %120 : vector<8x128xf32> to vector<8x128xbf16>
    %cst_57 = arith.constant dense<0.000000e+00> : vector<8x512xf32>
    %154 = tpu.matmul %153, %18, %cst_57 {dimension_numbers = #tpu.dot_dimension_numbers<[1], [0], [0], [1], [0, 0, 1, 1], [], []>} : vector<8x128xbf16>, vector<128x512xbf16>, vector<8x512xf32> -> vector<8x512xf32>
    %155 = arith.addf %152, %154 : vector<8x512xf32>
    %156 = vector.extract_strided_slice %155 {offsets = [0, 0], sizes = [8, 384], strides = [1, 1]} : vector<8x512xf32> to vector<8x384xf32>
    %157 = arith.negf %156 : vector<8x384xf32>
    %158 = math.exp %157 : vector<8x384xf32>
    %cst_58 = arith.constant 1.000000e+00 : f32
    %159 = vector.broadcast %cst_58 : f32 to vector<8x384xf32>
    %160 = arith.addf %159, %158 : vector<8x384xf32>
    %161 = arith.divf %159, %160 : vector<8x384xf32>
    %162 = vector.extract_strided_slice %161 {offsets = [0, 0], sizes = [8, 128], strides = [1, 1]} : vector<8x384xf32> to vector<8x128xf32>
    %163 = vector.extract_strided_slice %161 {offsets = [0, 128], sizes = [8, 128], strides = [1, 1]} : vector<8x384xf32> to vector<8x128xf32>
    %164 = vector.extract_strided_slice %161 {offsets = [0, 256], sizes = [8, 128], strides = [1, 1]} : vector<8x384xf32> to vector<8x128xf32>
    %165 = vector.extract_strided_slice %155 {offsets = [0, 384], sizes = [8, 128], strides = [1, 1]} : vector<8x512xf32> to vector<8x128xf32>
    %166 = math.tanh %165 : vector<8x128xf32>
    %167 = arith.mulf %163, %118 : vector<8x128xf32>
    %168 = arith.mulf %162, %166 : vector<8x128xf32>
    %169 = arith.addf %167, %168 : vector<8x128xf32>
    %170 = math.tanh %169 : vector<8x128xf32>
    %171 = arith.mulf %164, %170 : vector<8x128xf32>
    %172 = arith.index_cast %126 : i32 to index
    %c0_59 = arith.constant 0 : index
    %173 = vector.load %arg9[%172, %c0_59] : memref<64x128xf32, #tpu.memory_space<vmem>>, vector<8x128xf32>
    tpu.vector_store %arg9[%172, %c0_59], %150 {strides = array<i32>} : memref<64x128xf32, #tpu.memory_space<vmem>>, vector<8x128xf32>,
    %174 = arith.index_cast %129 : i32 to index
    %c0_60 = arith.constant 0 : index
    %175 = vector.load %arg10[%174, %c0_60] : memref<64x128xf32, #tpu.memory_space<vmem>>, vector<8x128xf32>
    tpu.vector_store %arg10[%174, %c0_60], %171 {strides = array<i32>} : memref<64x128xf32, #tpu.memory_space<vmem>>, vector<8x128xf32>,
    %c3_i32 = arith.constant 3 : i32
    %c8_i32_61 = arith.constant 8 : i32
    %176 = arith.muli %c3_i32, %c8_i32_61 : i32
    %177 = tpu.assume_multiple %176, 8 : i32
    %c7_i32_62 = arith.constant 7 : i32
    %178 = arith.subi %c7_i32_62, %c3_i32 : i32
    %c8_i32_63 = arith.constant 8 : i32
    %179 = arith.muli %178, %c8_i32_63 : i32
    %180 = tpu.assume_multiple %179, 8 : i32
    %181 = arith.index_cast %177 : i32 to index
    %c0_64 = arith.constant 0 : index
    %182 = vector.load %arg11[%181, %c0_64] : memref<64x512xf32, #tpu.memory_space<vmem>>, vector<8x512xf32>
    %183 = arith.truncf %150 : vector<8x128xf32> to vector<8x128xbf16>
    %cst_65 = arith.constant dense<0.000000e+00> : vector<8x512xf32>
    %184 = tpu.matmul %183, %17, %cst_65 {dimension_numbers = #tpu.dot_dimension_numbers<[1], [0], [0], [1], [0, 0, 1, 1], [], []>} : vector<8x128xbf16>, vector<128x512xbf16>, vector<8x512xf32> -> vector<8x512xf32>
    %185 = arith.addf %182, %184 : vector<8x512xf32>
    %186 = vector.extract_strided_slice %185 {offsets = [0, 0], sizes = [8, 384], strides = [1, 1]} : vector<8x512xf32> to vector<8x384xf32>
    %187 = arith.negf %186 : vector<8x384xf32>
    %188 = math.exp %187 : vector<8x384xf32>
    %cst_66 = arith.constant 1.000000e+00 : f32
    %189 = vector.broadcast %cst_66 : f32 to vector<8x384xf32>
    %190 = arith.addf %189, %188 : vector<8x384xf32>
    %191 = arith.divf %189, %190 : vector<8x384xf32>
    %192 = vector.extract_strided_slice %191 {offsets = [0, 0], sizes = [8, 128], strides = [1, 1]} : vector<8x384xf32> to vector<8x128xf32>
    %193 = vector.extract_strided_slice %191 {offsets = [0, 128], sizes = [8, 128], strides = [1, 1]} : vector<8x384xf32> to vector<8x128xf32>
    %194 = vector.extract_strided_slice %191 {offsets = [0, 256], sizes = [8, 128], strides = [1, 1]} : vector<8x384xf32> to vector<8x128xf32>
    %195 = vector.extract_strided_slice %185 {offsets = [0, 384], sizes = [8, 128], strides = [1, 1]} : vector<8x512xf32> to vector<8x128xf32>
    %196 = math.tanh %195 : vector<8x128xf32>
    %197 = arith.mulf %193, %148 : vector<8x128xf32>
    %198 = arith.mulf %192, %196 : vector<8x128xf32>
    %199 = arith.addf %197, %198 : vector<8x128xf32>
    %200 = math.tanh %199 : vector<8x128xf32>
    %201 = arith.mulf %194, %200 : vector<8x128xf32>
    %202 = arith.index_cast %177 : i32 to index
    %c0_67 = arith.constant 0 : index
    %203 = vector.load %arg12[%202, %c0_67] : memref<64x512xf32, #tpu.memory_space<vmem>>, vector<8x512xf32>
    %204 = arith.truncf %171 : vector<8x128xf32> to vector<8x128xbf16>
    %cst_68 = arith.constant dense<0.000000e+00> : vector<8x512xf32>
    %205 = tpu.matmul %204, %18, %cst_68 {dimension_numbers = #tpu.dot_dimension_numbers<[1], [0], [0], [1], [0, 0, 1, 1], [], []>} : vector<8x128xbf16>, vector<128x512xbf16>, vector<8x512xf32> -> vector<8x512xf32>
    %206 = arith.addf %203, %205 : vector<8x512xf32>
    %207 = vector.extract_strided_slice %206 {offsets = [0, 0], sizes = [8, 384], strides = [1, 1]} : vector<8x512xf32> to vector<8x384xf32>
    %208 = arith.negf %207 : vector<8x384xf32>
    %209 = math.exp %208 : vector<8x384xf32>
    %cst_69 = arith.constant 1.000000e+00 : f32
    %210 = vector.broadcast %cst_69 : f32 to vector<8x384xf32>
    %211 = arith.addf %210, %209 : vector<8x384xf32>
    %212 = arith.divf %210, %211 : vector<8x384xf32>
    %213 = vector.extract_strided_slice %212 {offsets = [0, 0], sizes = [8, 128], strides = [1, 1]} : vector<8x384xf32> to vector<8x128xf32>
    %214 = vector.extract_strided_slice %212 {offsets = [0, 128], sizes = [8, 128], strides = [1, 1]} : vector<8x384xf32> to vector<8x128xf32>
    %215 = vector.extract_strided_slice %212 {offsets = [0, 256], sizes = [8, 128], strides = [1, 1]} : vector<8x384xf32> to vector<8x128xf32>
    %216 = vector.extract_strided_slice %206 {offsets = [0, 384], sizes = [8, 128], strides = [1, 1]} : vector<8x512xf32> to vector<8x128xf32>
    %217 = math.tanh %216 : vector<8x128xf32>
    %218 = arith.mulf %214, %169 : vector<8x128xf32>
    %219 = arith.mulf %213, %217 : vector<8x128xf32>
    %220 = arith.addf %218, %219 : vector<8x128xf32>
    %221 = math.tanh %220 : vector<8x128xf32>
    %222 = arith.mulf %215, %221 : vector<8x128xf32>
    %223 = arith.index_cast %177 : i32 to index
    %c0_70 = arith.constant 0 : index
    %224 = vector.load %arg9[%223, %c0_70] : memref<64x128xf32, #tpu.memory_space<vmem>>, vector<8x128xf32>
    tpu.vector_store %arg9[%223, %c0_70], %201 {strides = array<i32>} : memref<64x128xf32, #tpu.memory_space<vmem>>, vector<8x128xf32>,
    %225 = arith.index_cast %180 : i32 to index
    %c0_71 = arith.constant 0 : index
    %226 = vector.load %arg10[%225, %c0_71] : memref<64x128xf32, #tpu.memory_space<vmem>>, vector<8x128xf32>
    tpu.vector_store %arg10[%225, %c0_71], %222 {strides = array<i32>} : memref<64x128xf32, #tpu.memory_space<vmem>>, vector<8x128xf32>,
    %c4_i32 = arith.constant 4 : i32
    %c8_i32_72 = arith.constant 8 : i32
    %227 = arith.muli %c4_i32, %c8_i32_72 : i32
    %228 = tpu.assume_multiple %227, 8 : i32
    %c7_i32_73 = arith.constant 7 : i32
    %229 = arith.subi %c7_i32_73, %c4_i32 : i32
    %c8_i32_74 = arith.constant 8 : i32
    %230 = arith.muli %229, %c8_i32_74 : i32
    %231 = tpu.assume_multiple %230, 8 : i32
    %232 = arith.index_cast %228 : i32 to index
    %c0_75 = arith.constant 0 : index
    %233 = vector.load %arg11[%232, %c0_75] : memref<64x512xf32, #tpu.memory_space<vmem>>, vector<8x512xf32>
    %234 = arith.truncf %201 : vector<8x128xf32> to vector<8x128xbf16>
    %cst_76 = arith.constant dense<0.000000e+00> : vector<8x512xf32>
    %235 = tpu.matmul %234, %17, %cst_76 {dimension_numbers = #tpu.dot_dimension_numbers<[1], [0], [0], [1], [0, 0, 1, 1], [], []>} : vector<8x128xbf16>, vector<128x512xbf16>, vector<8x512xf32> -> vector<8x512xf32>
    %236 = arith.addf %233, %235 : vector<8x512xf32>
    %237 = vector.extract_strided_slice %236 {offsets = [0, 0], sizes = [8, 384], strides = [1, 1]} : vector<8x512xf32> to vector<8x384xf32>
    %238 = arith.negf %237 : vector<8x384xf32>
    %239 = math.exp %238 : vector<8x384xf32>
    %cst_77 = arith.constant 1.000000e+00 : f32
    %240 = vector.broadcast %cst_77 : f32 to vector<8x384xf32>
    %241 = arith.addf %240, %239 : vector<8x384xf32>
    %242 = arith.divf %240, %241 : vector<8x384xf32>
    %243 = vector.extract_strided_slice %242 {offsets = [0, 0], sizes = [8, 128], strides = [1, 1]} : vector<8x384xf32> to vector<8x128xf32>
    %244 = vector.extract_strided_slice %242 {offsets = [0, 128], sizes = [8, 128], strides = [1, 1]} : vector<8x384xf32> to vector<8x128xf32>
    %245 = vector.extract_strided_slice %242 {offsets = [0, 256], sizes = [8, 128], strides = [1, 1]} : vector<8x384xf32> to vector<8x128xf32>
    %246 = vector.extract_strided_slice %236 {offsets = [0, 384], sizes = [8, 128], strides = [1, 1]} : vector<8x512xf32> to vector<8x128xf32>
    %247 = math.tanh %246 : vector<8x128xf32>
    %248 = arith.mulf %244, %199 : vector<8x128xf32>
    %249 = arith.mulf %243, %247 : vector<8x128xf32>
    %250 = arith.addf %248, %249 : vector<8x128xf32>
    %251 = math.tanh %250 : vector<8x128xf32>
    %252 = arith.mulf %245, %251 : vector<8x128xf32>
    %253 = arith.index_cast %228 : i32 to index
    %c0_78 = arith.constant 0 : index
    %254 = vector.load %arg12[%253, %c0_78] : memref<64x512xf32, #tpu.memory_space<vmem>>, vector<8x512xf32>
    %255 = arith.truncf %222 : vector<8x128xf32> to vector<8x128xbf16>
    %cst_79 = arith.constant dense<0.000000e+00> : vector<8x512xf32>
    %256 = tpu.matmul %255, %18, %cst_79 {dimension_numbers = #tpu.dot_dimension_numbers<[1], [0], [0], [1], [0, 0, 1, 1], [], []>} : vector<8x128xbf16>, vector<128x512xbf16>, vector<8x512xf32> -> vector<8x512xf32>
    %257 = arith.addf %254, %256 : vector<8x512xf32>
    %258 = vector.extract_strided_slice %257 {offsets = [0, 0], sizes = [8, 384], strides = [1, 1]} : vector<8x512xf32> to vector<8x384xf32>
    %259 = arith.negf %258 : vector<8x384xf32>
    %260 = math.exp %259 : vector<8x384xf32>
    %cst_80 = arith.constant 1.000000e+00 : f32
    %261 = vector.broadcast %cst_80 : f32 to vector<8x384xf32>
    %262 = arith.addf %261, %260 : vector<8x384xf32>
    %263 = arith.divf %261, %262 : vector<8x384xf32>
    %264 = vector.extract_strided_slice %263 {offsets = [0, 0], sizes = [8, 128], strides = [1, 1]} : vector<8x384xf32> to vector<8x128xf32>
    %265 = vector.extract_strided_slice %263 {offsets = [0, 128], sizes = [8, 128], strides = [1, 1]} : vector<8x384xf32> to vector<8x128xf32>
    %266 = vector.extract_strided_slice %263 {offsets = [0, 256], sizes = [8, 128], strides = [1, 1]} : vector<8x384xf32> to vector<8x128xf32>
    %267 = vector.extract_strided_slice %257 {offsets = [0, 384], sizes = [8, 128], strides = [1, 1]} : vector<8x512xf32> to vector<8x128xf32>
    %268 = math.tanh %267 : vector<8x128xf32>
    %269 = arith.mulf %265, %220 : vector<8x128xf32>
    %270 = arith.mulf %264, %268 : vector<8x128xf32>
    %271 = arith.addf %269, %270 : vector<8x128xf32>
    %272 = math.tanh %271 : vector<8x128xf32>
    %273 = arith.mulf %266, %272 : vector<8x128xf32>
    %274 = arith.index_cast %228 : i32 to index
    %c0_81 = arith.constant 0 : index
    %275 = vector.load %arg9[%274, %c0_81] : memref<64x128xf32, #tpu.memory_space<vmem>>, vector<8x128xf32>
    tpu.vector_store %arg9[%274, %c0_81], %252 {strides = array<i32>} : memref<64x128xf32, #tpu.memory_space<vmem>>, vector<8x128xf32>,
    %276 = arith.index_cast %231 : i32 to index
    %c0_82 = arith.constant 0 : index
    %277 = vector.load %arg10[%276, %c0_82] : memref<64x128xf32, #tpu.memory_space<vmem>>, vector<8x128xf32>
    tpu.vector_store %arg10[%276, %c0_82], %273 {strides = array<i32>} : memref<64x128xf32, #tpu.memory_space<vmem>>, vector<8x128xf32>,
    %c5_i32 = arith.constant 5 : i32
    %c8_i32_83 = arith.constant 8 : i32
    %278 = arith.muli %c5_i32, %c8_i32_83 : i32
    %279 = tpu.assume_multiple %278, 8 : i32
    %c7_i32_84 = arith.constant 7 : i32
    %280 = arith.subi %c7_i32_84, %c5_i32 : i32
    %c8_i32_85 = arith.constant 8 : i32
    %281 = arith.muli %280, %c8_i32_85 : i32
    %282 = tpu.assume_multiple %281, 8 : i32
    %283 = arith.index_cast %279 : i32 to index
    %c0_86 = arith.constant 0 : index
    %284 = vector.load %arg11[%283, %c0_86] : memref<64x512xf32, #tpu.memory_space<vmem>>, vector<8x512xf32>
    %285 = arith.truncf %252 : vector<8x128xf32> to vector<8x128xbf16>
    %cst_87 = arith.constant dense<0.000000e+00> : vector<8x512xf32>
    %286 = tpu.matmul %285, %17, %cst_87 {dimension_numbers = #tpu.dot_dimension_numbers<[1], [0], [0], [1], [0, 0, 1, 1], [], []>} : vector<8x128xbf16>, vector<128x512xbf16>, vector<8x512xf32> -> vector<8x512xf32>
    %287 = arith.addf %284, %286 : vector<8x512xf32>
    %288 = vector.extract_strided_slice %287 {offsets = [0, 0], sizes = [8, 384], strides = [1, 1]} : vector<8x512xf32> to vector<8x384xf32>
    %289 = arith.negf %288 : vector<8x384xf32>
    %290 = math.exp %289 : vector<8x384xf32>
    %cst_88 = arith.constant 1.000000e+00 : f32
    %291 = vector.broadcast %cst_88 : f32 to vector<8x384xf32>
    %292 = arith.addf %291, %290 : vector<8x384xf32>
    %293 = arith.divf %291, %292 : vector<8x384xf32>
    %294 = vector.extract_strided_slice %293 {offsets = [0, 0], sizes = [8, 128], strides = [1, 1]} : vector<8x384xf32> to vector<8x128xf32>
    %295 = vector.extract_strided_slice %293 {offsets = [0, 128], sizes = [8, 128], strides = [1, 1]} : vector<8x384xf32> to vector<8x128xf32>
    %296 = vector.extract_strided_slice %293 {offsets = [0, 256], sizes = [8, 128], strides = [1, 1]} : vector<8x384xf32> to vector<8x128xf32>
    %297 = vector.extract_strided_slice %287 {offsets = [0, 384], sizes = [8, 128], strides = [1, 1]} : vector<8x512xf32> to vector<8x128xf32>
    %298 = math.tanh %297 : vector<8x128xf32>
    %299 = arith.mulf %295, %250 : vector<8x128xf32>
    %300 = arith.mulf %294, %298 : vector<8x128xf32>
    %301 = arith.addf %299, %300 : vector<8x128xf32>
    %302 = math.tanh %301 : vector<8x128xf32>
    %303 = arith.mulf %296, %302 : vector<8x128xf32>
    %304 = arith.index_cast %279 : i32 to index
    %c0_89 = arith.constant 0 : index
    %305 = vector.load %arg12[%304, %c0_89] : memref<64x512xf32, #tpu.memory_space<vmem>>, vector<8x512xf32>
    %306 = arith.truncf %273 : vector<8x128xf32> to vector<8x128xbf16>
    %cst_90 = arith.constant dense<0.000000e+00> : vector<8x512xf32>
    %307 = tpu.matmul %306, %18, %cst_90 {dimension_numbers = #tpu.dot_dimension_numbers<[1], [0], [0], [1], [0, 0, 1, 1], [], []>} : vector<8x128xbf16>, vector<128x512xbf16>, vector<8x512xf32> -> vector<8x512xf32>
    %308 = arith.addf %305, %307 : vector<8x512xf32>
    %309 = vector.extract_strided_slice %308 {offsets = [0, 0], sizes = [8, 384], strides = [1, 1]} : vector<8x512xf32> to vector<8x384xf32>
    %310 = arith.negf %309 : vector<8x384xf32>
    %311 = math.exp %310 : vector<8x384xf32>
    %cst_91 = arith.constant 1.000000e+00 : f32
    %312 = vector.broadcast %cst_91 : f32 to vector<8x384xf32>
    %313 = arith.addf %312, %311 : vector<8x384xf32>
    %314 = arith.divf %312, %313 : vector<8x384xf32>
    %315 = vector.extract_strided_slice %314 {offsets = [0, 0], sizes = [8, 128], strides = [1, 1]} : vector<8x384xf32> to vector<8x128xf32>
    %316 = vector.extract_strided_slice %314 {offsets = [0, 128], sizes = [8, 128], strides = [1, 1]} : vector<8x384xf32> to vector<8x128xf32>
    %317 = vector.extract_strided_slice %314 {offsets = [0, 256], sizes = [8, 128], strides = [1, 1]} : vector<8x384xf32> to vector<8x128xf32>
    %318 = vector.extract_strided_slice %308 {offsets = [0, 384], sizes = [8, 128], strides = [1, 1]} : vector<8x512xf32> to vector<8x128xf32>
    %319 = math.tanh %318 : vector<8x128xf32>
    %320 = arith.mulf %316, %271 : vector<8x128xf32>
    %321 = arith.mulf %315, %319 : vector<8x128xf32>
    %322 = arith.addf %320, %321 : vector<8x128xf32>
    %323 = math.tanh %322 : vector<8x128xf32>
    %324 = arith.mulf %317, %323 : vector<8x128xf32>
    %325 = arith.index_cast %279 : i32 to index
    %c0_92 = arith.constant 0 : index
    %326 = vector.load %arg9[%325, %c0_92] : memref<64x128xf32, #tpu.memory_space<vmem>>, vector<8x128xf32>
    tpu.vector_store %arg9[%325, %c0_92], %303 {strides = array<i32>} : memref<64x128xf32, #tpu.memory_space<vmem>>, vector<8x128xf32>,
    %327 = arith.index_cast %282 : i32 to index
    %c0_93 = arith.constant 0 : index
    %328 = vector.load %arg10[%327, %c0_93] : memref<64x128xf32, #tpu.memory_space<vmem>>, vector<8x128xf32>
    tpu.vector_store %arg10[%327, %c0_93], %324 {strides = array<i32>} : memref<64x128xf32, #tpu.memory_space<vmem>>, vector<8x128xf32>,
    %c6_i32 = arith.constant 6 : i32
    %c8_i32_94 = arith.constant 8 : i32
    %329 = arith.muli %c6_i32, %c8_i32_94 : i32
    %330 = tpu.assume_multiple %329, 8 : i32
    %c7_i32_95 = arith.constant 7 : i32
    %331 = arith.subi %c7_i32_95, %c6_i32 : i32
    %c8_i32_96 = arith.constant 8 : i32
    %332 = arith.muli %331, %c8_i32_96 : i32
    %333 = tpu.assume_multiple %332, 8 : i32
    %334 = arith.index_cast %330 : i32 to index
    %c0_97 = arith.constant 0 : index
    %335 = vector.load %arg11[%334, %c0_97] : memref<64x512xf32, #tpu.memory_space<vmem>>, vector<8x512xf32>
    %336 = arith.truncf %303 : vector<8x128xf32> to vector<8x128xbf16>
    %cst_98 = arith.constant dense<0.000000e+00> : vector<8x512xf32>
    %337 = tpu.matmul %336, %17, %cst_98 {dimension_numbers = #tpu.dot_dimension_numbers<[1], [0], [0], [1], [0, 0, 1, 1], [], []>} : vector<8x128xbf16>, vector<128x512xbf16>, vector<8x512xf32> -> vector<8x512xf32>
    %338 = arith.addf %335, %337 : vector<8x512xf32>
    %339 = vector.extract_strided_slice %338 {offsets = [0, 0], sizes = [8, 384], strides = [1, 1]} : vector<8x512xf32> to vector<8x384xf32>
    %340 = arith.negf %339 : vector<8x384xf32>
    %341 = math.exp %340 : vector<8x384xf32>
    %cst_99 = arith.constant 1.000000e+00 : f32
    %342 = vector.broadcast %cst_99 : f32 to vector<8x384xf32>
    %343 = arith.addf %342, %341 : vector<8x384xf32>
    %344 = arith.divf %342, %343 : vector<8x384xf32>
    %345 = vector.extract_strided_slice %344 {offsets = [0, 0], sizes = [8, 128], strides = [1, 1]} : vector<8x384xf32> to vector<8x128xf32>
    %346 = vector.extract_strided_slice %344 {offsets = [0, 128], sizes = [8, 128], strides = [1, 1]} : vector<8x384xf32> to vector<8x128xf32>
    %347 = vector.extract_strided_slice %344 {offsets = [0, 256], sizes = [8, 128], strides = [1, 1]} : vector<8x384xf32> to vector<8x128xf32>
    %348 = vector.extract_strided_slice %338 {offsets = [0, 384], sizes = [8, 128], strides = [1, 1]} : vector<8x512xf32> to vector<8x128xf32>
    %349 = math.tanh %348 : vector<8x128xf32>
    %350 = arith.mulf %346, %301 : vector<8x128xf32>
    %351 = arith.mulf %345, %349 : vector<8x128xf32>
    %352 = arith.addf %350, %351 : vector<8x128xf32>
    %353 = math.tanh %352 : vector<8x128xf32>
    %354 = arith.mulf %347, %353 : vector<8x128xf32>
    %355 = arith.index_cast %330 : i32 to index
    %c0_100 = arith.constant 0 : index
    %356 = vector.load %arg12[%355, %c0_100] : memref<64x512xf32, #tpu.memory_space<vmem>>, vector<8x512xf32>
    %357 = arith.truncf %324 : vector<8x128xf32> to vector<8x128xbf16>
    %cst_101 = arith.constant dense<0.000000e+00> : vector<8x512xf32>
    %358 = tpu.matmul %357, %18, %cst_101 {dimension_numbers = #tpu.dot_dimension_numbers<[1], [0], [0], [1], [0, 0, 1, 1], [], []>} : vector<8x128xbf16>, vector<128x512xbf16>, vector<8x512xf32> -> vector<8x512xf32>
    %359 = arith.addf %356, %358 : vector<8x512xf32>
    %360 = vector.extract_strided_slice %359 {offsets = [0, 0], sizes = [8, 384], strides = [1, 1]} : vector<8x512xf32> to vector<8x384xf32>
    %361 = arith.negf %360 : vector<8x384xf32>
    %362 = math.exp %361 : vector<8x384xf32>
    %cst_102 = arith.constant 1.000000e+00 : f32
    %363 = vector.broadcast %cst_102 : f32 to vector<8x384xf32>
    %364 = arith.addf %363, %362 : vector<8x384xf32>
    %365 = arith.divf %363, %364 : vector<8x384xf32>
    %366 = vector.extract_strided_slice %365 {offsets = [0, 0], sizes = [8, 128], strides = [1, 1]} : vector<8x384xf32> to vector<8x128xf32>
    %367 = vector.extract_strided_slice %365 {offsets = [0, 128], sizes = [8, 128], strides = [1, 1]} : vector<8x384xf32> to vector<8x128xf32>
    %368 = vector.extract_strided_slice %365 {offsets = [0, 256], sizes = [8, 128], strides = [1, 1]} : vector<8x384xf32> to vector<8x128xf32>
    %369 = vector.extract_strided_slice %359 {offsets = [0, 384], sizes = [8, 128], strides = [1, 1]} : vector<8x512xf32> to vector<8x128xf32>
    %370 = math.tanh %369 : vector<8x128xf32>
    %371 = arith.mulf %367, %322 : vector<8x128xf32>
    %372 = arith.mulf %366, %370 : vector<8x128xf32>
    %373 = arith.addf %371, %372 : vector<8x128xf32>
    %374 = math.tanh %373 : vector<8x128xf32>
    %375 = arith.mulf %368, %374 : vector<8x128xf32>
    %376 = arith.index_cast %330 : i32 to index
    %c0_103 = arith.constant 0 : index
    %377 = vector.load %arg9[%376, %c0_103] : memref<64x128xf32, #tpu.memory_space<vmem>>, vector<8x128xf32>
    tpu.vector_store %arg9[%376, %c0_103], %354 {strides = array<i32>} : memref<64x128xf32, #tpu.memory_space<vmem>>, vector<8x128xf32>,
    %378 = arith.index_cast %333 : i32 to index
    %c0_104 = arith.constant 0 : index
    %379 = vector.load %arg10[%378, %c0_104] : memref<64x128xf32, #tpu.memory_space<vmem>>, vector<8x128xf32>
    tpu.vector_store %arg10[%378, %c0_104], %375 {strides = array<i32>} : memref<64x128xf32, #tpu.memory_space<vmem>>, vector<8x128xf32>,
    %c7_i32_105 = arith.constant 7 : i32
    %c8_i32_106 = arith.constant 8 : i32
    %380 = arith.muli %c7_i32_105, %c8_i32_106 : i32
    %381 = tpu.assume_multiple %380, 8 : i32
    %c7_i32_107 = arith.constant 7 : i32
    %382 = arith.subi %c7_i32_107, %c7_i32_105 : i32
    %c8_i32_108 = arith.constant 8 : i32
    %383 = arith.muli %382, %c8_i32_108 : i32
    %384 = tpu.assume_multiple %383, 8 : i32
    %385 = arith.index_cast %381 : i32 to index
    %c0_109 = arith.constant 0 : index
    %386 = vector.load %arg11[%385, %c0_109] : memref<64x512xf32, #tpu.memory_space<vmem>>, vector<8x512xf32>
    %387 = arith.truncf %354 : vector<8x128xf32> to vector<8x128xbf16>
    %cst_110 = arith.constant dense<0.000000e+00> : vector<8x512xf32>
    %388 = tpu.matmul %387, %17, %cst_110 {dimension_numbers = #tpu.dot_dimension_numbers<[1], [0], [0], [1], [0, 0, 1, 1], [], []>} : vector<8x128xbf16>, vector<128x512xbf16>, vector<8x512xf32> -> vector<8x512xf32>
    %389 = arith.addf %386, %388 : vector<8x512xf32>
    %390 = vector.extract_strided_slice %389 {offsets = [0, 0], sizes = [8, 384], strides = [1, 1]} : vector<8x512xf32> to vector<8x384xf32>
    %391 = arith.negf %390 : vector<8x384xf32>
    %392 = math.exp %391 : vector<8x384xf32>
    %cst_111 = arith.constant 1.000000e+00 : f32
    %393 = vector.broadcast %cst_111 : f32 to vector<8x384xf32>
    %394 = arith.addf %393, %392 : vector<8x384xf32>
    %395 = arith.divf %393, %394 : vector<8x384xf32>
    %396 = vector.extract_strided_slice %395 {offsets = [0, 0], sizes = [8, 128], strides = [1, 1]} : vector<8x384xf32> to vector<8x128xf32>
    %397 = vector.extract_strided_slice %395 {offsets = [0, 128], sizes = [8, 128], strides = [1, 1]} : vector<8x384xf32> to vector<8x128xf32>
    %398 = vector.extract_strided_slice %395 {offsets = [0, 256], sizes = [8, 128], strides = [1, 1]} : vector<8x384xf32> to vector<8x128xf32>
    %399 = vector.extract_strided_slice %389 {offsets = [0, 384], sizes = [8, 128], strides = [1, 1]} : vector<8x512xf32> to vector<8x128xf32>
    %400 = math.tanh %399 : vector<8x128xf32>
    %401 = arith.mulf %397, %352 : vector<8x128xf32>
    %402 = arith.mulf %396, %400 : vector<8x128xf32>
    %403 = arith.addf %401, %402 : vector<8x128xf32>
    %404 = math.tanh %403 : vector<8x128xf32>
    %405 = arith.mulf %398, %404 : vector<8x128xf32>
    %406 = arith.index_cast %381 : i32 to index
    %c0_112 = arith.constant 0 : index
    %407 = vector.load %arg12[%406, %c0_112] : memref<64x512xf32, #tpu.memory_space<vmem>>, vector<8x512xf32>
    %408 = arith.truncf %375 : vector<8x128xf32> to vector<8x128xbf16>
    %cst_113 = arith.constant dense<0.000000e+00> : vector<8x512xf32>
    %409 = tpu.matmul %408, %18, %cst_113 {dimension_numbers = #tpu.dot_dimension_numbers<[1], [0], [0], [1], [0, 0, 1, 1], [], []>} : vector<8x128xbf16>, vector<128x512xbf16>, vector<8x512xf32> -> vector<8x512xf32>
    %410 = arith.addf %407, %409 : vector<8x512xf32>
    %411 = vector.extract_strided_slice %410 {offsets = [0, 0], sizes = [8, 384], strides = [1, 1]} : vector<8x512xf32> to vector<8x384xf32>
    %412 = arith.negf %411 : vector<8x384xf32>
    %413 = math.exp %412 : vector<8x384xf32>
    %cst_114 = arith.constant 1.000000e+00 : f32
    %414 = vector.broadcast %cst_114 : f32 to vector<8x384xf32>
    %415 = arith.addf %414, %413 : vector<8x384xf32>
    %416 = arith.divf %414, %415 : vector<8x384xf32>
    %417 = vector.extract_strided_slice %416 {offsets = [0, 0], sizes = [8, 128], strides = [1, 1]} : vector<8x384xf32> to vector<8x128xf32>
    %418 = vector.extract_strided_slice %416 {offsets = [0, 128], sizes = [8, 128], strides = [1, 1]} : vector<8x384xf32> to vector<8x128xf32>
    %419 = vector.extract_strided_slice %416 {offsets = [0, 256], sizes = [8, 128], strides = [1, 1]} : vector<8x384xf32> to vector<8x128xf32>
    %420 = vector.extract_strided_slice %410 {offsets = [0, 384], sizes = [8, 128], strides = [1, 1]} : vector<8x512xf32> to vector<8x128xf32>
    %421 = math.tanh %420 : vector<8x128xf32>
    %422 = arith.mulf %418, %373 : vector<8x128xf32>
    %423 = arith.mulf %417, %421 : vector<8x128xf32>
    %424 = arith.addf %422, %423 : vector<8x128xf32>
    %425 = math.tanh %424 : vector<8x128xf32>
    %426 = arith.mulf %419, %425 : vector<8x128xf32>
    %427 = arith.index_cast %381 : i32 to index
    %c0_115 = arith.constant 0 : index
    %428 = vector.load %arg9[%427, %c0_115] : memref<64x128xf32, #tpu.memory_space<vmem>>, vector<8x128xf32>
    tpu.vector_store %arg9[%427, %c0_115], %405 {strides = array<i32>} : memref<64x128xf32, #tpu.memory_space<vmem>>, vector<8x128xf32>,
    %429 = arith.index_cast %384 : i32 to index
    %c0_116 = arith.constant 0 : index
    %430 = vector.load %arg10[%429, %c0_116] : memref<64x128xf32, #tpu.memory_space<vmem>>, vector<8x128xf32>
    tpu.vector_store %arg10[%429, %c0_116], %426 {strides = array<i32>} : memref<64x128xf32, #tpu.memory_space<vmem>>, vector<8x128xf32>,
    %c8_i32_117 = arith.constant 8 : i32
    %c0_118 = arith.constant 0 : index
    %c0_119 = arith.constant 0 : index
    %431 = vector.load %arg13[%c0_118, %c0_119] : memref<8x128xf32, #tpu.memory_space<vmem>>, vector<8x128xf32>
    tpu.vector_store %arg13[%c0_118, %c0_119], %405 {strides = array<i32>} : memref<8x128xf32, #tpu.memory_space<vmem>>, vector<8x128xf32>,
    %c0_120 = arith.constant 0 : index
    %c0_121 = arith.constant 0 : index
    %432 = vector.load %arg14[%c0_120, %c0_121] : memref<8x128xf32, #tpu.memory_space<vmem>>, vector<8x128xf32>
    tpu.vector_store %arg14[%c0_120, %c0_121], %403 {strides = array<i32>} : memref<8x128xf32, #tpu.memory_space<vmem>>, vector<8x128xf32>,
    %c0_122 = arith.constant 0 : index
    %c0_123 = arith.constant 0 : index
    %433 = vector.load %arg15[%c0_122, %c0_123] : memref<8x128xf32, #tpu.memory_space<vmem>>, vector<8x128xf32>
    tpu.vector_store %arg15[%c0_122, %c0_123], %426 {strides = array<i32>} : memref<8x128xf32, #tpu.memory_space<vmem>>, vector<8x128xf32>,
    %c0_124 = arith.constant 0 : index
    %c0_125 = arith.constant 0 : index
    %434 = vector.load %arg16[%c0_124, %c0_125] : memref<8x128xf32, #tpu.memory_space<vmem>>, vector<8x128xf32>
    tpu.vector_store %arg16[%c0_124, %c0_125], %424 {strides = array<i32>} : memref<8x128xf32, #tpu.memory_space<vmem>>, vector<8x128xf32>,
    return
  }
  func.func @transform_0(%arg0: i32) -> (i32, i32) {
    %c0_i32 = arith.constant 0 : i32
    %c0_i32_0 = arith.constant 0 : i32
    return %arg0, %c0_i32 : i32, i32
  }
  func.func @transform_1(%arg0: i32) -> (i32, i32) {
    %c0_i32 = arith.constant 0 : i32
    %c0_i32_0 = arith.constant 0 : i32
    return %arg0, %c0_i32 : i32, i32
  }
  func.func @transform_2(%arg0: i32) -> (i32, i32) {
    %c0_i32 = arith.constant 0 : i32
    %c0_i32_0 = arith.constant 0 : i32
    %c0_i32_1 = arith.constant 0 : i32
    return %c0_i32, %c0_i32_0 : i32, i32
  }
  func.func @transform_3(%arg0: i32) -> (i32, i32) {
    %c0_i32 = arith.constant 0 : i32
    %c0_i32_0 = arith.constant 0 : i32
    %c0_i32_1 = arith.constant 0 : i32
    return %c0_i32, %c0_i32_0 : i32, i32
  }
  func.func @transform_4(%arg0: i32) -> (i32, i32) {
    %c0_i32 = arith.constant 0 : i32
    %c0_i32_0 = arith.constant 0 : i32
    %c0_i32_1 = arith.constant 0 : i32
    return %c0_i32, %c0_i32_0 : i32, i32
  }
  func.func @transform_5(%arg0: i32) -> (i32, i32) {
    %c0_i32 = arith.constant 0 : i32
    %c0_i32_0 = arith.constant 0 : i32
    %c0_i32_1 = arith.constant 0 : i32
    return %c0_i32, %c0_i32_0 : i32, i32
  }
  func.func @transform_6(%arg0: i32) -> (i32, i32) {
    %c0_i32 = arith.constant 0 : i32
    %c0_i32_0 = arith.constant 0 : i32
    %c0_i32_1 = arith.constant 0 : i32
    return %c0_i32, %c0_i32_0 : i32, i32
  }
  func.func @transform_7(%arg0: i32) -> (i32, i32) {
    %c0_i32 = arith.constant 0 : i32
    %c0_i32_0 = arith.constant 0 : i32
    %c0_i32_1 = arith.constant 0 : i32
    return %c0_i32, %c0_i32_0 : i32, i32
  }
  func.func @transform_8(%arg0: i32) -> (i32, i32) {
    %c0_i32 = arith.constant 0 : i32
    %c0_i32_0 = arith.constant 0 : i32
    return %arg0, %c0_i32 : i32, i32
  }
  func.func @transform_9(%arg0: i32) -> (i32, i32) {
    %c0_i32 = arith.constant 0 : i32
    %0 = arith.subi %c0_i32, %arg0 : i32
    %c0_i32_0 = arith.constant 0 : i32
    %c0_i32_1 = arith.constant 0 : i32
    return %0, %c0_i32_0 : i32, i32
  }
}

</mosaic_0001>

<bundles_post_ra>
// kernel: _lambda_.1
= control target key start
LH: loop header
LB: loop body
LE: loop exit
PB: predicated region body
PF: predicated region fallthrough
CT: control target
= control target key end

     0   :  { %v5457_v1 = vmov 0   ;;  %vm120_vm0 = vcmask 130048   ;;  %v5459_v55 = vmov 0.0|0.0   ;;  %s5447_s2 = inlined_call_operand.vmem [shape: bf16[16,512], index: 2, kind: input, shape index: {}]   ;;  %s5448_s0 = inlined_call_operand.vmem [shape: bf16[64,16], index: 0, kind: input, shape index: {}]   ;;  %s5449_s3 = inlined_call_operand.vmem [shape: bf16[16,512], index: 3, kind: input, shape index: {}]   ;;  %s5450_s4 = inlined_call_operand.vmem [shape: bf16[128,512], index: 4, kind: input, shape index: {}]   ;;  %s5451_s1 = inlined_call_operand.vmem [shape: bf16[64,16], index: 1, kind: input, shape index: {}]   ;;  %s5452_s5 = inlined_call_operand.vmem [shape: bf16[128,512], index: 5, kind: input, shape index: {}]   ;;  %s5453_s6 = inlined_call_operand.vmem [shape: f32[1,512], index: 6, kind: input, shape index: {}]   ;;  %s5454_s7 = inlined_call_operand.vmem [shape: f32[1,512], index: 7, kind: input, shape index: {}]   ;;  %s5455_s8 = inlined_call_operand.vmem [shape: f32[64,128], index: 8, kind: output, shape index: {0}]   ;;  %s5456_s9 = inlined_call_operand.vmem [shape: f32[64,128], index: 9, kind: output, shape index: {1}]  }
   0x1   :  { %v3089_v0 = vld [vmem:[%s5447_s2 + $0x4] ss:$16 sps:$4 sm:$0xff]   ;;  %165 = vmatprep.mubr.bf16.mxu0 %v5457_v1  ;;  %238 = vmatprep.mubr.bf16.mxu1 %v5457_v1  ;;  %v3091_v2 = vld [vmem:[%s5447_s2 + $0xc] ss:$16 sps:$4 sm:$0xff]   ;;  %v3093_v3 = vld [vmem:[%s5447_s2] ss:$16 sps:$4 sm:$0xff]  }
   0x2   :  { %147 = vmatprep.subr.bf16.mxu0 %v3089_v0  ;;  %v3094_v4 = vld [vmem:[%s5447_s2 + $0x8] ss:$16 sps:$4 sm:$0xff]   ;;  %220 = vmatprep.subr.bf16.mxu1 %v3091_v2  ;;  %v3095_v5 = vld [vmem:[%s5448_s0] sm:$0xff]   ;;  %v3103_v9 = vld [vmem:[%s5449_s3 + $0xc] ss:$16 sps:$4 sm:$0xff]  }
   0x3   :  { %148 = vmatpush1.bf16.msra.mxu0 %v3093_v3  ;;  %221 = vmatpush1.bf16.msra.mxu1 %v3094_v4  ;;  %v3096_v6 = vld [vmem:[%s5449_s3] ss:$16 sps:$4 sm:$0xff]   ;;  %v3098_v7 = vld [vmem:[%s5449_s3 + $0x4] ss:$16 sps:$4 sm:$0xff]   ;;  %v3101_v8 = vld [vmem:[%s5449_s3 + $0x8] ss:$16 sps:$4 sm:$0xff]  }
   0x4   :  { %411 = vmatprep.subr.bf16.mxu0 %v3098_v7  ;;  %v3099_v10 = vld [vmem:[%s5448_s0 + $0x8] sm:$0xff]   ;;  %484 = vmatprep.subr.bf16.mxu1 %v3103_v9  ;;  %v3680_v11 = vld [vmem:[%s5450_s4 + $0xe4] ss:$16 sps:$4 sm:$0xff]   ;;  %v3104_v14 = vld [vmem:[%s5448_s0 + $0x18] sm:$0xff]  }
   0x5   :  { %v3685_v12 = vld [vmem:[%s5450_s4 + $0xec] ss:$16 sps:$4 sm:$0xff]   ;;  %v3100_v13 = vld [vmem:[%s5448_s0 + $0x10] sm:$0xff]   ;;  %v3109_v15 = vld [vmem:[%s5451_s1] sm:$0xff]  }
   0x6   :  { %2937 = vmatmul.mubr.msk.bf16.vlgmr.msra.gmra.mxu0 %vm120_vm0, %v3095_v5  ;;  %2941 = vmatmul.mubr.msk.bf16.vlgmr.msra.gmra.mxu1 %vm120_vm0, %v3095_v5  ;;  %v3713_v16 = vld [vmem:[%s5450_s4 + $0xe0] ss:$16 sps:$4 sm:$0xff]   ;;  %v3718_v17 = vld [vmem:[%s5450_s4 + $0xe8] ss:$16 sps:$4 sm:$0xff]   ;;  %v3723_v18 = vld [vmem:[%s5450_s4 + $0xc4] ss:$16 sps:$4 sm:$0xff]  }
   0x7   :  { %412 = vmatpush1.bf16.msra.mxu0 %v3096_v6  ;;  %175 = vmatprep.mubr.bf16.mxu0 %v5457_v1  ;;  %v3728_v19 = vld [vmem:[%s5450_s4 + $0xcc] ss:$16 sps:$4 sm:$0xff]   ;;  %v3735_v20 = vld [vmem:[%s5450_s4 + $0xc0] ss:$16 sps:$4 sm:$0xff]   ;;  %v3740_v21 = vld [vmem:[%s5450_s4 + $0xc8] ss:$16 sps:$4 sm:$0xff]  }
   0x8   :  { %248 = vmatprep.mubr.bf16.mxu1 %v5457_v1  ;;  %485 = vmatpush1.bf16.msra.mxu1 %v3101_v8  ;;  %5551 = vst [vmem:[#allocation8_spill] sm:$0xff] %v3735_v20  ;;  %5552 = vst [vmem:[#allocation9_spill] sm:$0xff] %v3740_v21  ;;  %v3747_v22 = vld [vmem:[%s5450_s4 + $0xa4] ss:$16 sps:$4 sm:$0xff]   ;;  %v3754_v23 = vld [vmem:[%s5450_s4 + $0xac] ss:$16 sps:$4 sm:$0xff]  }
   0x9   :  { %819 = vmatprep.subr.bf16.mxu0 %v3680_v11  ;;  %860 = vmatprep.subr.bf16.mxu1 %v3685_v12  ;;  %5553 = vst [vmem:[#allocation10_spill] sm:$0xff] %v3747_v22  ;;  %5554 = vst [vmem:[#allocation11_spill] sm:$0xff] %v3754_v23  ;;  %v3122_v24 = vld [vmem:[%s5451_s1 + $0x8] sm:$0xff]   ;;  %v3764_v25 = vld [vmem:[%s5450_s4 + $0xa0] ss:$16 sps:$4 sm:$0xff]  }
   0xa   :  { %5555 = vst [vmem:[#allocation12_spill] sm:$0xff] %v3764_v25  ;;  %v3771_v26 = vld [vmem:[%s5450_s4 + $0xa8] ss:$16 sps:$4 sm:$0xff]   ;;  %v3776_v27 = vld [vmem:[%s5450_s4 + $0x84] ss:$16 sps:$4 sm:$0xff]  }
   0xb   :  { %5556 = vst [vmem:[#allocation13_spill] sm:$0xff] %v3771_v26  ;;  %5557 = vst [vmem:[#allocation14_spill] sm:$0xff] %v3776_v27  ;;  %v3783_v28 = vld [vmem:[%s5450_s4 + $0x8c] ss:$16 sps:$4 sm:$0xff]   ;;  %v3790_v29 = vld [vmem:[%s5450_s4 + $0x80] ss:$16 sps:$4 sm:$0xff]  }
   0xc   :  { %5558 = vst [vmem:[#allocation15_spill] sm:$0xff] %v3783_v28  ;;  %5559 = vst [vmem:[#allocation16_spill] sm:$0xff] %v3790_v29  ;;  %v3795_v30 = vld [vmem:[%s5450_s4 + $0x88] ss:$16 sps:$4 sm:$0xff]   ;;  %v3802_v31 = vld [vmem:[%s5450_s4 + $0x64] ss:$16 sps:$4 sm:$0xff]  }
   0xd   :  { %5560 = vst [vmem:[#allocation17_spill] sm:$0xff] %v3795_v30  ;;  %5561 = vst [vmem:[#allocation18_spill] sm:$0xff] %v3802_v31  ;;  %v3809_v32 = vld [vmem:[%s5450_s4 + $0x6c] ss:$16 sps:$4 sm:$0xff]   ;;  %v3135_v33 = vld [vmem:[%s5451_s1 + $0x10] sm:$0xff]  }
   0xe   :  { %2938 = vmatmul.mubr.msk.bf16.gmra.mxu0 %vm120_vm0, %v3099_v10  ;;  %2942 = vmatmul.mubr.msk.bf16.gmra.mxu1 %vm120_vm0, %v3099_v10  ;;  %5562 = vst [vmem:[#allocation19_spill] sm:$0xff] %v3809_v32  ;;  %v3819_v34 = vld [vmem:[%s5450_s4 + $0x60] ss:$16 sps:$4 sm:$0xff]   ;;  %v3826_v35 = vld [vmem:[%s5450_s4 + $0x68] ss:$16 sps:$4 sm:$0xff]  }
   0xf   :  { %185 = vmatprep.mubr.bf16.mxu0 %v5457_v1  ;;  %258 = vmatprep.mubr.bf16.mxu1 %v5457_v1  ;;  %5563 = vst [vmem:[#allocation20_spill] sm:$0xff] %v3819_v34  ;;  %5564 = vst [vmem:[#allocation21_spill] sm:$0xff] %v3826_v35  ;;  %v3831_v36 = vld [vmem:[%s5450_s4 + $0x44] ss:$16 sps:$4 sm:$0xff]   ;;  %v3838_v37 = vld [vmem:[%s5450_s4 + $0x4c] ss:$16 sps:$4 sm:$0xff]  }
  0x10   :  { %5565 = vst [vmem:[#allocation22_spill] sm:$0xff] %v3831_v36  ;;  %5566 = vst [vmem:[#allocation23_spill] sm:$0xff] %v3838_v37  ;;  %v3847_v38 = vld [vmem:[%s5450_s4 + $0x40] ss:$16 sps:$4 sm:$0xff]   ;;  %v3852_v39 = vld [vmem:[%s5450_s4 + $0x48] ss:$16 sps:$4 sm:$0xff]  }
  0x11   :  { %5567 = vst [vmem:[#allocation24_spill] sm:$0xff] %v3847_v38  ;;  %5568 = vst [vmem:[#allocation25_spill] sm:$0xff] %v3852_v39  ;;  %v3859_v40 = vld [vmem:[%s5450_s4 + $0x24] ss:$16 sps:$4 sm:$0xff]   ;;  %v3864_v41 = vld [vmem:[%s5450_s4 + $0x2c] ss:$16 sps:$4 sm:$0xff]  }
  0x12   :  { %5569 = vst [vmem:[#allocation26_spill] sm:$0xff] %v3859_v40  ;;  %5570 = vst [vmem:[#allocation27_spill] sm:$0xff] %v3864_v41  ;;  %v3148_v42 = vld [vmem:[%s5451_s1 + $0x18] sm:$0xff]   ;;  %v3876_v43 = vld [vmem:[%s5450_s4 + $0x20] ss:$16 sps:$4 sm:$0xff]  }
  0x13   :  { %5571 = vst [vmem:[#allocation28_spill] sm:$0xff] %v3876_v43  ;;  %v3881_v44 = vld [vmem:[%s5450_s4 + $0x28] ss:$16 sps:$4 sm:$0xff]   ;;  %v3888_v45 = vld [vmem:[%s5450_s4 + $0x4] ss:$16 sps:$4 sm:$0xff]  }
  0x14   :  { %5572 = vst [vmem:[#allocation29_spill] sm:$0xff] %v3881_v44  ;;  %5573 = vst [vmem:[#allocation30_spill] sm:$0xff] %v3888_v45  ;;  %v3893_v46 = vld [vmem:[%s5450_s4 + $0xc] ss:$16 sps:$4 sm:$0xff]   ;;  %v3902_v47 = vld [vmem:[%s5450_s4] ss:$16 sps:$4 sm:$0xff]  }
  0x15   :  { %5574 = vst [vmem:[#allocation31_spill] sm:$0xff] %v3893_v46  ;;  %5575 = vst [vmem:[#allocation32_spill] sm:$0xff] %v3902_v47  ;;  %v3907_v48 = vld [vmem:[%s5450_s4 + $0x8] ss:$16 sps:$4 sm:$0xff]   ;;  %v3914_v49 = vld [vmem:[%s5452_s5 + $0xe4] ss:$16 sps:$4 sm:$0xff]  }
  0x16   :  { %2939 = vmatmul.mubr.msk.bf16.gmra.mxu0 %vm120_vm0, %v3100_v13  ;;  %2943 = vmatmul.mubr.msk.bf16.gmra.mxu1 %vm120_vm0, %v3100_v13  ;;  %5576 = vst [vmem:[#allocation33_spill] sm:$0xff] %v3907_v48  ;;  %5577 = vst [vmem:[#allocation34_spill] sm:$0xff] %v3914_v49  ;;  %v3919_v50 = vld [vmem:[%s5452_s5 + $0xec] ss:$16 sps:$4 sm:$0xff]   ;;  %v3928_v51 = vld [vmem:[%s5452_s5 + $0xe0] ss:$16 sps:$4 sm:$0xff]  }
  0x17   :  { %195 = vmatprep.mubr.bf16.mxu0 %v5457_v1  ;;  %268 = vmatprep.mubr.bf16.mxu1 %v5457_v1  ;;  %5578 = vst [vmem:[#allocation35_spill] sm:$0xff] %v3919_v50  ;;  %v3933_v52 = vld [vmem:[%s5452_s5 + $0xe8] ss:$16 sps:$4 sm:$0xff]   ;;  %v3940_v53 = vld [vmem:[%s5452_s5 + $0xc4] ss:$16 sps:$4 sm:$0xff]  }
  0x18   :  { %v3945_v54 = vld [vmem:[%s5452_s5 + $0xcc] ss:$16 sps:$4 sm:$0xff]   ;;  %v3954_v56 = vld [vmem:[%s5452_s5 + $0xc0] ss:$16 sps:$4 sm:$0xff]   ;;  %v3959_v57 = vld [vmem:[%s5452_s5 + $0xc8] ss:$16 sps:$4 sm:$0xff]  }
  0x19   :  { %v3966_v58 = vld [vmem:[%s5452_s5 + $0xa4] ss:$16 sps:$4 sm:$0xff]   ;;  %v3971_v59 = vld [vmem:[%s5452_s5 + $0xac] ss:$16 sps:$4 sm:$0xff]   ;;  %v3980_v60 = vld [vmem:[%s5452_s5 + $0xa0] ss:$16 sps:$4 sm:$0xff]  }
  0x1a   :  { %v3985_v61 = vld [vmem:[%s5452_s5 + $0xa8] ss:$16 sps:$4 sm:$0xff]   ;;  %v3992_v62 = vld [vmem:[%s5452_s5 + $0x84] ss:$16 sps:$4 sm:$0xff]   ;;  %v3997_v63 = vld [vmem:[%s5452_s5 + $0x8c] ss:$16 sps:$4 sm:$0xff]  }
  0x1b   :  { %v4004_v0 = vld [vmem:[%s5452_s5 + $0x80] ss:$16 sps:$4 sm:$0xff]   ;;  %v4009_v2 = vld [vmem:[%s5452_s5 + $0x88] ss:$16 sps:$4 sm:$0xff]   ;;  %v4016_v3 = vld [vmem:[%s5452_s5 + $0x64] ss:$16 sps:$4 sm:$0xff]  }
  0x1c   :  { %v4021_v4 = vld [vmem:[%s5452_s5 + $0x6c] ss:$16 sps:$4 sm:$0xff]   ;;  %v4028_v5 = vld [vmem:[%s5452_s5 + $0x60] ss:$16 sps:$4 sm:$0xff]   ;;  %v4033_v6 = vld [vmem:[%s5452_s5 + $0x68] ss:$16 sps:$4 sm:$0xff]  }
  0x1d   :  { %v4040_v7 = vld [vmem:[%s5452_s5 + $0x44] ss:$16 sps:$4 sm:$0xff]   ;;  %v4045_v8 = vld [vmem:[%s5452_s5 + $0x4c] ss:$16 sps:$4 sm:$0xff]   ;;  %v4052_v9 = vld [vmem:[%s5452_s5 + $0x40] ss:$16 sps:$4 sm:$0xff]  }
  0x1e   :  { %2940 = vmatmul.mubr.msk.bf16.gmra.mxu0 %vm120_vm0, %v3104_v14  ;;  %2944 = vmatmul.mubr.msk.bf16.gmra.mxu1 %vm120_vm0, %v3104_v14  ;;  %v4057_v10 = vld [vmem:[%s5452_s5 + $0x48] ss:$16 sps:$4 sm:$0xff]   ;;  %v4064_v13 = vld [vmem:[%s5452_s5 + $0x24] ss:$16 sps:$4 sm:$0xff]   ;;  %v4069_v14 = vld [vmem:[%s5452_s5 + $0x2c] ss:$16 sps:$4 sm:$0xff]  }
  0x1f   :  { %429 = vmatprep.mubr.bf16.mxu0 %v5457_v1  ;;  %502 = vmatprep.mubr.bf16.mxu1 %v5457_v1 }
  0x26   :  { %2953 = vmatmul.mubr.msk.bf16.vlgmr.msra.gmra.mxu0 %vm120_vm0, %v3109_v15  ;;  %2957 = vmatmul.mubr.msk.bf16.vlgmr.msra.gmra.mxu1 %vm120_vm0, %v3109_v15  ;;  %v4076_v15 = vld [vmem:[%s5452_s5 + $0x20] ss:$16 sps:$4 sm:$0xff]  }
  0x27   :  { %820 = vmatpush1.bf16.msra.mxu0 %v3713_v16  ;;  %861 = vmatpush1.bf16.msra.mxu1 %v3718_v17 }
  0x28   :  { %821 = vmatprep.subr.bf16.mxu0 %v3723_v18  ;;  %862 = vmatprep.subr.bf16.mxu1 %v3728_v19 }
  0x29   :  { %439 = vmatprep.mubr.bf16.mxu0 %v5457_v1  ;;  %512 = vmatprep.mubr.bf16.mxu1 %v5457_v1 }
  0x2b   :  { %822 = vmatpush1.bf16.msra.mxu0 %v3735_v20  ;;  %863 = vmatpush1.bf16.msra.mxu1 %v3740_v21 }
  0x2c   :  { %823 = vmatprep.subr.bf16.mxu0 %v3747_v22  ;;  %864 = vmatprep.subr.bf16.mxu1 %v3754_v23 }
  0x2e   :  { %2954 = vmatmul.mubr.msk.bf16.gmra.mxu0 %vm120_vm0, %v3122_v24  ;;  %2958 = vmatmul.mubr.msk.bf16.gmra.mxu1 %vm120_vm0, %v3122_v24  ;;  %v4081_v24 = vld [vmem:[%s5452_s5 + $0x28] ss:$16 sps:$4 sm:$0xff]  }
  0x2f   :  { %824 = vmatpush1.bf16.msra.mxu0 %v3764_v25  ;;  %865 = vmatpush1.bf16.msra.mxu1 %v3771_v26  ;;  %5579 = vst [vmem:[#allocation36_spill] sm:$0xff] %v4081_v24 }
  0x30   :  { %825 = vmatprep.subr.bf16.mxu0 %v3776_v27  ;;  %866 = vmatprep.subr.bf16.mxu1 %v3783_v28 }
  0x31   :  { %449 = vmatprep.mubr.bf16.mxu0 %v5457_v1  ;;  %522 = vmatprep.mubr.bf16.mxu1 %v5457_v1 }
  0x33   :  { %826 = vmatpush1.bf16.msra.mxu0 %v3790_v29  ;;  %867 = vmatpush1.bf16.msra.mxu1 %v3795_v30 }
  0x34   :  { %827 = vmatprep.subr.bf16.mxu0 %v3802_v31  ;;  %868 = vmatprep.subr.bf16.mxu1 %v3809_v32 }
  0x36   :  { %2955 = vmatmul.mubr.msk.bf16.gmra.mxu0 %vm120_vm0, %v3135_v33  ;;  %2959 = vmatmul.mubr.msk.bf16.gmra.mxu1 %vm120_vm0, %v3135_v33  ;;  %v4088_v33 = vld [vmem:[%s5452_s5 + $0x4] ss:$16 sps:$4 sm:$0xff]  }
  0x37   :  { %828 = vmatpush1.bf16.msra.mxu0 %v3819_v34  ;;  %869 = vmatpush1.bf16.msra.mxu1 %v3826_v35 }
  0x38   :  { %829 = vmatprep.subr.bf16.mxu0 %v3831_v36  ;;  %870 = vmatprep.subr.bf16.mxu1 %v3838_v37 }
  0x39   :  { %459 = vmatprep.mubr.bf16.mxu0 %v5457_v1  ;;  %532 = vmatprep.mubr.bf16.mxu1 %v5457_v1 }
  0x3b   :  { %830 = vmatpush1.bf16.msra.mxu0 %v3847_v38  ;;  %871 = vmatpush1.bf16.msra.mxu1 %v3852_v39 }
  0x3c   :  { %831 = vmatprep.subr.bf16.mxu0 %v3859_v40  ;;  %872 = vmatprep.subr.bf16.mxu1 %v3864_v41 }
  0x3e   :  { %2956 = vmatmul.mubr.msk.bf16.gmra.mxu0 %vm120_vm0, %v3148_v42  ;;  %2960 = vmatmul.mubr.msk.bf16.gmra.mxu1 %vm120_vm0, %v3148_v42  ;;  %v4093_v42 = vld [vmem:[%s5452_s5 + $0xc] ss:$16 sps:$4 sm:$0xff]  }
  0x3f   :  { %832 = vmatpush1.bf16.msra.mxu0 %v3876_v43  ;;  %873 = vmatpush1.bf16.msra.mxu1 %v3881_v44  ;;  %5580 = vst [vmem:[#allocation37_spill] sm:$0xff] %v4093_v42 }
  0x40   :  { %833 = vmatprep.subr.bf16.mxu0 %v3888_v45  ;;  %874 = vmatprep.subr.bf16.mxu1 %v3893_v46 }
  0x41   :  { %851 = vmatprep.mubr.bf16.mxu0 %v5457_v1  ;;  %892 = vmatprep.mubr.bf16.mxu1 %v5457_v1 }
  0x43   :  { %834 = vmatpush1.bf16.msra.mxu0 %v3902_v47  ;;  %875 = vmatpush1.bf16.msra.mxu1 %v3907_v48 }
  0x44   :  { %1096 = vmatprep.subr.bf16.mxu0 %v3914_v49  ;;  %1137 = vmatprep.subr.bf16.mxu1 %v3919_v50 }
  0x46   :  { %852 = vmatmul.mubr.bf16.vlgmr.msra.gmra.mxu0 %v5459_v55  ;;  %893 = vmatmul.mubr.bf16.vlgmr.msra.gmra.mxu1 %v5459_v55  ;;  %v4105_v55 = vld [vmem:[%s5452_s5 + $0x8] ss:$16 sps:$4 sm:$0xff]  }
  0x47   :  { %1097 = vmatpush1.bf16.msra.mxu0 %v3928_v51  ;;  %1138 = vmatpush1.bf16.msra.mxu1 %v3933_v52 }
  0x48   :  { %1098 = vmatprep.subr.bf16.mxu0 %v3940_v53  ;;  %1139 = vmatprep.subr.bf16.mxu1 %v3945_v54 }
  0x49   :  { %1128 = vmatprep.mubr.bf16.mxu0 %v5457_v1  ;;  %1169 = vmatprep.mubr.bf16.mxu1 %v5457_v1  ;;  %v4100_v1 = vld [vmem:[%s5452_s5] ss:$16 sps:$4 sm:$0xff]  }
  0x4b   :  { %1099 = vmatpush1.bf16.msra.mxu0 %v3954_v56  ;;  %1140 = vmatpush1.bf16.msra.mxu1 %v3959_v57 }
  0x4c   :  { %1100 = vmatprep.subr.bf16.mxu0 %v3966_v58  ;;  %1141 = vmatprep.subr.bf16.mxu1 %v3971_v59 }
  0x4f   :  { %1101 = vmatpush1.bf16.msra.mxu0 %v3980_v60  ;;  %1142 = vmatpush1.bf16.msra.mxu1 %v3985_v61 }
  0x50   :  { %1102 = vmatprep.subr.bf16.mxu0 %v3992_v62  ;;  %1143 = vmatprep.subr.bf16.mxu1 %v3997_v63 }
  0x53   :  { %1103 = vmatpush1.bf16.msra.mxu0 %v4004_v0  ;;  %1144 = vmatpush1.bf16.msra.mxu1 %v4009_v2 }
  0x54   :  { %1104 = vmatprep.subr.bf16.mxu0 %v4016_v3  ;;  %1145 = vmatprep.subr.bf16.mxu1 %v4021_v4 }
  0x57   :  { %1105 = vmatpush1.bf16.msra.mxu0 %v4028_v5  ;;  %1146 = vmatpush1.bf16.msra.mxu1 %v4033_v6 }
  0x58   :  { %1106 = vmatprep.subr.bf16.mxu0 %v4040_v7  ;;  %1147 = vmatprep.subr.bf16.mxu1 %v4045_v8 }
  0x5b   :  { %1107 = vmatpush1.bf16.msra.mxu0 %v4052_v9  ;;  %1148 = vmatpush1.bf16.msra.mxu1 %v4057_v10 }
  0x5c   :  { %1108 = vmatprep.subr.bf16.mxu0 %v4064_v13  ;;  %1149 = vmatprep.subr.bf16.mxu1 %v4069_v14 }
  0x5f   :  { %1109 = vmatpush1.bf16.msra.mxu0 %v4076_v15  ;;  %1150 = vmatpush1.bf16.msra.mxu1 %v4081_v24  ;;  %v5581_v24 = vmov 0.0|0.0  }
  0x60   :  { %1110 = vmatprep.subr.bf16.mxu0 %v4088_v33  ;;  %1151 = vmatprep.subr.bf16.mxu1 %v4093_v42  ;;  %v5582_v42 = vmov 0  }
  0x63   :  { %1111 = vmatpush1.bf16.msra.mxu0 %v4100_v1  ;;  %1152 = vmatpush1.bf16.msra.mxu1 %v4105_v55 }
  0x64   :  { %1217 = vmatprep.subr.bf16.mxu0 %v3680_v11  ;;  %1258 = vmatprep.subr.bf16.mxu1 %v3685_v12  ;;  %v60_v11 = vlaneseq }
  0x66   :  { %1129 = vmatmul.mubr.bf16.vlgmr.msra.gmra.mxu0 %v5581_v24  ;;  %1170 = vmatmul.mubr.bf16.vlgmr.msra.gmra.mxu1 %v5581_v24  ;;  %v4149_v12 = vshrl.u32 %v60_v11, 7 }
  0x67   :  { %1218 = vmatpush1.bf16.msra.mxu0 %v3713_v16  ;;  %1259 = vmatpush1.bf16.msra.mxu1 %v3718_v17 }
  0x68   :  { %1219 = vmatprep.subr.bf16.mxu0 %v3723_v18  ;;  %1260 = vmatprep.subr.bf16.mxu1 %v3728_v19  ;;  %v5477_v24 = vsub.s32 2, %v4149_v12  ;;  %v5486_v11 = vsub.s32 1, %v4149_v12 }
  0x69   :  { %1249 = vmatprep.mubr.bf16.mxu0 %v5582_v42  ;;  %1290 = vmatprep.mubr.bf16.mxu1 %v5582_v42 }
  0x6b   :  { %1220 = vmatpush1.bf16.msra.mxu0 %v3735_v20  ;;  %1261 = vmatpush1.bf16.msra.mxu1 %v3740_v21 }
  0x6c   :  { %1221 = vmatprep.subr.bf16.mxu0 %v3747_v22  ;;  %1262 = vmatprep.subr.bf16.mxu1 %v3754_v23 }
  0x6f   :  { %1222 = vmatpush1.bf16.msra.mxu0 %v3764_v25  ;;  %1263 = vmatpush1.bf16.msra.mxu1 %v3771_v26 }
  0x70   :  { %1223 = vmatprep.subr.bf16.mxu0 %v3776_v27  ;;  %1264 = vmatprep.subr.bf16.mxu1 %v3783_v28 }
  0x73   :  { %1224 = vmatpush1.bf16.msra.mxu0 %v3790_v29  ;;  %1265 = vmatpush1.bf16.msra.mxu1 %v3795_v30  ;;  %v5615_v29 = vsub.s32 1, %v4149_v12 }
  0x74   :  { %1225 = vmatprep.subr.bf16.mxu0 %v3802_v31  ;;  %1266 = vmatprep.subr.bf16.mxu1 %v3809_v32 }
  0x77   :  { %1226 = vmatpush1.bf16.msra.mxu0 %v3819_v34  ;;  %1267 = vmatpush1.bf16.msra.mxu1 %v3826_v35 }
  0x78   :  { %1227 = vmatprep.subr.bf16.mxu0 %v3831_v36  ;;  %1268 = vmatprep.subr.bf16.mxu1 %v3838_v37 }
  0x7b   :  { %1228 = vmatpush1.bf16.msra.mxu0 %v3847_v38  ;;  %1269 = vmatpush1.bf16.msra.mxu1 %v3852_v39 }
  0x7c   :  { %1229 = vmatprep.subr.bf16.mxu0 %v3859_v40  ;;  %1270 = vmatprep.subr.bf16.mxu1 %v3864_v41  ;;  %v5583_v41 = vsub.s32 3, %v4149_v12 }
  0x7f   :  { %1230 = vmatpush1.bf16.msra.mxu0 %v3876_v43  ;;  %1271 = vmatpush1.bf16.msra.mxu1 %v3881_v44  ;;  %v5482_v43 = vsub.s32 0, %v4149_v12 }
  0x80   :  { %1231 = vmatprep.subr.bf16.mxu0 %v3888_v45  ;;  %1272 = vmatprep.subr.bf16.mxu1 %v3893_v46  ;;  %v50_v46 = vld [vmem:[%s5453_s6] sm:$0xf] }
  0x81   :  { %v4172_v44 = vrot.slane %v50_v46, %v5482_v43  ;;  %v4176_v40 = vrot.slane %v50_v46, %v5583_v41 }
  0x83   :  { %1232 = vmatpush1.bf16.msra.mxu0 %v3902_v47  ;;  %1273 = vmatpush1.bf16.msra.mxu1 %v3907_v48 }
  0x84   :  { %1334 = vmatprep.subr.bf16.mxu0 %v3914_v49  ;;  %1375 = vmatprep.subr.bf16.mxu1 %v3919_v50  ;;  %v4163_v50 = vrot.slane %v50_v46, %v5477_v24  ;;  %v4180_v24 = vrot.slane %v50_v46, %v5486_v11 }
  0xc6   :  { %v4157_v47 = vpop.f32.mrf.mxu0  ;;  %v4159_v48 = vpop.f32.mrf.mxu1 }
  0xc8   :  { %v4166_v49 = vpop.f32.mrf.mxu0  ;;  %v4168_v45 = vpop.f32.mrf.mxu1 }
  0xca   :  { %v171_v39 = vpop.f32.mrf.mxu0  ;;  %v244_v38 = vpop.f32.mrf.mxu1 }
  0xcb   :  { %v4183_v37 = vadd.f32 %v171_v39, %v4172_v44  ;;  %v4186_v36 = vadd.f32 %v244_v38, %v4163_v50 }
  0xcc   :  { %v173_v35 = vpop.f32.mrf.mxu0  ;;  %v246_v34 = vpop.f32.mrf.mxu1 }
  0xcd   :  { %5584 = vst [vmem:[#allocation38_spill] sm:$0xff] %v4183_v37  ;;  %5585 = vst [vmem:[#allocation39_spill] sm:$0xff] %v4186_v36  ;;  %v4189_v43 = vadd.f32 %v173_v35, %v4180_v24  ;;  %v4192_v41 = vadd.f32 %v246_v34, %v4176_v40 }
  0xce   :  { %v177_v32 = vpop.f32.mrf.mxu0  ;;  %v250_v31 = vpop.f32.mrf.mxu1 }
  0xcf   :  { %5586 = vst [vmem:[#allocation40_spill] sm:$0xff] %v4189_v43  ;;  %5587 = vst [vmem:[#allocation41_spill] sm:$0xff] %v4192_v41  ;;  %v4195_v30 = vadd.f32 %v177_v32, %v4172_v44  ;;  %v4198_v46 = vadd.f32 %v250_v31, %v4163_v50 }
  0xd0   :  { %v179_v39 = vpop.f32.mrf.mxu0  ;;  %v252_v11 = vpop.f32.mrf.mxu1 }
  0xd1   :  { %5588 = vst [vmem:[#allocation42_spill] sm:$0xff] %v4195_v30  ;;  %5589 = vst [vmem:[#allocation43_spill] sm:$0xff] %v4198_v46  ;;  %v4201_v38 = vadd.f32 %v179_v39, %v4180_v24  ;;  %v4204_v36 = vadd.f32 %v252_v11, %v4176_v40 }
  0xd2   :  { %v181_v35 = vpop.f32.mrf.mxu0  ;;  %v254_v43 = vpop.f32.mrf.mxu1 }
  0xd3   :  { %5590 = vst [vmem:[#allocation44_spill] sm:$0xff] %v4201_v38  ;;  %5591 = vst [vmem:[#allocation45_spill] sm:$0xff] %v4204_v36  ;;  %v4207_v34 = vadd.f32 %v181_v35, %v4172_v44  ;;  %v4210_v41 = vadd.f32 %v254_v43, %v4163_v50 }
  0xd4   :  { %v183_v32 = vpop.f32.mrf.mxu0  ;;  %v256_v30 = vpop.f32.mrf.mxu1 }
  0xd5   :  { %5592 = vst [vmem:[#allocation46_spill] sm:$0xff] %v4207_v34  ;;  %5593 = vst [vmem:[#allocation47_spill] sm:$0xff] %v4210_v41  ;;  %v4213_v31 = vadd.f32 %v183_v32, %v4180_v24  ;;  %v4216_v46 = vadd.f32 %v256_v30, %v4176_v40 }
  0xd6   :  { %v187_v39 = vpop.f32.mrf.mxu0  ;;  %v260_v38 = vpop.f32.mrf.mxu1 }
  0xd7   :  { %5594 = vst [vmem:[#allocation48_spill] sm:$0xff] %v4213_v31  ;;  %5595 = vst [vmem:[#allocation49_spill] sm:$0xff] %v4216_v46  ;;  %v4219_v11 = vadd.f32 %v187_v39, %v4172_v44  ;;  %v4222_v36 = vadd.f32 %v260_v38, %v4163_v50 }
  0xd8   :  { %v189_v35 = vpop.f32.mrf.mxu0  ;;  %v262_v34 = vpop.f32.mrf.mxu1 }
  0xd9   :  { %5596 = vst [vmem:[#allocation50_spill] sm:$0xff] %v4219_v11  ;;  %5597 = vst [vmem:[#allocation51_spill] sm:$0xff] %v4222_v36  ;;  %v4225_v43 = vadd.f32 %v189_v35, %v4180_v24  ;;  %v4228_v41 = vadd.f32 %v262_v34, %v4176_v40 }
  0xda   :  { %v191_v32 = vpop.f32.mrf.mxu0  ;;  %v264_v31 = vpop.f32.mrf.mxu1 }
  0xdb   :  { %5598 = vst [vmem:[#allocation52_spill] sm:$0xff] %v4225_v43  ;;  %5599 = vst [vmem:[#allocation53_spill] sm:$0xff] %v4228_v41  ;;  %v4231_v30 = vadd.f32 %v191_v32, %v4172_v44  ;;  %v4234_v46 = vadd.f32 %v264_v31, %v4163_v50 }
  0xdc   :  { %v193_v39 = vpop.f32.mrf.mxu0  ;;  %v266_v11 = vpop.f32.mrf.mxu1 }
  0xdd   :  { %5600 = vst [vmem:[#allocation54_spill] sm:$0xff] %v4231_v30  ;;  %5601 = vst [vmem:[#allocation55_spill] sm:$0xff] %v4234_v46  ;;  %v4237_v38 = vadd.f32 %v193_v39, %v4180_v24  ;;  %v4240_v36 = vadd.f32 %v266_v11, %v4176_v40 }
  0xde   :  { %v197_v35 = vpop.f32.mrf.mxu0  ;;  %v270_v43 = vpop.f32.mrf.mxu1 }
  0xdf   :  { %5602 = vst [vmem:[#allocation56_spill] sm:$0xff] %v4237_v38  ;;  %5603 = vst [vmem:[#allocation57_spill] sm:$0xff] %v4240_v36  ;;  %v4243_v34 = vadd.f32 %v197_v35, %v4172_v44  ;;  %v4246_v41 = vadd.f32 %v270_v43, %v4163_v50 }
  0xe0   :  { %v199_v32 = vpop.f32.mrf.mxu0  ;;  %v272_v30 = vpop.f32.mrf.mxu1 }
  0xe1   :  { %5604 = vst [vmem:[#allocation58_spill] sm:$0xff] %v4243_v34  ;;  %5605 = vst [vmem:[#allocation59_spill] sm:$0xff] %v4246_v41  ;;  %v4249_v31 = vadd.f32 %v199_v32, %v4180_v24  ;;  %v4252_v46 = vadd.f32 %v272_v30, %v4176_v40  ;;  %v315_v30 = vld [vmem:[%s5454_s7] sm:$0xf] }
  0xe2   :  { %v201_v39 = vpop.f32.mrf.mxu0  ;;  %v274_v38 = vpop.f32.mrf.mxu1  ;;  %v4291_v28 = vrot.slane %v315_v30, %v5615_v29 }
  0xe3   :  { %5606 = vst [vmem:[#allocation60_spill] sm:$0xff] %v4249_v31  ;;  %5607 = vst [vmem:[#allocation61_spill] sm:$0xff] %v4252_v46  ;;  %v4255_v11 = vadd.f32 %v201_v39, %v4172_v44  ;;  %v4258_v36 = vadd.f32 %v274_v38, %v4163_v50  ;;  %v5612_v39 = vsub.s32 2, %v4149_v12 }
  0xe4   :  { %v203_v35 = vpop.f32.mrf.mxu0  ;;  %v276_v34 = vpop.f32.mrf.mxu1 }
  0xe5   :  { %5608 = vst [vmem:[#allocation62_spill] sm:$0xff] %v4255_v11  ;;  %5609 = vst [vmem:[#allocation63_spill] sm:$0xff] %v4258_v36  ;;  %v4261_v43 = vadd.f32 %v203_v35, %v4180_v24  ;;  %v4264_v41 = vadd.f32 %v276_v34, %v4176_v40  ;;  %v4275_v38 = vrot.slane %v315_v30, %v5612_v39  ;;  %v5613_v35 = vsub.s32 0, %v4149_v12 }
  0xe6   :  { %v4269_v32 = vpop.f32.mrf.mxu0  ;;  %v4271_v46 = vpop.f32.mrf.mxu1 }
  0xe7   :  { %5610 = vst [vmem:[#allocation64_spill] sm:$0xff] %v4261_v43  ;;  %5611 = vst [vmem:[#allocation65_spill] sm:$0xff] %v4264_v41  ;;  %v4283_v34 = vrot.slane %v315_v30, %v5613_v35  ;;  %v5614_v41 = vsub.s32 3, %v4149_v12 }
  0xe8   :  { %v4277_v36 = vpop.f32.mrf.mxu0  ;;  %v4279_v11 = vpop.f32.mrf.mxu1 }
  0xe9   :  { %v4287_v43 = vrot.slane %v315_v30, %v5614_v41 }
  0xea   :  { %v435_v31 = vpop.f32.mrf.mxu0  ;;  %v508_v37 = vpop.f32.mrf.mxu1 }
  0xeb   :  { %v4294_v39 = vadd.f32 %v435_v31, %v4283_v34  ;;  %v4297_v27 = vadd.f32 %v508_v37, %v4275_v38 }
  0xec   :  { %v437_v26 = vpop.f32.mrf.mxu0  ;;  %v510_v25 = vpop.f32.mrf.mxu1 }
  0xed   :  { %5616 = vst [vmem:[#allocation66_spill] sm:$0xff] %v4294_v39  ;;  %5617 = vst [vmem:[#allocation67_spill] sm:$0xff] %v4297_v27  ;;  %v4300_v35 = vadd.f32 %v437_v26, %v4291_v28  ;;  %v4303_v41 = vadd.f32 %v510_v25, %v4287_v43 }
  0xee   :  { %v441_v23 = vpop.f32.mrf.mxu0  ;;  %v514_v22 = vpop.f32.mrf.mxu1 }
  0xef   :  { %5618 = vst [vmem:[#allocation68_spill] sm:$0xff] %v4300_v35  ;;  %5619 = vst [vmem:[#allocation69_spill] sm:$0xff] %v4303_v41  ;;  %v4306_v12 = vadd.f32 %v441_v23, %v4283_v34  ;;  %v4309_v29 = vadd.f32 %v514_v22, %v4275_v38 }
  0xf0   :  { %v443_v31 = vpop.f32.mrf.mxu0  ;;  %v516_v30 = vpop.f32.mrf.mxu1 }
  0xf1   :  { %5620 = vst [vmem:[#allocation70_spill] sm:$0xff] %v4306_v12  ;;  %5621 = vst [vmem:[#allocation71_spill] sm:$0xff] %v4309_v29  ;;  %v4312_v37 = vadd.f32 %v443_v31, %v4291_v28  ;;  %v4315_v27 = vadd.f32 %v516_v30, %v4287_v43 }
  0xf2   :  { %v445_v26 = vpop.f32.mrf.mxu0  ;;  %v518_v35 = vpop.f32.mrf.mxu1 }
  0xf3   :  { %5622 = vst [vmem:[#allocation72_spill] sm:$0xff] %v4312_v37  ;;  %5623 = vst [vmem:[#allocation73_spill] sm:$0xff] %v4315_v27  ;;  %v4318_v25 = vadd.f32 %v445_v26, %v4283_v34  ;;  %v4321_v41 = vadd.f32 %v518_v35, %v4275_v38 }
  0xf4   :  { %v447_v23 = vpop.f32.mrf.mxu0  ;;  %v520_v12 = vpop.f32.mrf.mxu1 }
  0xf5   :  { %5624 = vst [vmem:[#allocation74_spill] sm:$0xff] %v4318_v25  ;;  %5625 = vst [vmem:[#allocation75_spill] sm:$0xff] %v4321_v41  ;;  %v4324_v22 = vadd.f32 %v447_v23, %v4291_v28  ;;  %v4327_v29 = vadd.f32 %v520_v12, %v4287_v43 }
  0xf6   :  { %v451_v31 = vpop.f32.mrf.mxu0  ;;  %v524_v37 = vpop.f32.mrf.mxu1 }
  0xf7   :  { %5626 = vst [vmem:[#allocation76_spill] sm:$0xff] %v4324_v22  ;;  %5627 = vst [vmem:[#allocation77_spill] sm:$0xff] %v4327_v29  ;;  %v4330_v30 = vadd.f32 %v451_v31, %v4283_v34  ;;  %v4333_v27 = vadd.f32 %v524_v37, %v4275_v38 }
  0xf8   :  { %v453_v26 = vpop.f32.mrf.mxu0  ;;  %v526_v25 = vpop.f32.mrf.mxu1 }
  0xf9   :  { %5628 = vst [vmem:[#allocation78_spill] sm:$0xff] %v4330_v30  ;;  %5629 = vst [vmem:[#allocation79_spill] sm:$0xff] %v4333_v27  ;;  %v4336_v35 = vadd.f32 %v453_v26, %v4291_v28  ;;  %v4339_v41 = vadd.f32 %v526_v25, %v4287_v43 }
  0xfa   :  { %v455_v23 = vpop.f32.mrf.mxu0  ;;  %v528_v22 = vpop.f32.mrf.mxu1 }
  0xfb   :  { %5630 = vst [vmem:[#allocation80_spill] sm:$0xff] %v4336_v35  ;;  %5631 = vst [vmem:[#allocation81_spill] sm:$0xff] %v4339_v41  ;;  %v4342_v12 = vadd.f32 %v455_v23, %v4283_v34  ;;  %v4345_v29 = vadd.f32 %v528_v22, %v4275_v38 }
  0xfc   :  { %v457_v31 = vpop.f32.mrf.mxu0  ;;  %v530_v30 = vpop.f32.mrf.mxu1 }
  0xfd   :  { %5632 = vst [vmem:[#allocation82_spill] sm:$0xff] %v4342_v12  ;;  %5633 = vst [vmem:[#allocation83_spill] sm:$0xff] %v4345_v29  ;;  %v4348_v37 = vadd.f32 %v457_v31, %v4291_v28  ;;  %v4351_v27 = vadd.f32 %v530_v30, %v4287_v43 }
  0xfe   :  { %v461_v26 = vpop.f32.mrf.mxu0  ;;  %v534_v35 = vpop.f32.mrf.mxu1 }
  0xff   :  { %5634 = vst [vmem:[#allocation84_spill] sm:$0xff] %v4348_v37  ;;  %5635 = vst [vmem:[#allocation85_spill] sm:$0xff] %v4351_v27  ;;  %v4354_v25 = vadd.f32 %v461_v26, %v4283_v34  ;;  %v4357_v41 = vadd.f32 %v534_v35, %v4275_v38  ;;  %v168_v35 = vadd.f32 %v4157_v47, %v4172_v44 }
 0x100   :  { %v463_v23 = vpop.f32.mrf.mxu0  ;;  %v536_v12 = vpop.f32.mrf.mxu1 }
 0x101   :  { %5636 = vst [vmem:[#allocation86_spill] sm:$0xff] %v4354_v25  ;;  %5637 = vst [vmem:[#allocation87_spill] sm:$0xff] %v4357_v41  ;;  %v4360_v22 = vadd.f32 %v463_v23, %v4291_v28  ;;  %v4363_v29 = vadd.f32 %v536_v12, %v4287_v43 }
 0x102   :  { %v465_v31 = vpop.f32.mrf.mxu0  ;;  %v538_v37 = vpop.f32.mrf.mxu1 }
 0x103   :  { %5638 = vst [vmem:[#allocation88_spill] sm:$0xff] %v4360_v22  ;;  %5639 = vst [vmem:[#allocation89_spill] sm:$0xff] %v4363_v29  ;;  %v4366_v30 = vadd.f32 %v465_v31, %v4283_v34  ;;  %v4369_v27 = vadd.f32 %v538_v37, %v4275_v38  ;;  %v170_v31 = vadd.f32 %v4166_v49, %v4180_v24 }
 0x104   :  { %v467_v26 = vpop.f32.mrf.mxu0  ;;  %v540_v25 = vpop.f32.mrf.mxu1 }
 0x105   :  { %5640 = vst [vmem:[#allocation90_spill] sm:$0xff] %v4366_v30  ;;  %5641 = vst [vmem:[#allocation91_spill] sm:$0xff] %v4369_v27  ;;  %v4374_v41 = vadd.f32 %v467_v26, %v4291_v28  ;;  %v4377_v23 = vadd.f32 %v540_v25, %v4287_v43  ;;  %v241_v25 = vadd.f32 %v4159_v48, %v4163_v50 }
 0x106   :  { %v853_v12 = vpop.f32.mrf.mxu0  ;;  %v894_v29 = vpop.f32.mrf.mxu1 }
 0x107   :  { %5642 = vst [vmem:[#allocation92_spill] sm:$0xff] %v4374_v41  ;;  %5643 = vst [vmem:[#allocation93_spill] sm:$0xff] %v4377_v23  ;;  %v901_v30 = vadd.f32 %v853_v12, %v168_v35  ;;  %v903_v23 = vadd.f32 %v894_v29, %v241_v25  ;;  %v243_v41 = vadd.f32 %v4168_v45, %v4176_v40 }
 0x108   :  { %v855_v22 = vpop.f32.mrf.mxu0  ;;  %v896_v37 = vpop.f32.mrf.mxu1  ;;  %v434_v40 = vadd.f32 %v4277_v36, %v4291_v28  ;;  %v505_v28 = vadd.f32 %v4271_v46, %v4275_v38 }
 0x109   :  { %v2993_v27 = vmul.f32 -1.442695, %v901_v30  ;;  %v902_v39 = vadd.f32 %v855_v22, %v170_v31  ;;  %v2995_v49 = vmul.f32 -1.442695, %v903_v23  ;;  %v904_v24 = vadd.f32 %v896_v37, %v243_v41 }
 0x10a   :  { %v857_v21 = vpop.f32.mrf.mxu0  ;;  %v898_v20 = vpop.f32.mrf.mxu1 }
 0x10b   :  { %3205 = vpow2.f32 %v2993_v27  ;;  %v2994_v44 = vmul.f32 -1.442695, %v902_v39  ;;  %v432_v21 = vadd.f32 %v4269_v32, %v4283_v34 }
 0x10c   :  { %v858_v47 = vpop.f32.mrf.mxu0  ;;  %v899_v26 = vpop.f32.mrf.mxu1 }
 0x10d   :  { %3207 = vpow2.f32 %v2994_v44 }
 0x10e   :  { %3209 = vpow2.f32 %v2995_v49 }
 0x10f   :  { %3211 = vtanh.f32 %v904_v24 }
 0x118   :  { %v3206_v35 = vpop.eup %3205 }
 0x119   :  { %v914_v12 = vadd.f32 1.0, %v3206_v35 }
 0x11a   :  { %v3208_v22 = vpop.eup %3207 }
 0x11b   :  { %3213 = vrcp.f32 %v914_v12  ;;  %v915_v20 = vadd.f32 1.0, %v3208_v22  ;;  %v3210_v27 = vpop.eup %3209  ;;  %v507_v12 = vadd.f32 %v4279_v11, %v4287_v43 }
 0x11c   :  { %v3212_v50 = vpop.eup %3211  ;;  %v916_v47 = vadd.f32 1.0, %v3210_v27 }
 0x11d   :  { %3215 = vrcp.f32 %v915_v20 }
 0x126   :  { %v1130_v39 = vpop.f32.mrf.mxu0  ;;  %v1171_v48 = vpop.f32.mrf.mxu1 }
 0x127   :  { %v1178_v45 = vadd.f32 %v1130_v39, %v432_v21  ;;  %v1180_v36 = vadd.f32 %v1171_v48, %v505_v28  ;;  %v5647_v28 = vld [vmem:[#allocation9_spill] sm:$0xff] }
 0x128   :  { %v3214_v41 = vpop.eup %3213  ;;  %v1132_v29 = vpop.f32.mrf.mxu0 }
 0x129   :  { %v1173_v30 = vpop.f32.mrf.mxu1  ;;  %v925_v23 = vmul.f32 %v3214_v41, %v3212_v50  ;;  %v3028_v31 = vmul.f32 -1.442695, %v1178_v45  ;;  %v1179_v37 = vadd.f32 %v1132_v29, %v434_v40  ;;  %v3030_v22 = vmul.f32 -1.442695, %v1180_v36  ;;  %v5648_v36 = vld [vmem:[#allocation10_spill] sm:$0xff] }
 0x12a   :  { %v3216_v44 = vpop.eup %3215  ;;  %v1134_v26 = vpop.f32.mrf.mxu0  ;;  %v1181_v20 = vadd.f32 %v1173_v30, %v507_v12  ;;  %v5649_v12 = vld [vmem:[#allocation11_spill] sm:$0xff] }
 0x12b   :  { %v1175_v25 = vpop.f32.mrf.mxu1  ;;  %v924_v49 = vmul.f32 0.0, %v3216_v44  ;;  %3217 = vpow2.f32 %v3028_v31  ;;  %v3029_v32 = vmul.f32 -1.442695, %v1179_v37  ;;  %v5644_v37 = vld [vmem:[#allocation36_spill] sm:$0xff] }
 0x12c   :  { %v1135_v34 = vpop.f32.mrf.mxu0 }
 0x12d   :  { %v1176_v24 = vpop.f32.mrf.mxu1  ;;  %v4389_v35 = vadd.f32 %v925_v23, %v924_v49  ;;  %3219 = vpow2.f32 %v3029_v32  ;;  %v4440_v32 = vld [vmem:[%s5450_s4 + $0xe4] ss:$16 sps:$4 sm:$0xff]   ;;  %v4446_v34 = vld [vmem:[%s5450_s4 + $0xec] ss:$16 sps:$4 sm:$0xff]  }
 0x12e   :  { %3221 = vrcp.f32 %v916_v47  ;;  %v5645_v47 = vld [vmem:[#allocation37_spill] sm:$0xff]  ;;  %v5646_v24 = vld [vmem:[#allocation8_spill] sm:$0xff] }
 0x12f   :  { %3223 = vtanh.f32 %v4389_v35 }
 0x130   :  { %3225 = vpow2.f32 %v3030_v22  ;;  %v5650_v22 = vld [vmem:[#allocation12_spill] sm:$0xff] }
 0x131   :  { %3227 = vtanh.f32 %v1181_v20  ;;  %v5655_v20 = vld [vmem:[#allocation17_spill] sm:$0xff] }
 0x138   :  { %v3218_v21 = vpop.eup %3217 }
 0x139   :  { %v1191_v27 = vadd.f32 1.0, %v3218_v21  ;;  %v5656_v21 = vld [vmem:[#allocation18_spill] sm:$0xff] }
 0x13a   :  { %v3220_v39 = vpop.eup %3219 }
 0x13b   :  { %v3222_v50 = vpop.eup %3221  ;;  %3229 = vrcp.f32 %v1191_v27  ;;  %v1192_v40 = vadd.f32 1.0, %v3220_v39  ;;  %v5657_v27 = vld [vmem:[#allocation19_spill] sm:$0xff]  ;;  %v5658_v39 = vld [vmem:[#allocation20_spill] sm:$0xff] }
 0x13c   :  { %v3224_v45 = vpop.eup %3223 }
 0x13d   :  { %3231 = vrcp.f32 %v1192_v40  ;;  %v928_v41 = vmul.f32 %v3224_v45, %v3222_v50  ;;  %v3226_v11 = vpop.eup %3225  ;;  %v5659_v50 = vld [vmem:[#allocation21_spill] sm:$0xff]  ;;  %v5660_v40 = vld [vmem:[#allocation22_spill] sm:$0xff]  ;;  %v5661_v45 = vld [vmem:[#allocation23_spill] sm:$0xff] }
 0x13e   :  { %v3228_v43 = vpop.eup %3227  ;;  %v1193_v30 = vadd.f32 1.0, %v3226_v11  ;;  %v5664_v11 = vld [vmem:[#allocation26_spill] sm:$0xff] }
 0x13f   :  { %1206 = vst [vmem:[%s5455_s8] sm:$0xff] %v928_v41  ;;  %v1216_v46 = vpack.c.bf16 %v928_v41, %v928_v41  ;;  %v5662_v41 = vld [vmem:[#allocation24_spill] sm:$0xff] }
 0x140   :  { %3233 = vrcp.f32 %v1193_v30  ;;  %v5669_v30 = vld [vmem:[#allocation31_spill] sm:$0xff] }
 0x141   :  { %1250 = vmatmul.mubr.bf16.vlgmr.msra.gmra.mxu0 %v1216_v46  ;;  %1291 = vmatmul.mubr.bf16.vlgmr.msra.gmra.mxu1 %v1216_v46  ;;  %v5663_v46 = vld [vmem:[#allocation25_spill] sm:$0xff] }
 0x142   :  { %1335 = vmatpush1.bf16.msra.mxu0 %v3928_v51  ;;  %1376 = vmatpush1.bf16.msra.mxu1 %v3933_v52 }
 0x143   :  { %1336 = vmatprep.subr.bf16.mxu0 %v3940_v53  ;;  %1377 = vmatprep.subr.bf16.mxu1 %v3945_v54 }
 0x144   :  { %1366 = vmatprep.mubr.bf16.mxu0 %v5582_v42  ;;  %1407 = vmatprep.mubr.bf16.mxu1 %v5582_v42 }
 0x146   :  { %1337 = vmatpush1.bf16.msra.mxu0 %v3954_v56  ;;  %1378 = vmatpush1.bf16.msra.mxu1 %v3959_v57 }
 0x147   :  { %1338 = vmatprep.subr.bf16.mxu0 %v3966_v58  ;;  %1379 = vmatprep.subr.bf16.mxu1 %v3971_v59 }
 0x148   :  { %v3230_v38 = vpop.eup %3229 }
 0x149   :  { %v1202_v48 = vmul.f32 %v3230_v38, %v3228_v43  ;;  %v5665_v43 = vld [vmem:[#allocation27_spill] sm:$0xff]  ;;  %v5666_v38 = vld [vmem:[#allocation28_spill] sm:$0xff] }
 0x14a   :  { %v3232_v29 = vpop.eup %3231  ;;  %1339 = vmatpush1.bf16.msra.mxu0 %v3980_v60  ;;  %1380 = vmatpush1.bf16.msra.mxu1 %v3985_v61 }
 0x14b   :  { %v1201_v23 = vmul.f32 0.0, %v3232_v29  ;;  %1340 = vmatprep.subr.bf16.mxu0 %v3992_v62  ;;  %1381 = vmatprep.subr.bf16.mxu1 %v3997_v63  ;;  %v5668_v29 = vld [vmem:[#allocation30_spill] sm:$0xff] }
 0x14d   :  { %v4413_v31 = vadd.f32 %v1202_v48, %v1201_v23  ;;  %v3234_v44 = vpop.eup %3233  ;;  %v5667_v48 = vld [vmem:[#allocation29_spill] sm:$0xff]  ;;  %v5670_v23 = vld [vmem:[#allocation32_spill] sm:$0xff] }
 0x14e   :  { %1341 = vmatpush1.bf16.msra.mxu0 %v4004_v0  ;;  %1382 = vmatpush1.bf16.msra.mxu1 %v4009_v2 }
 0x14f   :  { %3235 = vtanh.f32 %v4413_v31  ;;  %1342 = vmatprep.subr.bf16.mxu0 %v4016_v3  ;;  %1383 = vmatprep.subr.bf16.mxu1 %v4021_v4 }
 0x152   :  { %1343 = vmatpush1.bf16.msra.mxu0 %v4028_v5  ;;  %1384 = vmatpush1.bf16.msra.mxu1 %v4033_v6 }
 0x153   :  { %1344 = vmatprep.subr.bf16.mxu0 %v4040_v7  ;;  %1385 = vmatprep.subr.bf16.mxu1 %v4045_v8 }
 0x156   :  { %1345 = vmatpush1.bf16.msra.mxu0 %v4052_v9  ;;  %1386 = vmatpush1.bf16.msra.mxu1 %v4057_v10 }
 0x157   :  { %1346 = vmatprep.subr.bf16.mxu0 %v4064_v13  ;;  %1387 = vmatprep.subr.bf16.mxu1 %v4069_v14 }
 0x15a   :  { %1347 = vmatpush1.bf16.msra.mxu0 %v4076_v15  ;;  %1388 = vmatpush1.bf16.msra.mxu1 %v5644_v37 }
 0x15b   :  { %1348 = vmatprep.subr.bf16.mxu0 %v4088_v33  ;;  %1389 = vmatprep.subr.bf16.mxu1 %v5645_v47 }
 0x15c   :  { %v3236_v26 = vpop.eup %3235 }
 0x15d   :  { %v1205_v25 = vmul.f32 %v3236_v26, %v3234_v44  ;;  %v5671_v44 = vld [vmem:[#allocation33_spill] sm:$0xff]  ;;  %v5672_v26 = vld [vmem:[#allocation34_spill] sm:$0xff] }
 0x15e   :  { %1349 = vmatpush1.bf16.msra.mxu0 %v4100_v1  ;;  %1390 = vmatpush1.bf16.msra.mxu1 %v4105_v55 }
 0x15f   :  { %3031 = vst [vmem:[%s5456_s9 + $0x38] sm:$0xff] %v1205_v25  ;;  %v1333_v49 = vpack.c.bf16 %v1205_v25, %v1205_v25  ;;  %1456 = vmatprep.subr.bf16.mxu0 %v4440_v32  ;;  %1497 = vmatprep.subr.bf16.mxu1 %v4446_v34  ;;  %v5673_v25 = vld [vmem:[#allocation35_spill] sm:$0xff] }
 0x161   :  { %1367 = vmatmul.mubr.bf16.vlgmr.msra.gmra.mxu0 %v1333_v49  ;;  %1408 = vmatmul.mubr.bf16.vlgmr.msra.gmra.mxu1 %v1333_v49 }
 0x162   :  { %1457 = vmatpush1.bf16.msra.mxu0 %v3713_v16  ;;  %1498 = vmatpush1.bf16.msra.mxu1 %v3718_v17  ;;  %v5651_v16 = vld [vmem:[#allocation13_spill] sm:$0xff]  ;;  %v5652_v17 = vld [vmem:[#allocation14_spill] sm:$0xff] }
 0x163   :  { %1458 = vmatprep.subr.bf16.mxu0 %v3723_v18  ;;  %1499 = vmatprep.subr.bf16.mxu1 %v3728_v19  ;;  %v5653_v18 = vld [vmem:[#allocation15_spill] sm:$0xff]  ;;  %v5654_v19 = vld [vmem:[#allocation16_spill] sm:$0xff] }
 0x164   :  { %1488 = vmatprep.mubr.bf16.mxu0 %v5582_v42  ;;  %1529 = vmatprep.mubr.bf16.mxu1 %v5582_v42 }
 0x166   :  { %1459 = vmatpush1.bf16.msra.mxu0 %v5646_v24  ;;  %1500 = vmatpush1.bf16.msra.mxu1 %v5647_v28  ;;  %v5674_v28 = vld [vmem:[#allocation38_spill] sm:$0xff] }
 0x167   :  { %1460 = vmatprep.subr.bf16.mxu0 %v5648_v36  ;;  %1501 = vmatprep.subr.bf16.mxu1 %v5649_v12 }
 0x16a   :  { %1461 = vmatpush1.bf16.msra.mxu0 %v5650_v22  ;;  %1502 = vmatpush1.bf16.msra.mxu1 %v5651_v16 }
 0x16b   :  { %1462 = vmatprep.subr.bf16.mxu0 %v5652_v17  ;;  %1503 = vmatprep.subr.bf16.mxu1 %v5653_v18  ;;  %v5675_v17 = vld [vmem:[#allocation40_spill] sm:$0xff] }
 0x16e   :  { %1463 = vmatpush1.bf16.msra.mxu0 %v5654_v19  ;;  %1504 = vmatpush1.bf16.msra.mxu1 %v5655_v20 }
 0x16f   :  { %1464 = vmatprep.subr.bf16.mxu0 %v5656_v21  ;;  %1505 = vmatprep.subr.bf16.mxu1 %v5657_v27 }
 0x172   :  { %1465 = vmatpush1.bf16.msra.mxu0 %v5658_v39  ;;  %1506 = vmatpush1.bf16.msra.mxu1 %v5659_v50  ;;  %v5676_v50 = vld [vmem:[#allocation39_spill] sm:$0xff] }
 0x173   :  { %1466 = vmatprep.subr.bf16.mxu0 %v5660_v40  ;;  %1507 = vmatprep.subr.bf16.mxu1 %v5661_v45 }
 0x176   :  { %1467 = vmatpush1.bf16.msra.mxu0 %v5662_v41  ;;  %1508 = vmatpush1.bf16.msra.mxu1 %v5663_v46  ;;  %v5677_v41 = vld [vmem:[#allocation41_spill] sm:$0xff] }
 0x177   :  { %1468 = vmatprep.subr.bf16.mxu0 %v5664_v11  ;;  %1509 = vmatprep.subr.bf16.mxu1 %v5665_v43 }
 0x17a   :  { %1469 = vmatpush1.bf16.msra.mxu0 %v5666_v38  ;;  %1510 = vmatpush1.bf16.msra.mxu1 %v5667_v48 }
 0x17b   :  { %1470 = vmatprep.subr.bf16.mxu0 %v5668_v29  ;;  %1511 = vmatprep.subr.bf16.mxu1 %v5669_v30 }
 0x17e   :  { %1471 = vmatpush1.bf16.msra.mxu0 %v5670_v23  ;;  %1512 = vmatpush1.bf16.msra.mxu1 %v5671_v44 }
 0x17f   :  { %1573 = vmatprep.subr.bf16.mxu0 %v5672_v26  ;;  %1614 = vmatprep.subr.bf16.mxu1 %v5673_v25  ;;  %v5678_v26 = vld [vmem:[#allocation66_spill] sm:$0xff] }
 0x201   :  { %v1251_v49 = vpop.f32.mrf.mxu0  ;;  %v1292_v24 = vpop.f32.mrf.mxu1 }
 0x202   :  { %v1299_v36 = vadd.f32 %v1251_v49, %v5674_v28  ;;  %v1301_v40 = vadd.f32 %v1292_v24, %v5676_v50 }
 0x203   :  { %v1253_v12 = vpop.f32.mrf.mxu0  ;;  %v1294_v22 = vpop.f32.mrf.mxu1 }
 0x204   :  { %v3032_v16 = vmul.f32 -1.442695, %v1299_v36  ;;  %v1300_v18 = vadd.f32 %v1253_v12, %v5675_v17  ;;  %v3034_v45 = vmul.f32 -1.442695, %v1301_v40  ;;  %v1302_v46 = vadd.f32 %v1294_v22, %v5677_v41  ;;  %v5679_v22 = vld [vmem:[#allocation68_spill] sm:$0xff] }
 0x205   :  { %v1255_v19 = vpop.f32.mrf.mxu0  ;;  %v1296_v20 = vpop.f32.mrf.mxu1 }
 0x206   :  { %3237 = vpow2.f32 %v3032_v16  ;;  %v3033_v21 = vmul.f32 -1.442695, %v1300_v18 }
 0x207   :  { %v1256_v27 = vpop.f32.mrf.mxu0  ;;  %v1297_v39 = vpop.f32.mrf.mxu1 }
 0x208   :  { %3239 = vpow2.f32 %v3033_v21 }
 0x209   :  { %3241 = vpow2.f32 %v3034_v45  ;;  %v5680_v45 = vld [vmem:[#allocation67_spill] sm:$0xff] }
 0x20a   :  { %3243 = vtanh.f32 %v1302_v46 }
 0x213   :  { %v3238_v11 = vpop.eup %3237 }
 0x214   :  { %v1312_v43 = vadd.f32 1.0, %v3238_v11  ;;  %v5681_v11 = vld [vmem:[#allocation69_spill] sm:$0xff] }
 0x215   :  { %v3240_v38 = vpop.eup %3239 }
 0x216   :  { %3245 = vrcp.f32 %v1312_v43  ;;  %v1313_v48 = vadd.f32 1.0, %v3240_v38  ;;  %v3242_v29 = vpop.eup %3241 }
 0x217   :  { %v3244_v44 = vpop.eup %3243  ;;  %v1314_v18 = vadd.f32 1.0, %v3242_v29 }
 0x218   :  { %3247 = vrcp.f32 %v1313_v48 }
 0x221   :  { %v1368_v30 = vpop.f32.mrf.mxu0  ;;  %v1409_v23 = vpop.f32.mrf.mxu1 }
 0x222   :  { %v1416_v25 = vadd.f32 %v1368_v30, %v5678_v26  ;;  %v1418_v41 = vadd.f32 %v1409_v23, %v5680_v45 }
 0x223   :  { %v3246_v49 = vpop.eup %3245  ;;  %v1370_v28 = vpop.f32.mrf.mxu0 }
 0x224   :  { %v1411_v24 = vpop.f32.mrf.mxu1  ;;  %v1323_v36 = vmul.f32 %v3246_v49, %v3244_v44  ;;  %v3035_v12 = vmul.f32 -1.442695, %v1416_v25  ;;  %v1417_v16 = vadd.f32 %v1370_v28, %v5679_v22  ;;  %v3037_v46 = vmul.f32 -1.442695, %v1418_v41  ;;  %v4694_v22 = vld [vmem:[%s5450_s4 + $0x28] ss:$16 sps:$4 sm:$0xff]  }
 0x225   :  { %v3248_v17 = vpop.eup %3247  ;;  %v1372_v19 = vpop.f32.mrf.mxu0  ;;  %v1419_v43 = vadd.f32 %v1411_v24, %v5681_v11  ;;  %v4676_v24 = vld [vmem:[%s5450_s4 + $0x24] ss:$16 sps:$4 sm:$0xff]   ;;  %5698 = vst [vmem:[#allocation22_spill] sm:$0xff] %v4694_v22 }
 0x226   :  { %v1413_v20 = vpop.f32.mrf.mxu1  ;;  %v1322_v21 = vmul.f32 %v3248_v17, %v4389_v35  ;;  %3249 = vpow2.f32 %v3035_v12  ;;  %v3036_v27 = vmul.f32 -1.442695, %v1417_v16  ;;  %5695 = vst [vmem:[#allocation19_spill] sm:$0xff] %v4676_v24  ;;  %v4688_v12 = vld [vmem:[%s5450_s4 + $0x20] ss:$16 sps:$4 sm:$0xff]  }
 0x227   :  { %v1373_v39 = vpop.f32.mrf.mxu0  ;;  %5697 = vst [vmem:[#allocation21_spill] sm:$0xff] %v4688_v12  ;;  %v4700_v16 = vld [vmem:[%s5450_s4 + $0x4] ss:$16 sps:$4 sm:$0xff]   ;;  %v4706_v17 = vld [vmem:[%s5450_s4 + $0xc] ss:$16 sps:$4 sm:$0xff]  }
 0x228   :  { %v1414_v50 = vpop.f32.mrf.mxu1  ;;  %v4490_v40 = vadd.f32 %v1323_v36, %v1322_v21  ;;  %3251 = vpow2.f32 %v3036_v27  ;;  %v4682_v36 = vld [vmem:[%s5450_s4 + $0x2c] ss:$16 sps:$4 sm:$0xff]   ;;  %5699 = vst [vmem:[#allocation23_spill] sm:$0xff] %v4700_v16  ;;  %5700 = vst [vmem:[#allocation24_spill] sm:$0xff] %v4706_v17  ;;  %v4718_v19 = vld [vmem:[%s5450_s4 + $0x8] ss:$16 sps:$4 sm:$0xff]  }
 0x229   :  { %3253 = vrcp.f32 %v1314_v18  ;;  %5696 = vst [vmem:[#allocation20_spill] sm:$0xff] %v4682_v36  ;;  %v4712_v18 = vld [vmem:[%s5450_s4] ss:$16 sps:$4 sm:$0xff]   ;;  %5702 = vst [vmem:[#allocation26_spill] sm:$0xff] %v4718_v19  ;;  %v4724_v20 = vld [vmem:[%s5452_s5 + $0xe4] ss:$16 sps:$4 sm:$0xff]  }
 0x22a   :  { %3255 = vtanh.f32 %v4490_v40  ;;  %5701 = vst [vmem:[#allocation25_spill] sm:$0xff] %v4712_v18  ;;  %5703 = vst [vmem:[#allocation27_spill] sm:$0xff] %v4724_v20  ;;  %v4730_v21 = vld [vmem:[%s5452_s5 + $0xec] ss:$16 sps:$4 sm:$0xff]   ;;  %v5705_v50 = vld [vmem:[#allocation42_spill] sm:$0xff] }
 0x22b   :  { %3257 = vpow2.f32 %v3037_v46  ;;  %5704 = vst [vmem:[#allocation28_spill] sm:$0xff] %v4730_v21 }
 0x22c   :  { %3259 = vtanh.f32 %v1419_v43  ;;  %v5706_v43 = vld [vmem:[#allocation44_spill] sm:$0xff] }
 0x233   :  { %v3250_v38 = vpop.eup %3249 }
 0x234   :  { %v1429_v48 = vadd.f32 1.0, %v3250_v38 }
 0x235   :  { %v3252_v29 = vpop.eup %3251 }
 0x236   :  { %v3254_v35 = vpop.eup %3253  ;;  %3261 = vrcp.f32 %v1429_v48  ;;  %v1430_v30 = vadd.f32 1.0, %v3252_v29 }
 0x237   :  { %v3256_v44 = vpop.eup %3255 }
 0x238   :  { %3263 = vrcp.f32 %v1430_v30  ;;  %v1326_v26 = vmul.f32 %v3256_v44, %v3254_v35  ;;  %v3258_v23 = vpop.eup %3257 }
 0x239   :  { %v3260_v49 = vpop.eup %3259 }
 0x23a   :  { %3038 = vst [vmem:[%s5455_s8 + $0x8] sm:$0xff] %v1326_v26  ;;  %v1455_v25 = vpack.c.bf16 %v1326_v26, %v1326_v26  ;;  %v5707_v26 = vld [vmem:[#allocation43_spill] sm:$0xff] }
 0x23c   :  { %1489 = vmatmul.mubr.bf16.vlgmr.msra.gmra.mxu0 %v1455_v25  ;;  %1530 = vmatmul.mubr.bf16.vlgmr.msra.gmra.mxu1 %v1455_v25 }
 0x23d   :  { %1574 = vmatpush1.bf16.msra.mxu0 %v3928_v51  ;;  %1615 = vmatpush1.bf16.msra.mxu1 %v3933_v52 }
 0x23e   :  { %1575 = vmatprep.subr.bf16.mxu0 %v3940_v53  ;;  %1616 = vmatprep.subr.bf16.mxu1 %v3945_v54  ;;  %v1431_v53 = vadd.f32 1.0, %v3258_v23 }
 0x23f   :  { %1605 = vmatprep.mubr.bf16.mxu0 %v5582_v42  ;;  %1646 = vmatprep.mubr.bf16.mxu1 %v5582_v42 }
 0x240   :  { %3265 = vrcp.f32 %v1431_v53 }
 0x241   :  { %1576 = vmatpush1.bf16.msra.mxu0 %v3954_v56  ;;  %1617 = vmatpush1.bf16.msra.mxu1 %v3959_v57 }
 0x242   :  { %1577 = vmatprep.subr.bf16.mxu0 %v3966_v58  ;;  %1618 = vmatprep.subr.bf16.mxu1 %v3971_v59 }
 0x243   :  { %v3262_v51 = vpop.eup %3261 }
 0x244   :  { %v1440_v52 = vmul.f32 %v3262_v51, %v3260_v49  ;;  %v5708_v49 = vld [vmem:[#allocation45_spill] sm:$0xff] }
 0x245   :  { %v3264_v28 = vpop.eup %3263  ;;  %1578 = vmatpush1.bf16.msra.mxu0 %v3980_v60  ;;  %1619 = vmatpush1.bf16.msra.mxu1 %v3985_v61  ;;  %v4542_v61 = vld [vmem:[%s5450_s4 + $0xe0] ss:$16 sps:$4 sm:$0xff]  }
 0x246   :  { %v1439_v54 = vmul.f32 %v3264_v28, %v4413_v31  ;;  %1579 = vmatprep.subr.bf16.mxu0 %v3992_v62  ;;  %1620 = vmatprep.subr.bf16.mxu1 %v3997_v63  ;;  %v4560_v62 = vld [vmem:[%s5450_s4 + $0xcc] ss:$16 sps:$4 sm:$0xff]   ;;  %v4568_v63 = vld [vmem:[%s5450_s4 + $0xc0] ss:$16 sps:$4 sm:$0xff]  }
 0x247   :  { %v4658_v31 = vld [vmem:[%s5450_s4 + $0x4c] ss:$16 sps:$4 sm:$0xff]  }
 0x248   :  { %v4513_v56 = vadd.f32 %v1440_v52, %v1439_v54  ;;  %5692 = vst [vmem:[#allocation16_spill] sm:$0xff] %v4658_v31 }
 0x249   :  { %1580 = vmatpush1.bf16.msra.mxu0 %v4004_v0  ;;  %1621 = vmatpush1.bf16.msra.mxu1 %v4009_v2  ;;  %v4574_v0 = vld [vmem:[%s5450_s4 + $0xc8] ss:$16 sps:$4 sm:$0xff]   ;;  %v4580_v2 = vld [vmem:[%s5450_s4 + $0xa4] ss:$16 sps:$4 sm:$0xff]  }
 0x24a   :  { %3267 = vtanh.f32 %v4513_v56  ;;  %1581 = vmatprep.subr.bf16.mxu0 %v4016_v3  ;;  %1622 = vmatprep.subr.bf16.mxu1 %v4021_v4  ;;  %v4586_v3 = vld [vmem:[%s5450_s4 + $0xac] ss:$16 sps:$4 sm:$0xff]   ;;  %v4592_v4 = vld [vmem:[%s5450_s4 + $0xa0] ss:$16 sps:$4 sm:$0xff]  }
 0x24d   :  { %1582 = vmatpush1.bf16.msra.mxu0 %v4028_v5  ;;  %1623 = vmatpush1.bf16.msra.mxu1 %v4033_v6  ;;  %v3266_v57 = vpop.eup %3265  ;;  %v4598_v5 = vld [vmem:[%s5450_s4 + $0xa8] ss:$16 sps:$4 sm:$0xff]   ;;  %v4604_v6 = vld [vmem:[%s5450_s4 + $0x84] ss:$16 sps:$4 sm:$0xff]  }
 0x24e   :  { %1583 = vmatprep.subr.bf16.mxu0 %v4040_v7  ;;  %1624 = vmatprep.subr.bf16.mxu1 %v4045_v8  ;;  %5682 = vst [vmem:[#allocation36_spill] sm:$0xff] %v4598_v5  ;;  %5683 = vst [vmem:[#allocation37_spill] sm:$0xff] %v4604_v6  ;;  %v4610_v7 = vld [vmem:[%s5450_s4 + $0x8c] ss:$16 sps:$4 sm:$0xff]   ;;  %v4616_v8 = vld [vmem:[%s5450_s4 + $0x80] ss:$16 sps:$4 sm:$0xff]  }
 0x24f   :  { %5684 = vst [vmem:[#allocation8_spill] sm:$0xff] %v4610_v7  ;;  %5685 = vst [vmem:[#allocation9_spill] sm:$0xff] %v4616_v8 }
 0x251   :  { %1584 = vmatpush1.bf16.msra.mxu0 %v4052_v9  ;;  %1625 = vmatpush1.bf16.msra.mxu1 %v4057_v10  ;;  %v4622_v9 = vld [vmem:[%s5450_s4 + $0x88] ss:$16 sps:$4 sm:$0xff]   ;;  %v4628_v10 = vld [vmem:[%s5450_s4 + $0x64] ss:$16 sps:$4 sm:$0xff]  }
 0x252   :  { %1585 = vmatprep.subr.bf16.mxu0 %v4064_v13  ;;  %1626 = vmatprep.subr.bf16.mxu1 %v4069_v14  ;;  %5686 = vst [vmem:[#allocation10_spill] sm:$0xff] %v4622_v9  ;;  %5687 = vst [vmem:[#allocation11_spill] sm:$0xff] %v4628_v10  ;;  %v4634_v13 = vld [vmem:[%s5450_s4 + $0x6c] ss:$16 sps:$4 sm:$0xff]   ;;  %v4640_v14 = vld [vmem:[%s5450_s4 + $0x60] ss:$16 sps:$4 sm:$0xff]  }
 0x253   :  { %5688 = vst [vmem:[#allocation12_spill] sm:$0xff] %v4634_v13  ;;  %5689 = vst [vmem:[#allocation13_spill] sm:$0xff] %v4640_v14 }
 0x255   :  { %1586 = vmatpush1.bf16.msra.mxu0 %v4076_v15  ;;  %1627 = vmatpush1.bf16.msra.mxu1 %v5644_v37  ;;  %v4646_v15 = vld [vmem:[%s5450_s4 + $0x68] ss:$16 sps:$4 sm:$0xff]   ;;  %v4664_v37 = vld [vmem:[%s5450_s4 + $0x40] ss:$16 sps:$4 sm:$0xff]  }
 0x256   :  { %1587 = vmatprep.subr.bf16.mxu0 %v4088_v33  ;;  %1628 = vmatprep.subr.bf16.mxu1 %v5645_v47  ;;  %5690 = vst [vmem:[#allocation14_spill] sm:$0xff] %v4646_v15  ;;  %v4652_v33 = vld [vmem:[%s5450_s4 + $0x44] ss:$16 sps:$4 sm:$0xff]   ;;  %5693 = vst [vmem:[#allocation17_spill] sm:$0xff] %v4664_v37  ;;  %v4670_v47 = vld [vmem:[%s5450_s4 + $0x48] ss:$16 sps:$4 sm:$0xff]  }
 0x257   :  { %v3268_v58 = vpop.eup %3267  ;;  %5691 = vst [vmem:[#allocation15_spill] sm:$0xff] %v4652_v33  ;;  %5694 = vst [vmem:[#allocation18_spill] sm:$0xff] %v4670_v47 }
 0x258   :  { %v1443_v59 = vmul.f32 %v3268_v58, %v3266_v57 }
 0x259   :  { %1588 = vmatpush1.bf16.msra.mxu0 %v4100_v1  ;;  %1629 = vmatpush1.bf16.msra.mxu1 %v4105_v55  ;;  %v4548_v1 = vld [vmem:[%s5450_s4 + $0xe8] ss:$16 sps:$4 sm:$0xff]   ;;  %v4554_v55 = vld [vmem:[%s5450_s4 + $0xc4] ss:$16 sps:$4 sm:$0xff]  }
 0x25a   :  { %3039 = vst [vmem:[%s5456_s9 + $0x30] sm:$0xff] %v1443_v59  ;;  %v1572_v60 = vpack.c.bf16 %v1443_v59, %v1443_v59  ;;  %1695 = vmatprep.subr.bf16.mxu0 %v4440_v32  ;;  %1736 = vmatprep.subr.bf16.mxu1 %v4446_v34 }
 0x25c   :  { %1606 = vmatmul.mubr.bf16.vlgmr.msra.gmra.mxu0 %v1572_v60  ;;  %1647 = vmatmul.mubr.bf16.vlgmr.msra.gmra.mxu1 %v1572_v60 }
 0x25d   :  { %1696 = vmatpush1.bf16.msra.mxu0 %v4542_v61  ;;  %1737 = vmatpush1.bf16.msra.mxu1 %v4548_v1 }
 0x25e   :  { %1697 = vmatprep.subr.bf16.mxu0 %v4554_v55  ;;  %1738 = vmatprep.subr.bf16.mxu1 %v4560_v62 }
 0x25f   :  { %1727 = vmatprep.mubr.bf16.mxu0 %v5582_v42  ;;  %1768 = vmatprep.mubr.bf16.mxu1 %v5582_v42 }
 0x261   :  { %1698 = vmatpush1.bf16.msra.mxu0 %v4568_v63  ;;  %1739 = vmatpush1.bf16.msra.mxu1 %v4574_v0 }
 0x262   :  { %1699 = vmatprep.subr.bf16.mxu0 %v4580_v2  ;;  %1740 = vmatprep.subr.bf16.mxu1 %v4586_v3 }
 0x265   :  { %1700 = vmatpush1.bf16.msra.mxu0 %v4592_v4  ;;  %1741 = vmatpush1.bf16.msra.mxu1 %v4598_v5 }
 0x266   :  { %1701 = vmatprep.subr.bf16.mxu0 %v4604_v6  ;;  %1742 = vmatprep.subr.bf16.mxu1 %v4610_v7 }
 0x269   :  { %1702 = vmatpush1.bf16.msra.mxu0 %v4616_v8  ;;  %1743 = vmatpush1.bf16.msra.mxu1 %v4622_v9 }
 0x26a   :  { %1703 = vmatprep.subr.bf16.mxu0 %v4628_v10  ;;  %1744 = vmatprep.subr.bf16.mxu1 %v4634_v13 }
 0x26d   :  { %1704 = vmatpush1.bf16.msra.mxu0 %v4640_v14  ;;  %1745 = vmatpush1.bf16.msra.mxu1 %v4646_v15 }
 0x26e   :  { %1705 = vmatprep.subr.bf16.mxu0 %v4652_v33  ;;  %1746 = vmatprep.subr.bf16.mxu1 %v4658_v31 }
 0x271   :  { %1706 = vmatpush1.bf16.msra.mxu0 %v4664_v37  ;;  %1747 = vmatpush1.bf16.msra.mxu1 %v4670_v47 }
 0x272   :  { %1707 = vmatprep.subr.bf16.mxu0 %v4676_v24  ;;  %1748 = vmatprep.subr.bf16.mxu1 %v4682_v36 }
 0x275   :  { %1708 = vmatpush1.bf16.msra.mxu0 %v4688_v12  ;;  %1749 = vmatpush1.bf16.msra.mxu1 %v4694_v22 }
 0x276   :  { %1709 = vmatprep.subr.bf16.mxu0 %v4700_v16  ;;  %1750 = vmatprep.subr.bf16.mxu1 %v4706_v17 }
 0x279   :  { %1710 = vmatpush1.bf16.msra.mxu0 %v4712_v18  ;;  %1751 = vmatpush1.bf16.msra.mxu1 %v4718_v19 }
 0x27a   :  { %1812 = vmatprep.subr.bf16.mxu0 %v4724_v20  ;;  %1853 = vmatprep.subr.bf16.mxu1 %v4730_v21 }
 0x2fc   :  { %v1490_v27 = vpop.f32.mrf.mxu0  ;;  %v1531_v39 = vpop.f32.mrf.mxu1 }
 0x2fd   :  { %v1538_v45 = vadd.f32 %v1490_v27, %v5705_v50  ;;  %v1540_v25 = vadd.f32 %v1531_v39, %v5707_v26  ;;  %v5709_v27 = vld [vmem:[#allocation70_spill] sm:$0xff] }
 0x2fe   :  { %v1492_v41 = vpop.f32.mrf.mxu0  ;;  %v1533_v46 = vpop.f32.mrf.mxu1 }
 0x2ff   :  { %v3040_v11 = vmul.f32 -1.442695, %v1538_v45  ;;  %v1539_v38 = vadd.f32 %v1492_v41, %v5706_v43  ;;  %v3042_v23 = vmul.f32 -1.442695, %v1540_v25  ;;  %v1541_v51 = vadd.f32 %v1533_v46, %v5708_v49  ;;  %v5710_v46 = vld [vmem:[#allocation72_spill] sm:$0xff] }
 0x300   :  { %v1494_v48 = vpop.f32.mrf.mxu0  ;;  %v1535_v29 = vpop.f32.mrf.mxu1 }
 0x301   :  { %3269 = vpow2.f32 %v3040_v11  ;;  %v3041_v35 = vmul.f32 -1.442695, %v1539_v38 }
 0x302   :  { %v1495_v30 = vpop.f32.mrf.mxu0  ;;  %v1536_v44 = vpop.f32.mrf.mxu1 }
 0x303   :  { %3271 = vpow2.f32 %v3041_v35 }
 0x304   :  { %3273 = vpow2.f32 %v3042_v23 }
 0x305   :  { %3275 = vtanh.f32 %v1541_v51  ;;  %v5711_v51 = vld [vmem:[#allocation71_spill] sm:$0xff] }
 0x30e   :  { %v3270_v52 = vpop.eup %3269 }
 0x30f   :  { %v1551_v28 = vadd.f32 1.0, %v3270_v52 }
 0x310   :  { %v3272_v53 = vpop.eup %3271 }
 0x311   :  { %3277 = vrcp.f32 %v1551_v28  ;;  %v1552_v54 = vadd.f32 1.0, %v3272_v53  ;;  %v3274_v57 = vpop.eup %3273  ;;  %v5712_v53 = vld [vmem:[#allocation73_spill] sm:$0xff] }
 0x312   :  { %v3276_v60 = vpop.eup %3275  ;;  %v1553_v29 = vadd.f32 1.0, %v3274_v57 }
 0x313   :  { %3279 = vrcp.f32 %v1552_v54 }
 0x31c   :  { %v1607_v58 = vpop.f32.mrf.mxu0  ;;  %v1648_v59 = vpop.f32.mrf.mxu1 }
 0x31d   :  { %v1655_v50 = vadd.f32 %v1607_v58, %v5709_v27  ;;  %v1657_v52 = vadd.f32 %v1648_v59, %v5711_v51  ;;  %v4751_v59 = vld [vmem:[%s5452_s5 + $0xe0] ss:$16 sps:$4 sm:$0xff]  }
 0x31e   :  { %v3278_v45 = vpop.eup %3277  ;;  %v1609_v41 = vpop.f32.mrf.mxu0  ;;  %v4801_v51 = vld [vmem:[%s5452_s5 + $0xa0] ss:$16 sps:$4 sm:$0xff]  }
 0x31f   :  { %v1650_v39 = vpop.f32.mrf.mxu1  ;;  %v1562_v11 = vmul.f32 %v3278_v45, %v3276_v60  ;;  %v3043_v43 = vmul.f32 -1.442695, %v1655_v50  ;;  %v1656_v38 = vadd.f32 %v1609_v41, %v5710_v46  ;;  %v3045_v28 = vmul.f32 -1.442695, %v1657_v52  ;;  %v4807_v52 = vld [vmem:[%s5452_s5 + $0xa8] ss:$16 sps:$4 sm:$0xff]  }
 0x320   :  { %v3280_v48 = vpop.eup %3279  ;;  %v1611_v35 = vpop.f32.mrf.mxu0  ;;  %v1658_v54 = vadd.f32 %v1650_v39, %v5712_v53  ;;  %v4757_v39 = vld [vmem:[%s5452_s5 + $0xe8] ss:$16 sps:$4 sm:$0xff]   ;;  %v4814_v53 = vld [vmem:[%s5452_s5 + $0x84] ss:$16 sps:$4 sm:$0xff]  }
 0x321   :  { %v1652_v30 = vpop.f32.mrf.mxu1  ;;  %v1561_v44 = vmul.f32 %v3280_v48, %v4490_v40  ;;  %3281 = vpow2.f32 %v3043_v43  ;;  %v3044_v26 = vmul.f32 -1.442695, %v1656_v38  ;;  %v4769_v43 = vld [vmem:[%s5452_s5 + $0xcc] ss:$16 sps:$4 sm:$0xff]   ;;  %v4777_v38 = vld [vmem:[%s5452_s5 + $0xc0] ss:$16 sps:$4 sm:$0xff]  }
 0x322   :  { %v1612_v25 = vpop.f32.mrf.mxu0  ;;  %v4783_v48 = vld [vmem:[%s5452_s5 + $0xc8] ss:$16 sps:$4 sm:$0xff]   ;;  %v4789_v35 = vld [vmem:[%s5452_s5 + $0xa4] ss:$16 sps:$4 sm:$0xff]   ;;  %v4795_v30 = vld [vmem:[%s5452_s5 + $0xac] ss:$16 sps:$4 sm:$0xff]  }
 0x323   :  { %v1653_v23 = vpop.f32.mrf.mxu1  ;;  %v4740_v49 = vadd.f32 %v1562_v11, %v1561_v44  ;;  %3283 = vpow2.f32 %v3044_v26  ;;  %v4763_v11 = vld [vmem:[%s5452_s5 + $0xc4] ss:$16 sps:$4 sm:$0xff]  }
 0x324   :  { %3285 = vrcp.f32 %v1553_v29 }
 0x325   :  { %3287 = vtanh.f32 %v4740_v49 }
 0x326   :  { %3289 = vpow2.f32 %v3045_v28 }
 0x327   :  { %3291 = vtanh.f32 %v1658_v54  ;;  %v4820_v54 = vld [vmem:[%s5452_s5 + $0x8c] ss:$16 sps:$4 sm:$0xff]  }
 0x32e   :  { %v3282_v57 = vpop.eup %3281 }
 0x32f   :  { %v1668_v58 = vadd.f32 1.0, %v3282_v57 }
 0x330   :  { %v3284_v60 = vpop.eup %3283 }
 0x331   :  { %v3286_v40 = vpop.eup %3285  ;;  %3293 = vrcp.f32 %v1668_v58  ;;  %v1669_v27 = vadd.f32 1.0, %v3284_v60  ;;  %v4834_v58 = vld [vmem:[%s5452_s5 + $0x88] ss:$16 sps:$4 sm:$0xff]   ;;  %v4841_v60 = vld [vmem:[%s5452_s5 + $0x64] ss:$16 sps:$4 sm:$0xff]  }
 0x332   :  { %v3288_v50 = vpop.eup %3287 }
 0x333   :  { %3295 = vrcp.f32 %v1669_v27  ;;  %v1565_v45 = vmul.f32 %v3288_v50, %v3286_v40  ;;  %v3290_v46 = vpop.eup %3289  ;;  %v4847_v40 = vld [vmem:[%s5452_s5 + $0x6c] ss:$16 sps:$4 sm:$0xff]   ;;  %v4853_v27 = vld [vmem:[%s5452_s5 + $0x60] ss:$16 sps:$4 sm:$0xff]   ;;  %v4859_v50 = vld [vmem:[%s5452_s5 + $0x68] ss:$16 sps:$4 sm:$0xff]  }
 0x334   :  { %v3292_v29 = vpop.eup %3291  ;;  %v1670_v23 = vadd.f32 1.0, %v3290_v46  ;;  %v4877_v46 = vld [vmem:[%s5452_s5 + $0x40] ss:$16 sps:$4 sm:$0xff]  }
 0x335   :  { %3046 = vst [vmem:[%s5455_s8 + $0x10] sm:$0xff] %v1565_v45  ;;  %v1694_v41 = vpack.c.bf16 %v1565_v45, %v1565_v45  ;;  %v4865_v45 = vld [vmem:[%s5452_s5 + $0x44] ss:$16 sps:$4 sm:$0xff]  }
 0x336   :  { %3297 = vrcp.f32 %v1670_v23  ;;  %v4907_v23 = vld [vmem:[%s5452_s5 + $0x28] ss:$16 sps:$4 sm:$0xff]  }
 0x337   :  { %1728 = vmatmul.mubr.bf16.vlgmr.msra.gmra.mxu0 %v1694_v41  ;;  %1769 = vmatmul.mubr.bf16.vlgmr.msra.gmra.mxu1 %v1694_v41  ;;  %v4871_v41 = vld [vmem:[%s5452_s5 + $0x4c] ss:$16 sps:$4 sm:$0xff]   ;;  %5717 = vst [vmem:[#allocation33_spill] sm:$0xff] %v4907_v23 }
 0x338   :  { %1813 = vmatpush1.bf16.msra.mxu0 %v4751_v59  ;;  %1854 = vmatpush1.bf16.msra.mxu1 %v4757_v39 }
 0x339   :  { %1814 = vmatprep.subr.bf16.mxu0 %v4763_v11  ;;  %1855 = vmatprep.subr.bf16.mxu1 %v4769_v43 }
 0x33a   :  { %1844 = vmatprep.mubr.bf16.mxu0 %v5582_v42  ;;  %1885 = vmatprep.mubr.bf16.mxu1 %v5582_v42 }
 0x33c   :  { %1815 = vmatpush1.bf16.msra.mxu0 %v4777_v38  ;;  %1856 = vmatpush1.bf16.msra.mxu1 %v4783_v48 }
 0x33d   :  { %1816 = vmatprep.subr.bf16.mxu0 %v4789_v35  ;;  %1857 = vmatprep.subr.bf16.mxu1 %v4795_v30 }
 0x33e   :  { %v3294_v44 = vpop.eup %3293 }
 0x33f   :  { %v1679_v26 = vmul.f32 %v3294_v44, %v3292_v29  ;;  %v4883_v29 = vld [vmem:[%s5452_s5 + $0x48] ss:$16 sps:$4 sm:$0xff]   ;;  %v4889_v44 = vld [vmem:[%s5452_s5 + $0x24] ss:$16 sps:$4 sm:$0xff]  }
 0x340   :  { %v3296_v25 = vpop.eup %3295  ;;  %1817 = vmatpush1.bf16.msra.mxu0 %v4801_v51  ;;  %1858 = vmatpush1.bf16.msra.mxu1 %v4807_v52  ;;  %5713 = vst [vmem:[#allocation29_spill] sm:$0xff] %v4883_v29  ;;  %5714 = vst [vmem:[#allocation30_spill] sm:$0xff] %v4889_v44 }
 0x341   :  { %v1678_v28 = vmul.f32 %v3296_v25, %v4513_v56  ;;  %1818 = vmatprep.subr.bf16.mxu0 %v4814_v53  ;;  %1859 = vmatprep.subr.bf16.mxu1 %v4820_v54  ;;  %v4828_v56 = vld [vmem:[%s5452_s5 + $0x80] ss:$16 sps:$4 sm:$0xff]  }
 0x342   :  { %v4901_v25 = vld [vmem:[%s5452_s5 + $0x20] ss:$16 sps:$4 sm:$0xff]  }
 0x343   :  { %v4823_v57 = vadd.f32 %v1679_v26, %v1678_v28  ;;  %v4895_v26 = vld [vmem:[%s5452_s5 + $0x2c] ss:$16 sps:$4 sm:$0xff]   ;;  %5716 = vst [vmem:[#allocation32_spill] sm:$0xff] %v4901_v25  ;;  %v3298_v28 = vpop.eup %3297 }
 0x344   :  { %1819 = vmatpush1.bf16.msra.mxu0 %v4828_v56  ;;  %1860 = vmatpush1.bf16.msra.mxu1 %v4834_v58  ;;  %5715 = vst [vmem:[#allocation31_spill] sm:$0xff] %v4895_v26 }
 0x345   :  { %3299 = vtanh.f32 %v4823_v57  ;;  %1820 = vmatprep.subr.bf16.mxu0 %v4841_v60  ;;  %1861 = vmatprep.subr.bf16.mxu1 %v4847_v40 }
 0x348   :  { %1821 = vmatpush1.bf16.msra.mxu0 %v4853_v27  ;;  %1862 = vmatpush1.bf16.msra.mxu1 %v4859_v50 }
 0x349   :  { %1822 = vmatprep.subr.bf16.mxu0 %v4865_v45  ;;  %1863 = vmatprep.subr.bf16.mxu1 %v4871_v41 }
 0x34c   :  { %1823 = vmatpush1.bf16.msra.mxu0 %v4877_v46  ;;  %1864 = vmatpush1.bf16.msra.mxu1 %v4883_v29 }
 0x34d   :  { %1824 = vmatprep.subr.bf16.mxu0 %v4889_v44  ;;  %1865 = vmatprep.subr.bf16.mxu1 %v4895_v26  ;;  %v4913_v44 = vld [vmem:[%s5452_s5 + $0x4] ss:$16 sps:$4 sm:$0xff]   ;;  %v4919_v26 = vld [vmem:[%s5452_s5 + $0xc] ss:$16 sps:$4 sm:$0xff]  }
 0x34e   :  { %5718 = vst [vmem:[#allocation34_spill] sm:$0xff] %v4913_v44  ;;  %5719 = vst [vmem:[#allocation35_spill] sm:$0xff] %v4919_v26 }
 0x350   :  { %1825 = vmatpush1.bf16.msra.mxu0 %v4901_v25  ;;  %1866 = vmatpush1.bf16.msra.mxu1 %v4907_v23  ;;  %v4925_v23 = vld [vmem:[%s5452_s5] ss:$16 sps:$4 sm:$0xff]  }
 0x351   :  { %1826 = vmatprep.subr.bf16.mxu0 %v4913_v44  ;;  %1867 = vmatprep.subr.bf16.mxu1 %v4919_v26  ;;  %v4931_v44 = vld [vmem:[%s5452_s5 + $0x8] ss:$16 sps:$4 sm:$0xff]  }
 0x352   :  { %v3300_v25 = vpop.eup %3299 }
 0x353   :  { %v1682_v29 = vmul.f32 %v3300_v25, %v3298_v28  ;;  %v5720_v25 = vld [vmem:[#allocation46_spill] sm:$0xff] }
 0x354   :  { %1827 = vmatpush1.bf16.msra.mxu0 %v4925_v23  ;;  %1868 = vmatpush1.bf16.msra.mxu1 %v4931_v44 }
 0x355   :  { %3047 = vst [vmem:[%s5456_s9 + $0x28] sm:$0xff] %v1682_v29  ;;  %v1811_v26 = vpack.c.bf16 %v1682_v29, %v1682_v29  ;;  %1934 = vmatprep.subr.bf16.mxu0 %v4440_v32  ;;  %1975 = vmatprep.subr.bf16.mxu1 %v4446_v34 }
 0x357   :  { %1845 = vmatmul.mubr.bf16.vlgmr.msra.gmra.mxu0 %v1811_v26  ;;  %1886 = vmatmul.mubr.bf16.vlgmr.msra.gmra.mxu1 %v1811_v26 }
 0x358   :  { %1935 = vmatpush1.bf16.msra.mxu0 %v4542_v61  ;;  %1976 = vmatpush1.bf16.msra.mxu1 %v4548_v1 }
 0x359   :  { %1936 = vmatprep.subr.bf16.mxu0 %v4554_v55  ;;  %1977 = vmatprep.subr.bf16.mxu1 %v4560_v62 }
 0x35a   :  { %1966 = vmatprep.mubr.bf16.mxu0 %v5582_v42  ;;  %2007 = vmatprep.mubr.bf16.mxu1 %v5582_v42 }
 0x35c   :  { %1937 = vmatpush1.bf16.msra.mxu0 %v4568_v63  ;;  %1978 = vmatpush1.bf16.msra.mxu1 %v4574_v0 }
 0x35d   :  { %1938 = vmatprep.subr.bf16.mxu0 %v4580_v2  ;;  %1979 = vmatprep.subr.bf16.mxu1 %v4586_v3 }
 0x360   :  { %1939 = vmatpush1.bf16.msra.mxu0 %v4592_v4  ;;  %1980 = vmatpush1.bf16.msra.mxu1 %v4598_v5 }
 0x361   :  { %1940 = vmatprep.subr.bf16.mxu0 %v4604_v6  ;;  %1981 = vmatprep.subr.bf16.mxu1 %v4610_v7 }
 0x364   :  { %1941 = vmatpush1.bf16.msra.mxu0 %v4616_v8  ;;  %1982 = vmatpush1.bf16.msra.mxu1 %v4622_v9 }
 0x365   :  { %1942 = vmatprep.subr.bf16.mxu0 %v4628_v10  ;;  %1983 = vmatprep.subr.bf16.mxu1 %v4634_v13 }
 0x368   :  { %1943 = vmatpush1.bf16.msra.mxu0 %v4640_v14  ;;  %1984 = vmatpush1.bf16.msra.mxu1 %v4646_v15 }
 0x369   :  { %1944 = vmatprep.subr.bf16.mxu0 %v4652_v33  ;;  %1985 = vmatprep.subr.bf16.mxu1 %v4658_v31 }
 0x36c   :  { %1945 = vmatpush1.bf16.msra.mxu0 %v4664_v37  ;;  %1986 = vmatpush1.bf16.msra.mxu1 %v4670_v47 }
 0x36d   :  { %1946 = vmatprep.subr.bf16.mxu0 %v4676_v24  ;;  %1987 = vmatprep.subr.bf16.mxu1 %v4682_v36 }
 0x370   :  { %1947 = vmatpush1.bf16.msra.mxu0 %v4688_v12  ;;  %1988 = vmatpush1.bf16.msra.mxu1 %v4694_v22  ;;  %v5721_v22 = vld [vmem:[#allocation48_spill] sm:$0xff] }
 0x371   :  { %1948 = vmatprep.subr.bf16.mxu0 %v4700_v16  ;;  %1989 = vmatprep.subr.bf16.mxu1 %v4706_v17 }
 0x374   :  { %1949 = vmatpush1.bf16.msra.mxu0 %v4712_v18  ;;  %1990 = vmatpush1.bf16.msra.mxu1 %v4718_v19  ;;  %v5722_v19 = vld [vmem:[#allocation47_spill] sm:$0xff] }
 0x375   :  { %2051 = vmatprep.subr.bf16.mxu0 %v4724_v20  ;;  %2092 = vmatprep.subr.bf16.mxu1 %v4730_v21  ;;  %v5723_v21 = vld [vmem:[#allocation49_spill] sm:$0xff] }
 0x3f7   :  { %v1729_v29 = vpop.f32.mrf.mxu0  ;;  %v1770_v26 = vpop.f32.mrf.mxu1 }
 0x3f8   :  { %v1777_v28 = vadd.f32 %v1729_v29, %v5720_v25  ;;  %v1779_v20 = vadd.f32 %v1770_v26, %v5722_v19 }
 0x3f9   :  { %v1731_v36 = vpop.f32.mrf.mxu0  ;;  %v1772_v12 = vpop.f32.mrf.mxu1 }
 0x3fa   :  { %v3048_v24 = vmul.f32 -1.442695, %v1777_v28  ;;  %v1778_v47 = vadd.f32 %v1731_v36, %v5721_v22  ;;  %v3050_v33 = vmul.f32 -1.442695, %v1779_v20  ;;  %v1780_v15 = vadd.f32 %v1772_v12, %v5723_v21  ;;  %v5724_v22 = vld [vmem:[#allocation74_spill] sm:$0xff]  ;;  %v5725_v12 = vld [vmem:[#allocation76_spill] sm:$0xff] }
 0x3fb   :  { %v1733_v16 = vpop.f32.mrf.mxu0  ;;  %v1774_v37 = vpop.f32.mrf.mxu1 }
 0x3fc   :  { %3301 = vpow2.f32 %v3048_v24  ;;  %v3049_v17 = vmul.f32 -1.442695, %v1778_v47 }
 0x3fd   :  { %v1734_v18 = vpop.f32.mrf.mxu0  ;;  %v1775_v31 = vpop.f32.mrf.mxu1 }
 0x3fe   :  { %3303 = vpow2.f32 %v3049_v17 }
 0x3ff   :  { %3305 = vpow2.f32 %v3050_v33 }
 0x400   :  { %3307 = vtanh.f32 %v1780_v15 }
 0x409   :  { %v3302_v14 = vpop.eup %3301 }
 0x40a   :  { %v1790_v13 = vadd.f32 1.0, %v3302_v14 }
 0x40b   :  { %v3304_v29 = vpop.eup %3303 }
 0x40c   :  { %3309 = vrcp.f32 %v1790_v13  ;;  %v1791_v25 = vadd.f32 1.0, %v3304_v29  ;;  %v3306_v36 = vpop.eup %3305 }
 0x40d   :  { %v3308_v47 = vpop.eup %3307  ;;  %v1792_v33 = vadd.f32 1.0, %v3306_v36 }
 0x40e   :  { %3311 = vrcp.f32 %v1791_v25 }
 0x417   :  { %v1846_v37 = vpop.f32.mrf.mxu0  ;;  %v1887_v24 = vpop.f32.mrf.mxu1 }
 0x418   :  { %v1894_v31 = vadd.f32 %v1846_v37, %v5724_v22  ;;  %v5726_v37 = vld [vmem:[#allocation75_spill] sm:$0xff] }
 0x419   :  { %v3310_v16 = vpop.eup %3309  ;;  %v1848_v17 = vpop.f32.mrf.mxu0 }
 0x41a   :  { %v1889_v18 = vpop.f32.mrf.mxu1  ;;  %v1801_v19 = vmul.f32 %v3310_v16, %v3308_v47  ;;  %v3051_v20 = vmul.f32 -1.442695, %v1894_v31  ;;  %v1895_v21 = vadd.f32 %v1848_v17, %v5725_v12  ;;  %v1896_v47 = vadd.f32 %v1887_v24, %v5726_v37  ;;  %v5727_v31 = vld [vmem:[#allocation77_spill] sm:$0xff]  ;;  %v5730_v37 = vld [vmem:[#allocation31_spill] sm:$0xff] }
 0x41b   :  { %v3312_v14 = vpop.eup %3311  ;;  %v1850_v26 = vpop.f32.mrf.mxu0  ;;  %v1897_v16 = vadd.f32 %v1889_v18, %v5727_v31 }
 0x41c   :  { %v1891_v15 = vpop.f32.mrf.mxu1  ;;  %v1800_v13 = vmul.f32 %v3312_v14, %v4740_v49  ;;  %3313 = vpow2.f32 %v3051_v20  ;;  %v3052_v28 = vmul.f32 -1.442695, %v1895_v21  ;;  %v3053_v22 = vmul.f32 -1.442695, %v1896_v47  ;;  %v5731_v47 = vld [vmem:[#allocation32_spill] sm:$0xff] }
 0x41d   :  { %v1851_v29 = vpop.f32.mrf.mxu0 }
 0x41e   :  { %v1892_v25 = vpop.f32.mrf.mxu1  ;;  %v4980_v10 = vadd.f32 %v1801_v19, %v1800_v13  ;;  %3315 = vpow2.f32 %v3052_v28 }
 0x41f   :  { %3317 = vrcp.f32 %v1792_v33  ;;  %v5729_v25 = vld [vmem:[#allocation30_spill] sm:$0xff] }
 0x420   :  { %3319 = vtanh.f32 %v4980_v10 }
 0x421   :  { %3321 = vpow2.f32 %v3053_v22  ;;  %v5732_v22 = vld [vmem:[#allocation33_spill] sm:$0xff] }
 0x422   :  { %3323 = vtanh.f32 %v1897_v16  ;;  %v5733_v16 = vld [vmem:[#allocation34_spill] sm:$0xff] }
 0x429   :  { %v3314_v36 = vpop.eup %3313 }
 0x42a   :  { %v1907_v17 = vadd.f32 1.0, %v3314_v36  ;;  %v5734_v36 = vld [vmem:[#allocation35_spill] sm:$0xff] }
 0x42b   :  { %v3316_v12 = vpop.eup %3315 }
 0x42c   :  { %v3318_v49 = vpop.eup %3317  ;;  %3325 = vrcp.f32 %v1907_v17  ;;  %v1908_v20 = vadd.f32 1.0, %v3316_v12 }
 0x42d   :  { %v3320_v21 = vpop.eup %3319 }
 0x42e   :  { %3327 = vrcp.f32 %v1908_v20  ;;  %v1804_v19 = vmul.f32 %v3320_v21, %v3318_v49  ;;  %v3322_v24 = vpop.eup %3321  ;;  %v5737_v20 = vld [vmem:[#allocation13_spill] sm:$0xff]  ;;  %v5738_v21 = vld [vmem:[#allocation14_spill] sm:$0xff] }
 0x42f   :  { %v3324_v18 = vpop.eup %3323  ;;  %v1909_v13 = vadd.f32 1.0, %v3322_v24  ;;  %v5741_v24 = vld [vmem:[#allocation17_spill] sm:$0xff] }
 0x430   :  { %3054 = vst [vmem:[%s5455_s8 + $0x18] sm:$0xff] %v1804_v19  ;;  %v1933_v14 = vpack.c.bf16 %v1804_v19, %v1804_v19  ;;  %v5739_v19 = vld [vmem:[#allocation15_spill] sm:$0xff] }
 0x431   :  { %3329 = vrcp.f32 %v1909_v13  ;;  %v5746_v13 = vld [vmem:[#allocation22_spill] sm:$0xff] }
 0x432   :  { %1967 = vmatmul.mubr.bf16.vlgmr.msra.gmra.mxu0 %v1933_v14  ;;  %2008 = vmatmul.mubr.bf16.vlgmr.msra.gmra.mxu1 %v1933_v14  ;;  %v5740_v14 = vld [vmem:[#allocation16_spill] sm:$0xff] }
 0x433   :  { %2052 = vmatpush1.bf16.msra.mxu0 %v4751_v59  ;;  %2093 = vmatpush1.bf16.msra.mxu1 %v4757_v39 }
 0x434   :  { %2053 = vmatprep.subr.bf16.mxu0 %v4763_v11  ;;  %2094 = vmatprep.subr.bf16.mxu1 %v4769_v43 }
 0x435   :  { %2083 = vmatprep.mubr.bf16.mxu0 %v5582_v42  ;;  %2124 = vmatprep.mubr.bf16.mxu1 %v5582_v42 }
 0x437   :  { %2054 = vmatpush1.bf16.msra.mxu0 %v4777_v38  ;;  %2095 = vmatpush1.bf16.msra.mxu1 %v4783_v48 }
 0x438   :  { %2055 = vmatprep.subr.bf16.mxu0 %v4789_v35  ;;  %2096 = vmatprep.subr.bf16.mxu1 %v4795_v30 }
 0x439   :  { %v3326_v33 = vpop.eup %3325 }
 0x43a   :  { %v1918_v26 = vmul.f32 %v3326_v33, %v3324_v18  ;;  %v5742_v18 = vld [vmem:[#allocation18_spill] sm:$0xff]  ;;  %v5743_v33 = vld [vmem:[#allocation19_spill] sm:$0xff] }
 0x43b   :  { %v3328_v15 = vpop.eup %3327  ;;  %2056 = vmatpush1.bf16.msra.mxu0 %v4801_v51  ;;  %2097 = vmatpush1.bf16.msra.mxu1 %v4807_v52 }
 0x43c   :  { %v1917_v28 = vmul.f32 %v3328_v15, %v4823_v57  ;;  %2057 = vmatprep.subr.bf16.mxu0 %v4814_v53  ;;  %2098 = vmatprep.subr.bf16.mxu1 %v4820_v54  ;;  %v5728_v57 = vld [vmem:[#allocation29_spill] sm:$0xff] }
 0x43d   :  { %v5745_v15 = vld [vmem:[#allocation21_spill] sm:$0xff] }
 0x43e   :  { %v5003_v29 = vadd.f32 %v1918_v26, %v1917_v28  ;;  %v3330_v31 = vpop.eup %3329  ;;  %v5744_v26 = vld [vmem:[#allocation20_spill] sm:$0xff]  ;;  %v5747_v28 = vld [vmem:[#allocation23_spill] sm:$0xff] }
 0x43f   :  { %2058 = vmatpush1.bf16.msra.mxu0 %v4828_v56  ;;  %2099 = vmatpush1.bf16.msra.mxu1 %v4834_v58 }
 0x440   :  { %3331 = vtanh.f32 %v5003_v29  ;;  %2059 = vmatprep.subr.bf16.mxu0 %v4841_v60  ;;  %2100 = vmatprep.subr.bf16.mxu1 %v4847_v40 }
 0x443   :  { %2060 = vmatpush1.bf16.msra.mxu0 %v4853_v27  ;;  %2101 = vmatpush1.bf16.msra.mxu1 %v4859_v50 }
 0x444   :  { %2061 = vmatprep.subr.bf16.mxu0 %v4865_v45  ;;  %2102 = vmatprep.subr.bf16.mxu1 %v4871_v41 }
 0x447   :  { %2062 = vmatpush1.bf16.msra.mxu0 %v4877_v46  ;;  %2103 = vmatpush1.bf16.msra.mxu1 %v5728_v57 }
 0x448   :  { %2063 = vmatprep.subr.bf16.mxu0 %v5729_v25  ;;  %2104 = vmatprep.subr.bf16.mxu1 %v5730_v37 }
 0x44b   :  { %2064 = vmatpush1.bf16.msra.mxu0 %v5731_v47  ;;  %2105 = vmatpush1.bf16.msra.mxu1 %v5732_v22 }
 0x44c   :  { %2065 = vmatprep.subr.bf16.mxu0 %v5733_v16  ;;  %2106 = vmatprep.subr.bf16.mxu1 %v5734_v36 }
 0x44d   :  { %v3332_v17 = vpop.eup %3331 }
 0x44e   :  { %v1921_v12 = vmul.f32 %v3332_v17, %v3330_v31  ;;  %v5748_v31 = vld [vmem:[#allocation24_spill] sm:$0xff]  ;;  %v5749_v17 = vld [vmem:[#allocation25_spill] sm:$0xff] }
 0x44f   :  { %2066 = vmatpush1.bf16.msra.mxu0 %v4925_v23  ;;  %2107 = vmatpush1.bf16.msra.mxu1 %v4931_v44 }
 0x450   :  { %3055 = vst [vmem:[%s5456_s9 + $0x20] sm:$0xff] %v1921_v12  ;;  %v2050_v49 = vpack.c.bf16 %v1921_v12, %v1921_v12  ;;  %2173 = vmatprep.subr.bf16.mxu0 %v4440_v32  ;;  %2214 = vmatprep.subr.bf16.mxu1 %v4446_v34  ;;  %v5735_v32 = vld [vmem:[#allocation11_spill] sm:$0xff]  ;;  %v5736_v34 = vld [vmem:[#allocation12_spill] sm:$0xff]  ;;  %v5750_v12 = vld [vmem:[#allocation26_spill] sm:$0xff] }
 0x452   :  { %2084 = vmatmul.mubr.bf16.vlgmr.msra.gmra.mxu0 %v2050_v49  ;;  %2125 = vmatmul.mubr.bf16.vlgmr.msra.gmra.mxu1 %v2050_v49  ;;  %v5751_v49 = vld [vmem:[#allocation27_spill] sm:$0xff] }
 0x453   :  { %2174 = vmatpush1.bf16.msra.mxu0 %v4542_v61  ;;  %2215 = vmatpush1.bf16.msra.mxu1 %v4548_v1 }
 0x454   :  { %2175 = vmatprep.subr.bf16.mxu0 %v4554_v55  ;;  %2216 = vmatprep.subr.bf16.mxu1 %v4560_v62 }
 0x455   :  { %2205 = vmatprep.mubr.bf16.mxu0 %v5582_v42  ;;  %2246 = vmatprep.mubr.bf16.mxu1 %v5582_v42 }
 0x457   :  { %2176 = vmatpush1.bf16.msra.mxu0 %v4568_v63  ;;  %2217 = vmatpush1.bf16.msra.mxu1 %v4574_v0 }
 0x458   :  { %2177 = vmatprep.subr.bf16.mxu0 %v4580_v2  ;;  %2218 = vmatprep.subr.bf16.mxu1 %v4586_v3 }
 0x45b   :  { %2178 = vmatpush1.bf16.msra.mxu0 %v4592_v4  ;;  %2219 = vmatpush1.bf16.msra.mxu1 %v4598_v5 }
 0x45c   :  { %2179 = vmatprep.subr.bf16.mxu0 %v4604_v6  ;;  %2220 = vmatprep.subr.bf16.mxu1 %v4610_v7 }
 0x45f   :  { %2180 = vmatpush1.bf16.msra.mxu0 %v4616_v8  ;;  %2221 = vmatpush1.bf16.msra.mxu1 %v4622_v9 }
 0x460   :  { %2181 = vmatprep.subr.bf16.mxu0 %v5735_v32  ;;  %2222 = vmatprep.subr.bf16.mxu1 %v5736_v34 }
 0x463   :  { %2182 = vmatpush1.bf16.msra.mxu0 %v5737_v20  ;;  %2223 = vmatpush1.bf16.msra.mxu1 %v5738_v21 }
 0x464   :  { %2183 = vmatprep.subr.bf16.mxu0 %v5739_v19  ;;  %2224 = vmatprep.subr.bf16.mxu1 %v5740_v14  ;;  %v5753_v14 = vld [vmem:[#allocation50_spill] sm:$0xff] }
 0x467   :  { %2184 = vmatpush1.bf16.msra.mxu0 %v5741_v24  ;;  %2225 = vmatpush1.bf16.msra.mxu1 %v5742_v18  ;;  %v5752_v24 = vld [vmem:[#allocation28_spill] sm:$0xff] }
 0x468   :  { %2185 = vmatprep.subr.bf16.mxu0 %v5743_v33  ;;  %2226 = vmatprep.subr.bf16.mxu1 %v5744_v26 }
 0x46b   :  { %2186 = vmatpush1.bf16.msra.mxu0 %v5745_v15  ;;  %2227 = vmatpush1.bf16.msra.mxu1 %v5746_v13  ;;  %v5754_v13 = vld [vmem:[#allocation52_spill] sm:$0xff] }
 0x46c   :  { %2187 = vmatprep.subr.bf16.mxu0 %v5747_v28  ;;  %2228 = vmatprep.subr.bf16.mxu1 %v5748_v31 }
 0x46f   :  { %2188 = vmatpush1.bf16.msra.mxu0 %v5749_v17  ;;  %2229 = vmatpush1.bf16.msra.mxu1 %v5750_v12  ;;  %v5755_v12 = vld [vmem:[#allocation51_spill] sm:$0xff] }
 0x470   :  { %2290 = vmatprep.subr.bf16.mxu0 %v5751_v49  ;;  %2331 = vmatprep.subr.bf16.mxu1 %v5752_v24  ;;  %v5756_v24 = vld [vmem:[#allocation53_spill] sm:$0xff] }
 0x4f2   :  { %v1968_v18 = vpop.f32.mrf.mxu0  ;;  %v2009_v33 = vpop.f32.mrf.mxu1 }
 0x4f3   :  { %v2016_v26 = vadd.f32 %v1968_v18, %v5753_v14  ;;  %v2018_v49 = vadd.f32 %v2009_v33, %v5755_v12 }
 0x4f4   :  { %v1970_v19 = vpop.f32.mrf.mxu0  ;;  %v2011_v15 = vpop.f32.mrf.mxu1 }
 0x4f5   :  { %v3056_v21 = vmul.f32 -1.442695, %v2016_v26  ;;  %v2017_v20 = vadd.f32 %v1970_v19, %v5754_v13  ;;  %v3058_v9 = vmul.f32 -1.442695, %v2018_v49  ;;  %v2019_v8 = vadd.f32 %v2011_v15, %v5756_v24  ;;  %v5757_v26 = vld [vmem:[#allocation78_spill] sm:$0xff]  ;;  %v5758_v24 = vld [vmem:[#allocation80_spill] sm:$0xff] }
 0x4f6   :  { %v1972_v28 = vpop.f32.mrf.mxu0  ;;  %v2013_v34 = vpop.f32.mrf.mxu1 }
 0x4f7   :  { %3333 = vpow2.f32 %v3056_v21  ;;  %v3057_v31 = vmul.f32 -1.442695, %v2017_v20 }
 0x4f8   :  { %v1973_v17 = vpop.f32.mrf.mxu0  ;;  %v2014_v32 = vpop.f32.mrf.mxu1 }
 0x4f9   :  { %3335 = vpow2.f32 %v3057_v31 }
 0x4fa   :  { %3337 = vpow2.f32 %v3058_v9 }
 0x4fb   :  { %3339 = vtanh.f32 %v2019_v8 }
 0x504   :  { %v3334_v7 = vpop.eup %3333 }
 0x505   :  { %v2029_v6 = vadd.f32 1.0, %v3334_v7 }
 0x506   :  { %v3336_v14 = vpop.eup %3335 }
 0x507   :  { %3341 = vrcp.f32 %v2029_v6  ;;  %v2030_v18 = vadd.f32 1.0, %v3336_v14  ;;  %v3338_v19 = vpop.eup %3337 }
 0x508   :  { %v3340_v20 = vpop.eup %3339  ;;  %v2031_v9 = vadd.f32 1.0, %v3338_v19 }
 0x509   :  { %3343 = vrcp.f32 %v2030_v18 }
 0x512   :  { %v2085_v34 = vpop.f32.mrf.mxu0  ;;  %v2126_v21 = vpop.f32.mrf.mxu1 }
 0x513   :  { %v2133_v32 = vadd.f32 %v2085_v34, %v5757_v26  ;;  %v5759_v34 = vld [vmem:[#allocation79_spill] sm:$0xff] }
 0x514   :  { %v3342_v13 = vpop.eup %3341  ;;  %v2087_v28 = vpop.f32.mrf.mxu0 }
 0x515   :  { %v2128_v33 = vpop.f32.mrf.mxu1  ;;  %v2040_v31 = vmul.f32 %v3342_v13, %v3340_v20  ;;  %v3059_v17 = vmul.f32 -1.442695, %v2133_v32  ;;  %v2134_v15 = vadd.f32 %v2087_v28, %v5758_v24  ;;  %v2135_v20 = vadd.f32 %v2126_v21, %v5759_v34  ;;  %v5760_v32 = vld [vmem:[#allocation81_spill] sm:$0xff] }
 0x516   :  { %v3344_v7 = vpop.eup %3343  ;;  %v2089_v12 = vpop.f32.mrf.mxu0  ;;  %v2136_v13 = vadd.f32 %v2128_v33, %v5760_v32  ;;  %v5126_v32 = vld [vmem:[%s5450_s4 + $0xec] ss:$16 sps:$4 sm:$0xff]  }
 0x517   :  { %v2130_v8 = vpop.f32.mrf.mxu1  ;;  %v2039_v6 = vmul.f32 %v3344_v7, %v4980_v10  ;;  %3345 = vpow2.f32 %v3059_v17  ;;  %v3060_v49 = vmul.f32 -1.442695, %v2134_v15  ;;  %v3061_v26 = vmul.f32 -1.442695, %v2135_v20 }
 0x518   :  { %v2090_v14 = vpop.f32.mrf.mxu0 }
 0x519   :  { %v2131_v18 = vpop.f32.mrf.mxu1  ;;  %v5070_v5 = vadd.f32 %v2040_v31, %v2039_v6  ;;  %3347 = vpow2.f32 %v3060_v49 }
 0x51a   :  { %3349 = vrcp.f32 %v2031_v9 }
 0x51b   :  { %3351 = vtanh.f32 %v5070_v5 }
 0x51c   :  { %3353 = vpow2.f32 %v3061_v26  ;;  %v5120_v26 = vld [vmem:[%s5450_s4 + $0xe4] ss:$16 sps:$4 sm:$0xff]  }
 0x51d   :  { %3355 = vtanh.f32 %v2136_v13  ;;  %v5765_v13 = vld [vmem:[#allocation10_spill] sm:$0xff] }
 0x524   :  { %v3346_v19 = vpop.eup %3345 }
 0x525   :  { %v2146_v28 = vadd.f32 1.0, %v3346_v19  ;;  %v5766_v19 = vld [vmem:[#allocation11_spill] sm:$0xff] }
 0x526   :  { %v3348_v24 = vpop.eup %3347 }
 0x527   :  { %v3350_v10 = vpop.eup %3349  ;;  %3357 = vrcp.f32 %v2146_v28  ;;  %v2147_v17 = vadd.f32 1.0, %v3348_v24  ;;  %v5772_v28 = vld [vmem:[#allocation17_spill] sm:$0xff]  ;;  %v5773_v24 = vld [vmem:[#allocation18_spill] sm:$0xff] }
 0x528   :  { %v3352_v15 = vpop.eup %3351 }
 0x529   :  { %3359 = vrcp.f32 %v2147_v17  ;;  %v2043_v31 = vmul.f32 %v3352_v15, %v3350_v10  ;;  %v3354_v21 = vpop.eup %3353  ;;  %v5774_v10 = vld [vmem:[#allocation19_spill] sm:$0xff]  ;;  %v5775_v17 = vld [vmem:[#allocation20_spill] sm:$0xff]  ;;  %v5776_v15 = vld [vmem:[#allocation21_spill] sm:$0xff] }
 0x52a   :  { %v3356_v33 = vpop.eup %3355  ;;  %v2148_v6 = vadd.f32 1.0, %v3354_v21  ;;  %v5779_v21 = vld [vmem:[#allocation24_spill] sm:$0xff] }
 0x52b   :  { %3062 = vst [vmem:[%s5455_s8 + $0x20] sm:$0xff] %v2043_v31  ;;  %v2172_v7 = vpack.c.bf16 %v2043_v31, %v2043_v31  ;;  %v5777_v31 = vld [vmem:[#allocation22_spill] sm:$0xff] }
 0x52c   :  { %3361 = vrcp.f32 %v2148_v6 }
 0x52d   :  { %2206 = vmatmul.mubr.bf16.vlgmr.msra.gmra.mxu0 %v2172_v7  ;;  %2247 = vmatmul.mubr.bf16.vlgmr.msra.gmra.mxu1 %v2172_v7  ;;  %v5778_v7 = vld [vmem:[#allocation23_spill] sm:$0xff] }
 0x52e   :  { %2291 = vmatpush1.bf16.msra.mxu0 %v4751_v59  ;;  %2332 = vmatpush1.bf16.msra.mxu1 %v4757_v39 }
 0x52f   :  { %2292 = vmatprep.subr.bf16.mxu0 %v4763_v11  ;;  %2333 = vmatprep.subr.bf16.mxu1 %v4769_v43 }
 0x530   :  { %2322 = vmatprep.mubr.bf16.mxu0 %v5582_v42  ;;  %2363 = vmatprep.mubr.bf16.mxu1 %v5582_v42 }
 0x532   :  { %2293 = vmatpush1.bf16.msra.mxu0 %v4777_v38  ;;  %2334 = vmatpush1.bf16.msra.mxu1 %v4783_v48 }
 0x533   :  { %2294 = vmatprep.subr.bf16.mxu0 %v4789_v35  ;;  %2335 = vmatprep.subr.bf16.mxu1 %v4795_v30 }
 0x534   :  { %v3358_v9 = vpop.eup %3357 }
 0x535   :  { %v2157_v12 = vmul.f32 %v3358_v9, %v3356_v33  ;;  %v5780_v33 = vld [vmem:[#allocation25_spill] sm:$0xff]  ;;  %v5781_v9 = vld [vmem:[#allocation26_spill] sm:$0xff] }
 0x536   :  { %v3360_v8 = vpop.eup %3359  ;;  %2295 = vmatpush1.bf16.msra.mxu0 %v4801_v51  ;;  %2336 = vmatpush1.bf16.msra.mxu1 %v4807_v52 }
 0x537   :  { %v2156_v49 = vmul.f32 %v3360_v8, %v5003_v29  ;;  %2296 = vmatprep.subr.bf16.mxu0 %v4814_v53  ;;  %2337 = vmatprep.subr.bf16.mxu1 %v4820_v54  ;;  %v5783_v8 = vld [vmem:[#allocation28_spill] sm:$0xff] }
 0x539   :  { %v5093_v14 = vadd.f32 %v2157_v12, %v2156_v49  ;;  %v3362_v29 = vpop.eup %3361  ;;  %v5782_v12 = vld [vmem:[#allocation27_spill] sm:$0xff] }
 0x53a   :  { %2297 = vmatpush1.bf16.msra.mxu0 %v4828_v56  ;;  %2338 = vmatpush1.bf16.msra.mxu1 %v4834_v58 }
 0x53b   :  { %3363 = vtanh.f32 %v5093_v14  ;;  %2298 = vmatprep.subr.bf16.mxu0 %v4841_v60  ;;  %2339 = vmatprep.subr.bf16.mxu1 %v4847_v40 }
 0x53e   :  { %2299 = vmatpush1.bf16.msra.mxu0 %v4853_v27  ;;  %2340 = vmatpush1.bf16.msra.mxu1 %v4859_v50 }
 0x53f   :  { %2300 = vmatprep.subr.bf16.mxu0 %v4865_v45  ;;  %2341 = vmatprep.subr.bf16.mxu1 %v4871_v41 }
 0x542   :  { %2301 = vmatpush1.bf16.msra.mxu0 %v4877_v46  ;;  %2342 = vmatpush1.bf16.msra.mxu1 %v5728_v57 }
 0x543   :  { %2302 = vmatprep.subr.bf16.mxu0 %v5729_v25  ;;  %2343 = vmatprep.subr.bf16.mxu1 %v5730_v37 }
 0x546   :  { %2303 = vmatpush1.bf16.msra.mxu0 %v5731_v47  ;;  %2344 = vmatpush1.bf16.msra.mxu1 %v5732_v22 }
 0x547   :  { %2304 = vmatprep.subr.bf16.mxu0 %v5733_v16  ;;  %2345 = vmatprep.subr.bf16.mxu1 %v5734_v36 }
 0x548   :  { %v3364_v18 = vpop.eup %3363 }
 0x549   :  { %v2160_v34 = vmul.f32 %v3364_v18, %v3362_v29  ;;  %v5784_v29 = vld [vmem:[#allocation54_spill] sm:$0xff] }
 0x54a   :  { %2305 = vmatpush1.bf16.msra.mxu0 %v4925_v23  ;;  %2346 = vmatpush1.bf16.msra.mxu1 %v4931_v44 }
 0x54b   :  { %3063 = vst [vmem:[%s5456_s9 + $0x18] sm:$0xff] %v2160_v34  ;;  %v2289_v20 = vpack.c.bf16 %v2160_v34, %v2160_v34  ;;  %2412 = vmatprep.subr.bf16.mxu0 %v5120_v26  ;;  %2453 = vmatprep.subr.bf16.mxu1 %v5126_v32 }
 0x54d   :  { %2323 = vmatmul.mubr.bf16.vlgmr.msra.gmra.mxu0 %v2289_v20  ;;  %2364 = vmatmul.mubr.bf16.vlgmr.msra.gmra.mxu1 %v2289_v20 }
 0x54e   :  { %2413 = vmatpush1.bf16.msra.mxu0 %v4542_v61  ;;  %2454 = vmatpush1.bf16.msra.mxu1 %v4548_v1  ;;  %v5761_v61 = vld [vmem:[#allocation36_spill] sm:$0xff]  ;;  %v5762_v1 = vld [vmem:[#allocation37_spill] sm:$0xff] }
 0x54f   :  { %2414 = vmatprep.subr.bf16.mxu0 %v4554_v55  ;;  %2455 = vmatprep.subr.bf16.mxu1 %v4560_v62  ;;  %v5763_v55 = vld [vmem:[#allocation8_spill] sm:$0xff]  ;;  %v5764_v62 = vld [vmem:[#allocation9_spill] sm:$0xff] }
 0x550   :  { %2444 = vmatprep.mubr.bf16.mxu0 %v5582_v42  ;;  %2485 = vmatprep.mubr.bf16.mxu1 %v5582_v42 }
 0x552   :  { %2415 = vmatpush1.bf16.msra.mxu0 %v4568_v63  ;;  %2456 = vmatpush1.bf16.msra.mxu1 %v4574_v0  ;;  %v5767_v63 = vld [vmem:[#allocation12_spill] sm:$0xff]  ;;  %v5768_v0 = vld [vmem:[#allocation13_spill] sm:$0xff] }
 0x553   :  { %2416 = vmatprep.subr.bf16.mxu0 %v4580_v2  ;;  %2457 = vmatprep.subr.bf16.mxu1 %v4586_v3  ;;  %v5769_v2 = vld [vmem:[#allocation14_spill] sm:$0xff]  ;;  %v5770_v3 = vld [vmem:[#allocation15_spill] sm:$0xff] }
 0x556   :  { %2417 = vmatpush1.bf16.msra.mxu0 %v4592_v4  ;;  %2458 = vmatpush1.bf16.msra.mxu1 %v5761_v61  ;;  %v5771_v4 = vld [vmem:[#allocation16_spill] sm:$0xff] }
 0x557   :  { %2418 = vmatprep.subr.bf16.mxu0 %v5762_v1  ;;  %2459 = vmatprep.subr.bf16.mxu1 %v5763_v55  ;;  %v5785_v1 = vld [vmem:[#allocation56_spill] sm:$0xff] }
 0x55a   :  { %2419 = vmatpush1.bf16.msra.mxu0 %v5764_v62  ;;  %2460 = vmatpush1.bf16.msra.mxu1 %v5765_v13 }
 0x55b   :  { %2420 = vmatprep.subr.bf16.mxu0 %v5766_v19  ;;  %2461 = vmatprep.subr.bf16.mxu1 %v5767_v63 }
 0x55e   :  { %2421 = vmatpush1.bf16.msra.mxu0 %v5768_v0  ;;  %2462 = vmatpush1.bf16.msra.mxu1 %v5769_v2  ;;  %v5786_v2 = vld [vmem:[#allocation55_spill] sm:$0xff] }
 0x55f   :  { %2422 = vmatprep.subr.bf16.mxu0 %v5770_v3  ;;  %2463 = vmatprep.subr.bf16.mxu1 %v5771_v4 }
 0x562   :  { %2423 = vmatpush1.bf16.msra.mxu0 %v5772_v28  ;;  %2464 = vmatpush1.bf16.msra.mxu1 %v5773_v24  ;;  %v5787_v28 = vld [vmem:[#allocation57_spill] sm:$0xff] }
 0x563   :  { %2424 = vmatprep.subr.bf16.mxu0 %v5774_v10  ;;  %2465 = vmatprep.subr.bf16.mxu1 %v5775_v17 }
 0x566   :  { %2425 = vmatpush1.bf16.msra.mxu0 %v5776_v15  ;;  %2466 = vmatpush1.bf16.msra.mxu1 %v5777_v31 }
 0x567   :  { %2426 = vmatprep.subr.bf16.mxu0 %v5778_v7  ;;  %2467 = vmatprep.subr.bf16.mxu1 %v5779_v21 }
 0x56a   :  { %2427 = vmatpush1.bf16.msra.mxu0 %v5780_v33  ;;  %2468 = vmatpush1.bf16.msra.mxu1 %v5781_v9 }
 0x56b   :  { %2529 = vmatprep.subr.bf16.mxu0 %v5782_v12  ;;  %2570 = vmatprep.subr.bf16.mxu1 %v5783_v8  ;;  %v5788_v12 = vld [vmem:[#allocation82_spill] sm:$0xff] }
 0x5ed   :  { %v2207_v6 = vpop.f32.mrf.mxu0  ;;  %v2248_v49 = vpop.f32.mrf.mxu1 }
 0x5ee   :  { %v2255_v18 = vadd.f32 %v2207_v6, %v5784_v29  ;;  %v2257_v3 = vadd.f32 %v2248_v49, %v5786_v2 }
 0x5ef   :  { %v2209_v34 = vpop.f32.mrf.mxu0  ;;  %v2250_v20 = vpop.f32.mrf.mxu1 }
 0x5f0   :  { %v3064_v61 = vmul.f32 -1.442695, %v2255_v18  ;;  %v2256_v55 = vadd.f32 %v2209_v34, %v5785_v1  ;;  %v3066_v4 = vmul.f32 -1.442695, %v2257_v3  ;;  %v2258_v24 = vadd.f32 %v2250_v20, %v5787_v28  ;;  %v5789_v20 = vld [vmem:[#allocation84_spill] sm:$0xff] }
 0x5f1   :  { %v2211_v62 = vpop.f32.mrf.mxu0  ;;  %v2252_v13 = vpop.f32.mrf.mxu1 }
 0x5f2   :  { %3365 = vpow2.f32 %v3064_v61  ;;  %v3065_v19 = vmul.f32 -1.442695, %v2256_v55 }
 0x5f3   :  { %v2212_v63 = vpop.f32.mrf.mxu0  ;;  %v2253_v0 = vpop.f32.mrf.mxu1 }
 0x5f4   :  { %3367 = vpow2.f32 %v3065_v19 }
 0x5f5   :  { %3369 = vpow2.f32 %v3066_v4  ;;  %v5790_v4 = vld [vmem:[#allocation83_spill] sm:$0xff] }
 0x5f6   :  { %3371 = vtanh.f32 %v2258_v24 }
 0x5ff   :  { %v3366_v10 = vpop.eup %3365 }
 0x600   :  { %v2268_v17 = vadd.f32 1.0, %v3366_v10  ;;  %v5791_v10 = vld [vmem:[#allocation85_spill] sm:$0xff] }
 0x601   :  { %v3368_v15 = vpop.eup %3367 }
 0x602   :  { %3373 = vrcp.f32 %v2268_v17  ;;  %v2269_v31 = vadd.f32 1.0, %v3368_v15  ;;  %v3370_v7 = vpop.eup %3369 }
 0x603   :  { %v3372_v9 = vpop.eup %3371  ;;  %v2270_v55 = vadd.f32 1.0, %v3370_v7 }
 0x604   :  { %3375 = vrcp.f32 %v2269_v31 }
 0x60d   :  { %v2324_v21 = vpop.f32.mrf.mxu0  ;;  %v2365_v33 = vpop.f32.mrf.mxu1 }
 0x60e   :  { %v2372_v8 = vadd.f32 %v2324_v21, %v5788_v12  ;;  %v2374_v28 = vadd.f32 %v2365_v33, %v5790_v4 }
 0x60f   :  { %v3374_v6 = vpop.eup %3373  ;;  %v2326_v29 = vpop.f32.mrf.mxu0 }
 0x610   :  { %v2367_v49 = vpop.f32.mrf.mxu1  ;;  %v2279_v18 = vmul.f32 %v3374_v6, %v3372_v9  ;;  %v3067_v34 = vmul.f32 -1.442695, %v2372_v8  ;;  %v2373_v61 = vadd.f32 %v2326_v29, %v5789_v20  ;;  %v3069_v24 = vmul.f32 -1.442695, %v2374_v28  ;;  %v3554_v20 = vld [vmem:[%s5450_s4 + $0xc] ss:$16 sps:$4 sm:$0xff]  }
 0x611   :  { %v3376_v1 = vpop.eup %3375  ;;  %v2328_v62 = vpop.f32.mrf.mxu0  ;;  %v2375_v17 = vadd.f32 %v2367_v49, %v5791_v10  ;;  %v3551_v49 = vld [vmem:[%s5450_s4 + $0x20] ss:$16 sps:$4 sm:$0xff]  }
 0x612   :  { %v2369_v13 = vpop.f32.mrf.mxu1  ;;  %v2278_v19 = vmul.f32 %v3376_v1, %v5070_v5  ;;  %3377 = vpow2.f32 %v3067_v34  ;;  %v3068_v63 = vmul.f32 -1.442695, %v2373_v61  ;;  %v3553_v34 = vld [vmem:[%s5450_s4 + $0x4] ss:$16 sps:$4 sm:$0xff]   ;;  %v3555_v61 = vld [vmem:[%s5450_s4] ss:$16 sps:$4 sm:$0xff]  }
 0x613   :  { %v2329_v0 = vpop.f32.mrf.mxu0  ;;  %v3556_v1 = vld [vmem:[%s5450_s4 + $0x8] ss:$16 sps:$4 sm:$0xff]   ;;  %v3558_v62 = vld [vmem:[%s5452_s5 + $0xec] ss:$16 sps:$4 sm:$0xff]  }
 0x614   :  { %v2370_v2 = vpop.f32.mrf.mxu1  ;;  %v5170_v3 = vadd.f32 %v2279_v18, %v2278_v19  ;;  %3379 = vpow2.f32 %v3068_v63  ;;  %v3552_v18 = vld [vmem:[%s5450_s4 + $0x28] ss:$16 sps:$4 sm:$0xff]   ;;  %v5792_v63 = vld [vmem:[#allocation58_spill] sm:$0xff] }
 0x615   :  { %3381 = vrcp.f32 %v2270_v55  ;;  %v3557_v55 = vld [vmem:[%s5452_s5 + $0xe4] ss:$16 sps:$4 sm:$0xff]  }
 0x616   :  { %3383 = vtanh.f32 %v5170_v3 }
 0x617   :  { %3385 = vpow2.f32 %v3069_v24  ;;  %v5793_v24 = vld [vmem:[#allocation60_spill] sm:$0xff] }
 0x618   :  { %3387 = vtanh.f32 %v2375_v17 }
 0x61f   :  { %v3378_v15 = vpop.eup %3377 }
 0x620   :  { %v2385_v31 = vadd.f32 1.0, %v3378_v15 }
 0x621   :  { %v3380_v7 = vpop.eup %3379 }
 0x622   :  { %v3382_v5 = vpop.eup %3381  ;;  %3389 = vrcp.f32 %v2385_v31  ;;  %v2386_v21 = vadd.f32 1.0, %v3380_v7 }
 0x623   :  { %v3384_v9 = vpop.eup %3383 }
 0x624   :  { %3391 = vrcp.f32 %v2386_v21  ;;  %v2282_v12 = vmul.f32 %v3384_v9, %v3382_v5  ;;  %v3386_v33 = vpop.eup %3385  ;;  %v5794_v21 = vld [vmem:[#allocation59_spill] sm:$0xff] }
 0x625   :  { %v3388_v6 = vpop.eup %3387 }
 0x626   :  { %3070 = vst [vmem:[%s5455_s8 + $0x28] sm:$0xff] %v2282_v12  ;;  %v2411_v8 = vpack.c.bf16 %v2282_v12, %v2282_v12 }
 0x628   :  { %2445 = vmatmul.mubr.bf16.vlgmr.msra.gmra.mxu0 %v2411_v8  ;;  %2486 = vmatmul.mubr.bf16.vlgmr.msra.gmra.mxu1 %v2411_v8  ;;  %v5795_v8 = vld [vmem:[#allocation61_spill] sm:$0xff] }
 0x629   :  { %2530 = vmatpush1.bf16.msra.mxu0 %v4751_v59  ;;  %2571 = vmatpush1.bf16.msra.mxu1 %v4757_v39 }
 0x62a   :  { %2531 = vmatprep.subr.bf16.mxu0 %v4763_v11  ;;  %2572 = vmatprep.subr.bf16.mxu1 %v4769_v43  ;;  %v2387_v11 = vadd.f32 1.0, %v3386_v33 }
 0x62b   :  { %2561 = vmatprep.mubr.bf16.mxu0 %v5582_v42  ;;  %2602 = vmatprep.mubr.bf16.mxu1 %v5582_v42 }
 0x62c   :  { %3393 = vrcp.f32 %v2387_v11 }
 0x62d   :  { %2532 = vmatpush1.bf16.msra.mxu0 %v4777_v38  ;;  %2573 = vmatpush1.bf16.msra.mxu1 %v4783_v48 }
 0x62e   :  { %2533 = vmatprep.subr.bf16.mxu0 %v4789_v35  ;;  %2574 = vmatprep.subr.bf16.mxu1 %v4795_v30 }
 0x62f   :  { %v3390_v59 = vpop.eup %3389 }
 0x630   :  { %v2396_v39 = vmul.f32 %v3390_v59, %v3388_v6 }
 0x631   :  { %v3392_v29 = vpop.eup %3391  ;;  %2534 = vmatpush1.bf16.msra.mxu0 %v4801_v51  ;;  %2575 = vmatpush1.bf16.msra.mxu1 %v4807_v52  ;;  %v3527_v52 = vld [vmem:[%s5450_s4 + $0xe0] ss:$16 sps:$4 sm:$0xff]  }
 0x632   :  { %v2395_v43 = vmul.f32 %v3392_v29, %v5093_v14  ;;  %2535 = vmatprep.subr.bf16.mxu0 %v4814_v53  ;;  %2576 = vmatprep.subr.bf16.mxu1 %v4820_v54  ;;  %v3528_v53 = vld [vmem:[%s5450_s4 + $0xe8] ss:$16 sps:$4 sm:$0xff]   ;;  %v3529_v54 = vld [vmem:[%s5450_s4 + $0xc4] ss:$16 sps:$4 sm:$0xff]  }
 0x633   :  { %v3548_v14 = vld [vmem:[%s5450_s4 + $0x48] ss:$16 sps:$4 sm:$0xff]  }
 0x634   :  { %v5193_v38 = vadd.f32 %v2396_v39, %v2395_v43 }
 0x635   :  { %2536 = vmatpush1.bf16.msra.mxu0 %v4828_v56  ;;  %2577 = vmatpush1.bf16.msra.mxu1 %v4834_v58  ;;  %v3530_v56 = vld [vmem:[%s5450_s4 + $0xcc] ss:$16 sps:$4 sm:$0xff]   ;;  %v3531_v58 = vld [vmem:[%s5450_s4 + $0xc0] ss:$16 sps:$4 sm:$0xff]  }
 0x636   :  { %3395 = vtanh.f32 %v5193_v38  ;;  %2537 = vmatprep.subr.bf16.mxu0 %v4841_v60  ;;  %2578 = vmatprep.subr.bf16.mxu1 %v4847_v40  ;;  %v3532_v60 = vld [vmem:[%s5450_s4 + $0xc8] ss:$16 sps:$4 sm:$0xff]   ;;  %v3533_v40 = vld [vmem:[%s5450_s4 + $0xa4] ss:$16 sps:$4 sm:$0xff]  }
 0x639   :  { %2538 = vmatpush1.bf16.msra.mxu0 %v4853_v27  ;;  %2579 = vmatpush1.bf16.msra.mxu1 %v4859_v50  ;;  %v3394_v48 = vpop.eup %3393  ;;  %v3534_v27 = vld [vmem:[%s5450_s4 + $0xac] ss:$16 sps:$4 sm:$0xff]   ;;  %v3535_v50 = vld [vmem:[%s5450_s4 + $0xa0] ss:$16 sps:$4 sm:$0xff]  }
 0x63a   :  { %2539 = vmatprep.subr.bf16.mxu0 %v4865_v45  ;;  %2580 = vmatprep.subr.bf16.mxu1 %v4871_v41  ;;  %v3536_v45 = vld [vmem:[%s5450_s4 + $0xa8] ss:$16 sps:$4 sm:$0xff]   ;;  %v3537_v41 = vld [vmem:[%s5450_s4 + $0x84] ss:$16 sps:$4 sm:$0xff]  }
 0x63d   :  { %2540 = vmatpush1.bf16.msra.mxu0 %v4877_v46  ;;  %2581 = vmatpush1.bf16.msra.mxu1 %v5728_v57  ;;  %v3538_v46 = vld [vmem:[%s5450_s4 + $0x8c] ss:$16 sps:$4 sm:$0xff]   ;;  %v3541_v57 = vld [vmem:[%s5450_s4 + $0x64] ss:$16 sps:$4 sm:$0xff]  }
 0x63e   :  { %2541 = vmatprep.subr.bf16.mxu0 %v5729_v25  ;;  %2582 = vmatprep.subr.bf16.mxu1 %v5730_v37  ;;  %v3542_v25 = vld [vmem:[%s5450_s4 + $0x6c] ss:$16 sps:$4 sm:$0xff]   ;;  %v3543_v37 = vld [vmem:[%s5450_s4 + $0x60] ss:$16 sps:$4 sm:$0xff]  }
 0x641   :  { %2542 = vmatpush1.bf16.msra.mxu0 %v5731_v47  ;;  %2583 = vmatpush1.bf16.msra.mxu1 %v5732_v22  ;;  %v3544_v47 = vld [vmem:[%s5450_s4 + $0x68] ss:$16 sps:$4 sm:$0xff]   ;;  %v3545_v22 = vld [vmem:[%s5450_s4 + $0x44] ss:$16 sps:$4 sm:$0xff]  }
 0x642   :  { %2543 = vmatprep.subr.bf16.mxu0 %v5733_v16  ;;  %2584 = vmatprep.subr.bf16.mxu1 %v5734_v36  ;;  %v3546_v16 = vld [vmem:[%s5450_s4 + $0x4c] ss:$16 sps:$4 sm:$0xff]   ;;  %v3547_v36 = vld [vmem:[%s5450_s4 + $0x40] ss:$16 sps:$4 sm:$0xff]  }
 0x643   :  { %v3396_v35 = vpop.eup %3395 }
 0x644   :  { %v2399_v30 = vmul.f32 %v3396_v35, %v3394_v48 }
 0x645   :  { %2544 = vmatpush1.bf16.msra.mxu0 %v4925_v23  ;;  %2585 = vmatpush1.bf16.msra.mxu1 %v4931_v44  ;;  %v3539_v44 = vld [vmem:[%s5450_s4 + $0x80] ss:$16 sps:$4 sm:$0xff]   ;;  %v3540_v23 = vld [vmem:[%s5450_s4 + $0x88] ss:$16 sps:$4 sm:$0xff]  }
 0x646   :  { %3071 = vst [vmem:[%s5456_s9 + $0x10] sm:$0xff] %v2399_v30  ;;  %v2528_v51 = vpack.c.bf16 %v2399_v30, %v2399_v30  ;;  %2651 = vmatprep.subr.bf16.mxu0 %v5120_v26  ;;  %2692 = vmatprep.subr.bf16.mxu1 %v5126_v32  ;;  %v3549_v26 = vld [vmem:[%s5450_s4 + $0x24] ss:$16 sps:$4 sm:$0xff]   ;;  %v3550_v32 = vld [vmem:[%s5450_s4 + $0x2c] ss:$16 sps:$4 sm:$0xff]  }
 0x647   :  { %v5796_v30 = vld [vmem:[#allocation86_spill] sm:$0xff] }
 0x648   :  { %2562 = vmatmul.mubr.bf16.vlgmr.msra.gmra.mxu0 %v2528_v51  ;;  %2603 = vmatmul.mubr.bf16.vlgmr.msra.gmra.mxu1 %v2528_v51 }
 0x649   :  { %2652 = vmatpush1.bf16.msra.mxu0 %v3527_v52  ;;  %2693 = vmatpush1.bf16.msra.mxu1 %v3528_v53 }
 0x64a   :  { %2653 = vmatprep.subr.bf16.mxu0 %v3529_v54  ;;  %2694 = vmatprep.subr.bf16.mxu1 %v3530_v56 }
 0x64b   :  { %2683 = vmatprep.mubr.bf16.mxu0 %v5582_v42  ;;  %2724 = vmatprep.mubr.bf16.mxu1 %v5582_v42 }
 0x64d   :  { %2654 = vmatpush1.bf16.msra.mxu0 %v3531_v58  ;;  %2695 = vmatpush1.bf16.msra.mxu1 %v3532_v60  ;;  %v5797_v60 = vld [vmem:[#allocation88_spill] sm:$0xff] }
 0x64e   :  { %2655 = vmatprep.subr.bf16.mxu0 %v3533_v40  ;;  %2696 = vmatprep.subr.bf16.mxu1 %v3534_v27 }
 0x651   :  { %2656 = vmatpush1.bf16.msra.mxu0 %v3535_v50  ;;  %2697 = vmatpush1.bf16.msra.mxu1 %v3536_v45 }
 0x652   :  { %2657 = vmatprep.subr.bf16.mxu0 %v3537_v41  ;;  %2698 = vmatprep.subr.bf16.mxu1 %v3538_v46 }
 0x655   :  { %2658 = vmatpush1.bf16.msra.mxu0 %v3539_v44  ;;  %2699 = vmatpush1.bf16.msra.mxu1 %v3540_v23 }
 0x656   :  { %2659 = vmatprep.subr.bf16.mxu0 %v3541_v57  ;;  %2700 = vmatprep.subr.bf16.mxu1 %v3542_v25 }
 0x659   :  { %2660 = vmatpush1.bf16.msra.mxu0 %v3543_v37  ;;  %2701 = vmatpush1.bf16.msra.mxu1 %v3544_v47  ;;  %v5798_v37 = vld [vmem:[#allocation87_spill] sm:$0xff] }
 0x65a   :  { %2661 = vmatprep.subr.bf16.mxu0 %v3545_v22  ;;  %2702 = vmatprep.subr.bf16.mxu1 %v3546_v16  ;;  %v5799_v16 = vld [vmem:[#allocation89_spill] sm:$0xff] }
 0x65d   :  { %2662 = vmatpush1.bf16.msra.mxu0 %v3547_v36  ;;  %2703 = vmatpush1.bf16.msra.mxu1 %v3548_v14 }
 0x65e   :  { %2663 = vmatprep.subr.bf16.mxu0 %v3549_v26  ;;  %2704 = vmatprep.subr.bf16.mxu1 %v3550_v32 }
 0x661   :  { %2664 = vmatpush1.bf16.msra.mxu0 %v3551_v49  ;;  %2705 = vmatpush1.bf16.msra.mxu1 %v3552_v18 }
 0x662   :  { %2665 = vmatprep.subr.bf16.mxu0 %v3553_v34  ;;  %2706 = vmatprep.subr.bf16.mxu1 %v3554_v20 }
 0x665   :  { %2666 = vmatpush1.bf16.msra.mxu0 %v3555_v61  ;;  %2707 = vmatpush1.bf16.msra.mxu1 %v3556_v1  ;;  %v3559_v61 = vld [vmem:[%s5452_s5 + $0xe0] ss:$16 sps:$4 sm:$0xff]   ;;  %v3560_v1 = vld [vmem:[%s5452_s5 + $0xe8] ss:$16 sps:$4 sm:$0xff]  }
 0x666   :  { %2768 = vmatprep.subr.bf16.mxu0 %v3557_v55  ;;  %2809 = vmatprep.subr.bf16.mxu1 %v3558_v62  ;;  %v3561_v55 = vld [vmem:[%s5452_s5 + $0xc4] ss:$16 sps:$4 sm:$0xff]   ;;  %v3562_v62 = vld [vmem:[%s5452_s5 + $0xcc] ss:$16 sps:$4 sm:$0xff]  }
 0x6e8   :  { %v2446_v13 = vpop.f32.mrf.mxu0  ;;  %v2487_v19 = vpop.f32.mrf.mxu1 }
 0x6e9   :  { %v2494_v0 = vadd.f32 %v2446_v13, %v5792_v63  ;;  %v2496_v9 = vadd.f32 %v2487_v19, %v5794_v21  ;;  %v3563_v19 = vld [vmem:[%s5452_s5 + $0xc0] ss:$16 sps:$4 sm:$0xff]   ;;  %v3564_v63 = vld [vmem:[%s5452_s5 + $0xc8] ss:$16 sps:$4 sm:$0xff]  }
 0x6ea   :  { %v2448_v2 = vpop.f32.mrf.mxu0  ;;  %v2489_v4 = vpop.f32.mrf.mxu1 }
 0x6eb   :  { %v3072_v28 = vmul.f32 -1.442695, %v2494_v0  ;;  %v2495_v10 = vadd.f32 %v2448_v2, %v5793_v24  ;;  %v3074_v12 = vmul.f32 -1.442695, %v2496_v9  ;;  %v2497_v33 = vadd.f32 %v2489_v4, %v5795_v8  ;;  %v3565_v2 = vld [vmem:[%s5452_s5 + $0xa4] ss:$16 sps:$4 sm:$0xff]  }
 0x6ec   :  { %v2450_v17 = vpop.f32.mrf.mxu0  ;;  %v2491_v15 = vpop.f32.mrf.mxu1  ;;  %v3571_v9 = vld [vmem:[%s5452_s5 + $0x80] ss:$16 sps:$4 sm:$0xff]   ;;  %v3574_v8 = vld [vmem:[%s5452_s5 + $0x6c] ss:$16 sps:$4 sm:$0xff]  }
 0x6ed   :  { %3397 = vpow2.f32 %v3072_v28  ;;  %v3073_v31 = vmul.f32 -1.442695, %v2495_v10  ;;  %v3567_v17 = vld [vmem:[%s5452_s5 + $0xa0] ss:$16 sps:$4 sm:$0xff]   ;;  %v3568_v15 = vld [vmem:[%s5452_s5 + $0xa8] ss:$16 sps:$4 sm:$0xff]  }
 0x6ee   :  { %v2451_v7 = vpop.f32.mrf.mxu0  ;;  %v2492_v5 = vpop.f32.mrf.mxu1 }
 0x6ef   :  { %3399 = vpow2.f32 %v3073_v31  ;;  %v3569_v7 = vld [vmem:[%s5452_s5 + $0x84] ss:$16 sps:$4 sm:$0xff]   ;;  %v3570_v5 = vld [vmem:[%s5452_s5 + $0x8c] ss:$16 sps:$4 sm:$0xff]  }
 0x6f0   :  { %3401 = vpow2.f32 %v3074_v12  ;;  %v3573_v12 = vld [vmem:[%s5452_s5 + $0x64] ss:$16 sps:$4 sm:$0xff]  }
 0x6f1   :  { %3403 = vtanh.f32 %v2497_v33  ;;  %v3575_v33 = vld [vmem:[%s5452_s5 + $0x60] ss:$16 sps:$4 sm:$0xff]  }
 0x6fa   :  { %v3398_v6 = vpop.eup %3397 }
 0x6fb   :  { %v2507_v59 = vadd.f32 1.0, %v3398_v6  ;;  %v3576_v6 = vld [vmem:[%s5452_s5 + $0x68] ss:$16 sps:$4 sm:$0xff]  }
 0x6fc   :  { %v3400_v39 = vpop.eup %3399 }
 0x6fd   :  { %3405 = vrcp.f32 %v2507_v59  ;;  %v2508_v29 = vadd.f32 1.0, %v3400_v39  ;;  %v3402_v11 = vpop.eup %3401  ;;  %v3577_v59 = vld [vmem:[%s5452_s5 + $0x44] ss:$16 sps:$4 sm:$0xff]   ;;  %v3578_v39 = vld [vmem:[%s5452_s5 + $0x4c] ss:$16 sps:$4 sm:$0xff]  }
 0x6fe   :  { %v3404_v35 = vpop.eup %3403  ;;  %v2509_v50 = vadd.f32 1.0, %v3402_v11  ;;  %v3580_v11 = vld [vmem:[%s5452_s5 + $0x48] ss:$16 sps:$4 sm:$0xff]  }
 0x6ff   :  { %3407 = vrcp.f32 %v2508_v29  ;;  %v3579_v29 = vld [vmem:[%s5452_s5 + $0x40] ss:$16 sps:$4 sm:$0xff]  }
 0x708   :  { %v2563_v43 = vpop.f32.mrf.mxu0  ;;  %v2604_v48 = vpop.f32.mrf.mxu1 }
 0x709   :  { %v2611_v51 = vadd.f32 %v2563_v43, %v5796_v30  ;;  %v2613_v47 = vadd.f32 %v2604_v48, %v5798_v37  ;;  %v3581_v43 = vld [vmem:[%s5452_s5 + $0x24] ss:$16 sps:$4 sm:$0xff]   ;;  %v3582_v48 = vld [vmem:[%s5452_s5 + $0x2c] ss:$16 sps:$4 sm:$0xff]   ;;  %v3584_v30 = vld [vmem:[%s5452_s5 + $0x28] ss:$16 sps:$4 sm:$0xff]  }
 0x70a   :  { %v3406_v52 = vpop.eup %3405  ;;  %v2565_v53 = vpop.f32.mrf.mxu0 }
 0x70b   :  { %v2606_v54 = vpop.f32.mrf.mxu1  ;;  %v2518_v56 = vmul.f32 %v3406_v52, %v3404_v35  ;;  %v3075_v58 = vmul.f32 -1.442695, %v2611_v51  ;;  %v2612_v40 = vadd.f32 %v2565_v53, %v5797_v60  ;;  %v3077_v22 = vmul.f32 -1.442695, %v2613_v47  ;;  %v3583_v35 = vld [vmem:[%s5452_s5 + $0x20] ss:$16 sps:$4 sm:$0xff]  }
 0x70c   :  { %v3408_v27 = vpop.eup %3407  ;;  %v2567_v45 = vpop.f32.mrf.mxu0  ;;  %v2614_v36 = vadd.f32 %v2606_v54, %v5799_v16  ;;  %v3585_v52 = vld [vmem:[%s5452_s5 + $0x4] ss:$16 sps:$4 sm:$0xff]   ;;  %v3586_v53 = vld [vmem:[%s5452_s5 + $0xc] ss:$16 sps:$4 sm:$0xff]   ;;  %v3588_v60 = vld [vmem:[%s5452_s5 + $0x8] ss:$16 sps:$4 sm:$0xff]  }
 0x70d   :  { %v2608_v41 = vpop.f32.mrf.mxu1  ;;  %v2517_v46 = vmul.f32 %v3408_v27, %v5170_v3  ;;  %3409 = vpow2.f32 %v3075_v58  ;;  %v3076_v44 = vmul.f32 -1.442695, %v2612_v40  ;;  %v3587_v58 = vld [vmem:[%s5452_s5] ss:$16 sps:$4 sm:$0xff]  }
 0x70e   :  { %v2568_v23 = vpop.f32.mrf.mxu0  ;;  %v5800_v45 = vld [vmem:[#allocation62_spill] sm:$0xff] }
 0x70f   :  { %v2609_v57 = vpop.f32.mrf.mxu1  ;;  %v5324_v25 = vadd.f32 %v2518_v56, %v2517_v46  ;;  %3411 = vpow2.f32 %v3076_v44 }
 0x710   :  { %3413 = vrcp.f32 %v2509_v50  ;;  %v5801_v57 = vld [vmem:[#allocation64_spill] sm:$0xff] }
 0x711   :  { %3415 = vtanh.f32 %v5324_v25 }
 0x712   :  { %3417 = vpow2.f32 %v3077_v22 }
 0x713   :  { %3419 = vtanh.f32 %v2614_v36 }
 0x71a   :  { %v3410_v14 = vpop.eup %3409 }
 0x71b   :  { %v2624_v26 = vadd.f32 1.0, %v3410_v14 }
 0x71c   :  { %v3412_v32 = vpop.eup %3411 }
 0x71d   :  { %v3414_v3 = vpop.eup %3413  ;;  %3421 = vrcp.f32 %v2624_v26  ;;  %v2625_v49 = vadd.f32 1.0, %v3412_v32  ;;  %v5802_v26 = vld [vmem:[#allocation63_spill] sm:$0xff] }
 0x71e   :  { %v3416_v18 = vpop.eup %3415 }
 0x71f   :  { %3423 = vrcp.f32 %v2625_v49  ;;  %v2521_v34 = vmul.f32 %v3416_v18, %v3414_v3  ;;  %v3418_v13 = vpop.eup %3417  ;;  %v5803_v49 = vld [vmem:[#allocation65_spill] sm:$0xff] }
 0x720   :  { %v3420_v0 = vpop.eup %3419  ;;  %v2626_v10 = vadd.f32 1.0, %v3418_v13 }
 0x721   :  { %3078 = vst [vmem:[%s5455_s8 + $0x30] sm:$0xff] %v2521_v34  ;;  %v2650_v20 = vpack.c.bf16 %v2521_v34, %v2521_v34 }
 0x722   :  { %3425 = vrcp.f32 %v2626_v10  ;;  %v5805_v10 = vld [vmem:[#allocation92_spill] sm:$0xff] }
 0x723   :  { %2684 = vmatmul.mubr.bf16.vlgmr.msra.gmra.mxu0 %v2650_v20  ;;  %2725 = vmatmul.mubr.bf16.vlgmr.msra.gmra.mxu1 %v2650_v20 }
 0x724   :  { %2769 = vmatpush1.bf16.msra.mxu0 %v3559_v61  ;;  %2810 = vmatpush1.bf16.msra.mxu1 %v3560_v1 }
 0x725   :  { %2770 = vmatprep.subr.bf16.mxu0 %v3561_v55  ;;  %2811 = vmatprep.subr.bf16.mxu1 %v3562_v62 }
 0x726   :  { %2800 = vmatprep.mubr.bf16.mxu0 %v5582_v42  ;;  %2841 = vmatprep.mubr.bf16.mxu1 %v5582_v42  ;;  %v3566_v42 = vld [vmem:[%s5452_s5 + $0xac] ss:$16 sps:$4 sm:$0xff]  }
 0x728   :  { %2771 = vmatpush1.bf16.msra.mxu0 %v3563_v19  ;;  %2812 = vmatpush1.bf16.msra.mxu1 %v3564_v63  ;;  %v5804_v63 = vld [vmem:[#allocation90_spill] sm:$0xff] }
 0x729   :  { %2772 = vmatprep.subr.bf16.mxu0 %v3565_v2  ;;  %2813 = vmatprep.subr.bf16.mxu1 %v3566_v42 }
 0x72a   :  { %v3422_v4 = vpop.eup %3421 }
 0x72b   :  { %v2635_v28 = vmul.f32 %v3422_v4, %v3420_v0 }
 0x72c   :  { %v3424_v24 = vpop.eup %3423  ;;  %2773 = vmatpush1.bf16.msra.mxu0 %v3567_v17  ;;  %2814 = vmatpush1.bf16.msra.mxu1 %v3568_v15 }
 0x72d   :  { %v2634_v31 = vmul.f32 %v3424_v24, %v5193_v38  ;;  %2774 = vmatprep.subr.bf16.mxu0 %v3569_v7  ;;  %2815 = vmatprep.subr.bf16.mxu1 %v3570_v5  ;;  %v3572_v38 = vld [vmem:[%s5452_s5 + $0x88] ss:$16 sps:$4 sm:$0xff]  }
 0x72f   :  { %v5371_v21 = vadd.f32 %v2635_v28, %v2634_v31  ;;  %v3426_v51 = vpop.eup %3425 }
 0x730   :  { %2775 = vmatpush1.bf16.msra.mxu0 %v3571_v9  ;;  %2816 = vmatpush1.bf16.msra.mxu1 %v3572_v38 }
 0x731   :  { %3427 = vtanh.f32 %v5371_v21  ;;  %2776 = vmatprep.subr.bf16.mxu0 %v3573_v12  ;;  %2817 = vmatprep.subr.bf16.mxu1 %v3574_v8 }
 0x734   :  { %2777 = vmatpush1.bf16.msra.mxu0 %v3575_v33  ;;  %2818 = vmatpush1.bf16.msra.mxu1 %v3576_v6  ;;  %v5806_v6 = vld [vmem:[#allocation91_spill] sm:$0xff] }
 0x735   :  { %2778 = vmatprep.subr.bf16.mxu0 %v3577_v59  ;;  %2819 = vmatprep.subr.bf16.mxu1 %v3578_v39 }
 0x738   :  { %2779 = vmatpush1.bf16.msra.mxu0 %v3579_v29  ;;  %2820 = vmatpush1.bf16.msra.mxu1 %v3580_v11  ;;  %v5807_v29 = vld [vmem:[#allocation93_spill] sm:$0xff] }
 0x739   :  { %2780 = vmatprep.subr.bf16.mxu0 %v3581_v43  ;;  %2821 = vmatprep.subr.bf16.mxu1 %v3582_v48 }
 0x73c   :  { %2781 = vmatpush1.bf16.msra.mxu0 %v3583_v35  ;;  %2822 = vmatpush1.bf16.msra.mxu1 %v3584_v30 }
 0x73d   :  { %2782 = vmatprep.subr.bf16.mxu0 %v3585_v52  ;;  %2823 = vmatprep.subr.bf16.mxu1 %v3586_v53 }
 0x73e   :  { %v3428_v54 = vpop.eup %3427 }
 0x73f   :  { %v2638_v56 = vmul.f32 %v3428_v54, %v3426_v51 }
 0x740   :  { %2783 = vmatpush1.bf16.msra.mxu0 %v3587_v58  ;;  %2824 = vmatpush1.bf16.msra.mxu1 %v3588_v60 }
 0x741   :  { %3079 = vst [vmem:[%s5456_s9 + $0x8] sm:$0xff] %v2638_v56  ;;  %v2767_v40 = vpack.c.bf16 %v2638_v56, %v2638_v56 }
 0x743   :  { %2801 = vmatmul.mubr.bf16.vlgmr.msra.gmra.mxu0 %v2767_v40  ;;  %2842 = vmatmul.mubr.bf16.vlgmr.msra.gmra.mxu1 %v2767_v40 }
 0x7e3   :  { %v2685_v27 = vpop.f32.mrf.mxu0  ;;  %v2726_v50 = vpop.f32.mrf.mxu1 }
 0x7e4   :  { %v2733_v41 = vadd.f32 %v2685_v27, %v5800_v45  ;;  %v2735_v32 = vadd.f32 %v2726_v50, %v5802_v26 }
 0x7e5   :  { %v2687_v46 = vpop.f32.mrf.mxu0  ;;  %v2728_v44 = vpop.f32.mrf.mxu1 }
 0x7e6   :  { %v3080_v23 = vmul.f32 -1.442695, %v2733_v41  ;;  %v2734_v37 = vadd.f32 %v2687_v46, %v5801_v57  ;;  %v3082_v3 = vmul.f32 -1.442695, %v2735_v32  ;;  %v2736_v18 = vadd.f32 %v2728_v44, %v5803_v49 }
 0x7e7   :  { %v2689_v47 = vpop.f32.mrf.mxu0  ;;  %v2730_v22 = vpop.f32.mrf.mxu1 }
 0x7e8   :  { %3429 = vpow2.f32 %v3080_v23  ;;  %v3081_v16 = vmul.f32 -1.442695, %v2734_v37 }
 0x7e9   :  { %v2690_v36 = vpop.f32.mrf.mxu0  ;;  %v2731_v14 = vpop.f32.mrf.mxu1 }
 0x7ea   :  { %3431 = vpow2.f32 %v3081_v16 }
 0x7eb   :  { %3433 = vpow2.f32 %v3082_v3 }
 0x7ec   :  { %3435 = vtanh.f32 %v2736_v18 }
 0x7f5   :  { %v3430_v34 = vpop.eup %3429 }
 0x7f6   :  { %v2746_v20 = vadd.f32 1.0, %v3430_v34 }
 0x7f7   :  { %v3432_v61 = vpop.eup %3431 }
 0x7f8   :  { %3437 = vrcp.f32 %v2746_v20  ;;  %v2747_v1 = vadd.f32 1.0, %v3432_v61  ;;  %v3434_v55 = vpop.eup %3433 }
 0x7f9   :  { %v3436_v19 = vpop.eup %3435  ;;  %v2748_v31 = vadd.f32 1.0, %v3434_v55 }
 0x7fa   :  { %3439 = vrcp.f32 %v2747_v1 }
 0x803   :  { %v2802_v62 = vpop.f32.mrf.mxu0  ;;  %v2843_v13 = vpop.f32.mrf.mxu1 }
 0x804   :  { %v2850_v0 = vadd.f32 %v2802_v62, %v5804_v63  ;;  %v2852_v59 = vadd.f32 %v2843_v13, %v5806_v6 }
 0x805   :  { %v3438_v2 = vpop.eup %3437  ;;  %v2804_v42 = vpop.f32.mrf.mxu0 }
 0x806   :  { %v2845_v4 = vpop.f32.mrf.mxu1  ;;  %v2757_v28 = vmul.f32 %v3438_v2, %v3436_v19  ;;  %v3083_v24 = vmul.f32 -1.442695, %v2850_v0  ;;  %v2851_v17 = vadd.f32 %v2804_v42, %v5805_v10  ;;  %v3085_v39 = vmul.f32 -1.442695, %v2852_v59 }
 0x807   :  { %v3440_v15 = vpop.eup %3439  ;;  %v2806_v7 = vpop.f32.mrf.mxu0  ;;  %v2853_v11 = vadd.f32 %v2845_v4, %v5807_v29 }
 0x808   :  { %v2847_v5 = vpop.f32.mrf.mxu1  ;;  %v2756_v9 = vmul.f32 %v3440_v15, %v5324_v25  ;;  %3441 = vpow2.f32 %v3083_v24  ;;  %v3084_v38 = vmul.f32 -1.442695, %v2851_v17 }
 0x809   :  { %v2807_v12 = vpop.f32.mrf.mxu0 }
 0x80a   :  { %v2848_v8 = vpop.f32.mrf.mxu1  ;;  %v2758_v33 = vadd.f32 %v2757_v28, %v2756_v9  ;;  %3443 = vpow2.f32 %v3084_v38 }
 0x80b   :  { %3445 = vrcp.f32 %v2748_v31 }
 0x80c   :  { %3447 = vtanh.f32 %v2758_v33 }
 0x80d   :  { %3449 = vpow2.f32 %v3085_v39 }
 0x80e   :  { %3451 = vtanh.f32 %v2853_v11 }
 0x815   :  { %v3442_v43 = vpop.eup %3441 }
 0x816   :  { %v2863_v48 = vadd.f32 1.0, %v3442_v43 }
 0x817   :  { %v3444_v35 = vpop.eup %3443 }
 0x818   :  { %v3446_v30 = vpop.eup %3445  ;;  %3453 = vrcp.f32 %v2863_v48  ;;  %v2864_v25 = vadd.f32 1.0, %v3444_v35 }
 0x819   :  { %v3448_v51 = vpop.eup %3447 }
 0x81a   :  { %v2760_v52 = vmul.f32 %v3448_v51, %v3446_v30  ;;  %3455 = vrcp.f32 %v2864_v25  ;;  %v3450_v53 = vpop.eup %3449 }
 0x81b   :  { %v3452_v54 = vpop.eup %3451  ;;  %v2865_v40 = vadd.f32 1.0, %v3450_v53 }
 0x81c   :  { %3086 = vst [vmem:[%s5455_s8 + $0x38] sm:$0xff] %v2760_v52 }
 0x81d   :  { %3457 = vrcp.f32 %v2865_v40 }
 0x825   :  { %v3454_v56 = vpop.eup %3453 }
 0x826   :  { %v2874_v58 = vmul.f32 %v3454_v56, %v3452_v54 }
 0x827   :  { %v3456_v60 = vpop.eup %3455 }
 0x828   :  { %v2873_v27 = vmul.f32 %v3456_v60, %v5371_v21 }
 0x82a   :  { %v2875_v50 = vadd.f32 %v2874_v58, %v2873_v27  ;;  %v3458_v45 = vpop.eup %3457 }
 0x82c   :  { %3459 = vtanh.f32 %v2875_v50 }
 0x839   :  { %v3460_v41 = vpop.eup %3459 }
 0x83a   :  { %v2877_v46 = vmul.f32 %v3460_v41, %v3458_v45 }
 0x83c   :  { %2880 = vst [vmem:[%s5456_s9] sm:$0xff] %v2877_v46 }

</bundles_post_ra>
